<compile_context>
chip_gen: v6e
topology: v6e:2x2x1
jax: 0.10.0
libtpu: 0.0.40
codegen_flags: <defaults>
</compile_context>

<pallas_src>
import jax
import jax.numpy as jnp
from jax.experimental import pallas as pl
from jax.experimental.pallas import tpu as pltpu

# ----------------------------- config (small, synthetic) ----------------------
CONV_DIM = 32
CONV_KERNELS = [10, 3, 3, 3, 3, 2, 2]
CONV_STRIDES = [5, 2, 2, 2, 2, 2, 2]          # product = 320
HIDDEN = 32
HEADS = 4
HEAD_DIM = HIDDEN // HEADS
FFN = 64
LAYERS = 2
EPS = 1e-5


# ----------------------------- in-kernel helpers ------------------------------
def _mm(a, b):
    """a @ b: bf16 operands on the MXU, f32 accumulation."""
    return jax.lax.dot_general(
        a.astype(jnp.bfloat16), b.astype(jnp.bfloat16),
        dimension_numbers=(((1,), (0,)), ((), ())),
        preferred_element_type=jnp.float32)


def _mm_nt(a, b):
    """a @ b.T (contract last dims): bf16 operands, f32 accumulation."""
    return jax.lax.dot_general(
        a.astype(jnp.bfloat16), b.astype(jnp.bfloat16),
        dimension_numbers=(((1,), (1,)), ((), ())),
        preferred_element_type=jnp.float32)


def _gelu(x):
    return jax.nn.gelu(x, approximate=True)


def _ln(x, g, b, eps=EPS):
    m = jnp.mean(x, axis=-1, keepdims=True)
    v = jnp.mean(jnp.square(x - m), axis=-1, keepdims=True)
    return (x - m) * jax.lax.rsqrt(v + eps) * g + b


def _conv_out_len(t, k, s):
    return (t - k) // s + 1


# ----------------------------- single fused kernel ----------------------------
def _w2v2_kernel(patches_ref, w0_ref, gng_ref, gnb_ref,
                 cw1_ref, cw2_ref, cw3_ref, cw4_ref, cw5_ref, cw6_ref,
                 fplng_ref, fplnb_ref, fpw_ref, fpb_ref,
                 posw_ref, posb_ref, encg_ref, encb_ref,
                 qkvw_ref, qkvb_ref, ow_ref, ob_ref, lng_ref, lnb_ref,
                 wi_ref, bi_ref, wo_ref, bo_ref, flng_ref, flnb_ref,
                 out_ref, buf_a, buf_b):
    """One batch element per grid step.  Whole forward pass stays in VMEM."""
    t0 = patches_ref.shape[2]

    # ---- conv0 (kernel 10, stride 5), lane-dense (C, T0) layout -------------
    h_ct = _mm(w0_ref[...], patches_ref[0])                   # (C, T0) f32
    # GroupNorm (num_groups == C): per-channel stats over time via lane reduce (XLU)
    mean = jnp.mean(h_ct, axis=-1, keepdims=True)              # (C, 1)
    cent = h_ct - mean
    var = jnp.mean(cent * cent, axis=-1, keepdims=True)        # (C, 1)
    h_ct = cent * jax.lax.rsqrt(var + EPS) * gng_ref[...] + gnb_ref[...]
    h_ct = _gelu(h_ct)
    # stage as (T, C) for the strided-tap conv layers
    buf_a[...] = jnp.transpose(h_ct)                           # (T0, C)

    # ---- conv layers 1..6: strided sublane taps from VMEM scratch ------------
    conv_ws = (cw1_ref, cw2_ref, cw3_ref, cw4_ref, cw5_ref, cw6_ref)
    t_in = t0
    src, dst = buf_a, buf_b
    h = None
    for i, w_ref in enumerate(conv_ws):
        kk = CONV_KERNELS[i + 1]
        st = CONV_STRIDES[i + 1]
        t_out = _conv_out_len(t_in, kk, st)
        acc = _mm(src[pl.ds(0, t_out, stride=st), :], w_ref[0])
        for k in range(1, kk):
            acc = acc + _mm(src[pl.ds(k, t_out, stride=st), :], w_ref[k])
        h = _gelu(acc)                                          # (t_out, C)
        if i + 1 < len(conv_ws):
            dst[0:t_out, :] = h
            src, dst = dst, src
        t_in = t_out
    feats = h                                                   # (S, C) f32
    s_len = feats.shape[0]

    # ---- feature projection: LayerNorm over conv dim + Linear ----------------
    x = _ln(feats, fplng_ref[...], fplnb_ref[...])
    h = _mm(x, fpw_ref[...]) + fpb_ref[...]                     # (S, H)

    # ---- positional conv (kernel 3, same pad) via rolls + edge masking -------
    row = jax.lax.broadcasted_iota(jnp.int32, (s_len, 1), 0)
    h_prev = jnp.where(row >= 1, pltpu.roll(h, shift=1, axis=0), 0.0)
    h_next = jnp.where(row <= s_len - 2, pltpu.roll(h, shift=s_len - 1, axis=0), 0.0)
    pos = _mm(h_prev, posw_ref[0]) + _mm(h, posw_ref[1]) + _mm(h_next, posw_ref[2])
    pos = _gelu(pos + posb_ref[...])
    h = _ln(h + pos, encg_ref[...], encb_ref[...])
    out_ref[0, 0] = h.astype(out_ref.dtype)

    # ---- transformer layers (per-batch full attention == old block-diag mask)
    scale = HEAD_DIM ** -0.5
    for li in range(LAYERS):
        qkv = _mm(h, qkvw_ref[li]) + qkvb_ref[li]               # (S, 3H)
        ctx = []
        for hd in range(HEADS):
            lo, hi = hd * HEAD_DIM, (hd + 1) * HEAD_DIM
            q = qkv[:, lo:hi] * scale
            k_ = qkv[:, HIDDEN + lo:HIDDEN + hi]
            v = qkv[:, 2 * HIDDEN + lo:2 * HIDDEN + hi]
            s_ = _mm_nt(q, k_)                                  # (S, S)
            s_ = s_ - jnp.max(s_, axis=-1, keepdims=True)
            p = jnp.exp(s_)
            p = p * pl.reciprocal(jnp.sum(p, axis=-1, keepdims=True), approx=True)
            ctx.append(_mm(p, v))                               # (S, Dh)
        ctx = jnp.concatenate(ctx, axis=-1)                     # (S, H)
        attn = _mm(ctx, ow_ref[li]) + ob_ref[li]                # single output proj

        h = _ln(h + attn, lng_ref[li], lnb_ref[li])
        ff = _gelu(_mm(h, wi_ref[li]) + bi_ref[li])
        ff = _mm(ff, wo_ref[li]) + bo_ref[li]
        h = _ln(h + ff, flng_ref[li], flnb_ref[li])
        out_ref[li + 1, 0] = h.astype(out_ref.dtype)


# ----------------------------- wrapper / JAX glue ------------------------------
def wav2vec2_forward(params, x):
    """x: (B, T_samples) raw audio -> stacked hidden states (LAYERS+1, B, S, HIDDEN)."""
    B, T = x.shape
    C = CONV_DIM
    K0, S0 = CONV_KERNELS[0], CONV_STRIDES[0]
    T0 = _conv_out_len(T, K0, S0)

    lens = [T0]
    for i in range(1, len(CONV_KERNELS)):
        lens.append(_conv_out_len(lens[-1], CONV_KERNELS[i], CONV_STRIDES[i]))
    S = lens[-1]

    # lane-dense im2col for conv0: (B, K0, T0), time on lanes
    idx = jnp.arange(K0)[:, None] + jnp.arange(T0)[None, :] * S0        # (K0, T0)
    patches0 = x[:, idx].astype(jnp.bfloat16)                           # (B, K0, T0)
    w0c = params["conv0_w"][:, 0, :].astype(jnp.bfloat16)               # (C, K0)

    # per-tap conv weights, pre-cast bf16: W_k[c_in, c_out]
    conv_w = []
    for i in range(1, len(CONV_KERNELS)):
        w = params[f"conv{i}_w"]                                        # (C, C, K)
        conv_w.append(jnp.stack([w[:, :, k].T for k in range(CONV_KERNELS[i])]
                                ).astype(jnp.bfloat16))                 # (K, C, C)

    kp = params["pos_w"].shape[-1]
    pos_wk = jnp.stack([params["pos_w"][:, :, k].T for k in range(kp)]
                       ).astype(jnp.bfloat16)                           # (Kp, H, H)

    def lstack(name, dtype=jnp.float32):
        return jnp.stack([params[f"layer{l}"][name] for l in range(LAYERS)]).astype(dtype)

    qkv_w = jnp.stack([jnp.concatenate([params[f"layer{l}"]["q_w"],
                                        params[f"layer{l}"]["k_w"],
                                        params[f"layer{l}"]["v_w"]], axis=1)
                       for l in range(LAYERS)]).astype(jnp.bfloat16)    # (L, H, 3H)
    qkv_b = jnp.stack([jnp.concatenate([params[f"layer{l}"]["q_b"],
                                        params[f"layer{l}"]["k_b"],
                                        params[f"layer{l}"]["v_b"]])[None, :]
                       for l in range(LAYERS)])                          # (L, 1, 3H)

    inputs = [
        patches0, w0c,
        params["gn_g"].reshape(C, 1), params["gn_b"].reshape(C, 1),
        *conv_w,
        params["fp_ln_g"].reshape(1, C), params["fp_ln_b"].reshape(1, C),
        params["fp_w"].astype(jnp.bfloat16), params["fp_b"].reshape(1, HIDDEN),
        pos_wk, params["pos_b"].reshape(1, HIDDEN),
        params["enc_ln_g"].reshape(1, HIDDEN), params["enc_ln_b"].reshape(1, HIDDEN),
        qkv_w, qkv_b,
        lstack("o_w", jnp.bfloat16), lstack("o_b")[:, None, :],
        lstack("ln_g")[:, None, :], lstack("ln_b")[:, None, :],
        lstack("wi", jnp.bfloat16), lstack("bi")[:, None, :],
        lstack("wo", jnp.bfloat16), lstack("bo")[:, None, :],
        lstack("fln_g")[:, None, :], lstack("fln_b")[:, None, :],
    ]

    in_specs = [pl.BlockSpec((1, K0, T0), lambda b: (b, 0, 0))]
    for a in inputs[1:]:
        nd = a.ndim
        in_specs.append(pl.BlockSpec(a.shape, lambda b, _nd=nd: (0,) * _nd))

    hs = pl.pallas_call(
        _w2v2_kernel,
        out_shape=jax.ShapeDtypeStruct((LAYERS + 1, B, S, HIDDEN), jnp.float32),
        grid=(B,),
        in_specs=in_specs,
        out_specs=pl.BlockSpec((LAYERS + 1, 1, S, HIDDEN), lambda b: (0, b, 0, 0)),
        scratch_shapes=[pltpu.VMEM((T0, C), jnp.float32),     # ping-pong activation buffers
                        pltpu.VMEM((T0, C), jnp.float32)],
        compiler_params=pltpu.CompilerParams(
            dimension_semantics=("parallel",),
            vmem_limit_bytes=32 * 1024 * 1024),
    )(*inputs)
    return hs


# ----------------------------- deterministic parameter init --------------------
def init_params(key):
    def nxt():
        nonlocal key
        key, sub = jax.random.split(key)
        return sub

    def w(shape):
        return (0.02 * jax.random.normal(nxt(), shape)).astype(jnp.float32)

    p = {}
    ci = 1
    for i, k in enumerate(CONV_KERNELS):
        p[f"conv{i}_w"] = w((CONV_DIM, ci, k))
        ci = CONV_DIM
    p["gn_g"] = jnp.ones((CONV_DIM,), jnp.float32)
    p["gn_b"] = jnp.zeros((CONV_DIM,), jnp.float32)
    p["fp_ln_g"] = jnp.ones((CONV_DIM,), jnp.float32)
    p["fp_ln_b"] = jnp.zeros((CONV_DIM,), jnp.float32)
    p["fp_w"] = w((CONV_DIM, HIDDEN))
    p["fp_b"] = jnp.zeros((HIDDEN,), jnp.float32)
    p["pos_w"] = w((HIDDEN, HIDDEN, 3))
    p["pos_b"] = jnp.zeros((HIDDEN,), jnp.float32)
    p["enc_ln_g"] = jnp.ones((HIDDEN,), jnp.float32)
    p["enc_ln_b"] = jnp.zeros((HIDDEN,), jnp.float32)
    for li in range(LAYERS):
        lp = {
            "q_w": w((HIDDEN, HIDDEN)), "q_b": jnp.zeros((HIDDEN,), jnp.float32),
            "k_w": w((HIDDEN, HIDDEN)), "k_b": jnp.zeros((HIDDEN,), jnp.float32),
            "v_w": w((HIDDEN, HIDDEN)), "v_b": jnp.zeros((HIDDEN,), jnp.float32),
            "o_w": w((HIDDEN, HIDDEN)), "o_b": jnp.zeros((HIDDEN,), jnp.float32),
            "ln_g": jnp.ones((HIDDEN,), jnp.float32), "ln_b": jnp.zeros((HIDDEN,), jnp.float32),
            "wi": w((HIDDEN, FFN)), "bi": jnp.zeros((FFN,), jnp.float32),
            "wo": w((FFN, HIDDEN)), "bo": jnp.zeros((HIDDEN,), jnp.float32),
            "fln_g": jnp.ones((HIDDEN,), jnp.float32), "fln_b": jnp.zeros((HIDDEN,), jnp.float32),
        }
        p[f"layer{li}"] = lp
    return p


# ----------------------------- main ---------------------------------------------
if __name__ == "__main__":
    key = jax.random.PRNGKey(0)
    key, pk, xk = jax.random.split(key, 3)
    params = init_params(pk)

    B, T = 2, 1600                                   # 1600 samples -> 4 frames
    x = jax.random.normal(xk, (B, T), dtype=jnp.float32)

    fwd = jax.jit(wav2vec2_forward)
    out = fwd(params, x)
    out = jax.block_until_ready(out)

    expected = (LAYERS + 1, B, 4, HIDDEN)
    assert out.shape == expected, (out.shape, expected)
    assert bool(jnp.all(jnp.isfinite(out)))
    print("KERNEL_OK")
</pallas_src>

<mosaic_0001>
module attributes {stable_mosaic.version = 11 : i64} {
  func.func @_w2v2_kernel(%arg0: i32, %arg1: memref<1x10x319xbf16, #tpu.memory_space<vmem>>, %arg2: memref<32x10xbf16, #tpu.memory_space<vmem>>, %arg3: memref<32x1xf32, #tpu.memory_space<vmem>>, %arg4: memref<32x1xf32, #tpu.memory_space<vmem>>, %arg5: memref<3x32x32xbf16, #tpu.memory_space<vmem>>, %arg6: memref<3x32x32xbf16, #tpu.memory_space<vmem>>, %arg7: memref<3x32x32xbf16, #tpu.memory_space<vmem>>, %arg8: memref<3x32x32xbf16, #tpu.memory_space<vmem>>, %arg9: memref<2x32x32xbf16, #tpu.memory_space<vmem>>, %arg10: memref<2x32x32xbf16, #tpu.memory_space<vmem>>, %arg11: memref<1x32xf32, #tpu.memory_space<vmem>>, %arg12: memref<1x32xf32, #tpu.memory_space<vmem>>, %arg13: memref<32x32xbf16, #tpu.memory_space<vmem>>, %arg14: memref<1x32xf32, #tpu.memory_space<vmem>>, %arg15: memref<3x32x32xbf16, #tpu.memory_space<vmem>>, %arg16: memref<1x32xf32, #tpu.memory_space<vmem>>, %arg17: memref<1x32xf32, #tpu.memory_space<vmem>>, %arg18: memref<1x32xf32, #tpu.memory_space<vmem>>, %arg19: memref<2x32x96xbf16, #tpu.memory_space<vmem>>, %arg20: memref<2x1x96xf32, #tpu.memory_space<vmem>>, %arg21: memref<2x32x32xbf16, #tpu.memory_space<vmem>>, %arg22: memref<2x1x32xf32, #tpu.memory_space<vmem>>, %arg23: memref<2x1x32xf32, #tpu.memory_space<vmem>>, %arg24: memref<2x1x32xf32, #tpu.memory_space<vmem>>, %arg25: memref<2x32x64xbf16, #tpu.memory_space<vmem>>, %arg26: memref<2x1x64xf32, #tpu.memory_space<vmem>>, %arg27: memref<2x64x32xbf16, #tpu.memory_space<vmem>>, %arg28: memref<2x1x32xf32, #tpu.memory_space<vmem>>, %arg29: memref<2x1x32xf32, #tpu.memory_space<vmem>>, %arg30: memref<2x1x32xf32, #tpu.memory_space<vmem>>, %arg31: memref<3x1x4x32xf32, #tpu.memory_space<vmem>>, %arg32: memref<319x32xf32, #tpu.memory_space<vmem>>, %arg33: memref<319x32xf32, #tpu.memory_space<vmem>>) attributes {dimension_semantics = [#tpu.dimension_semantics<parallel>], iteration_bounds = array<i64: 2>, scalar_prefetch = 0 : i64, scratch_operands = 2 : i64, tpu.core_type = #tpu.core_type<tc>, window_params = [{transform_indices = @transform_0, window_bounds = array<i64: 1, 10, 319>}, {pipeline_mode = #tpu.pipeline_mode<synchronous>, transform_indices = @transform_1, window_bounds = array<i64: 32, 10>}, {pipeline_mode = #tpu.pipeline_mode<synchronous>, transform_indices = @transform_2, window_bounds = array<i64: 32, 1>}, {pipeline_mode = #tpu.pipeline_mode<synchronous>, transform_indices = @transform_3, window_bounds = array<i64: 32, 1>}, {pipeline_mode = #tpu.pipeline_mode<synchronous>, transform_indices = @transform_4, window_bounds = array<i64: 3, 32, 32>}, {pipeline_mode = #tpu.pipeline_mode<synchronous>, transform_indices = @transform_5, window_bounds = array<i64: 3, 32, 32>}, {pipeline_mode = #tpu.pipeline_mode<synchronous>, transform_indices = @transform_6, window_bounds = array<i64: 3, 32, 32>}, {pipeline_mode = #tpu.pipeline_mode<synchronous>, transform_indices = @transform_7, window_bounds = array<i64: 3, 32, 32>}, {pipeline_mode = #tpu.pipeline_mode<synchronous>, transform_indices = @transform_8, window_bounds = array<i64: 2, 32, 32>}, {pipeline_mode = #tpu.pipeline_mode<synchronous>, transform_indices = @transform_9, window_bounds = array<i64: 2, 32, 32>}, {pipeline_mode = #tpu.pipeline_mode<synchronous>, transform_indices = @transform_10, window_bounds = array<i64: 1, 32>}, {pipeline_mode = #tpu.pipeline_mode<synchronous>, transform_indices = @transform_11, window_bounds = array<i64: 1, 32>}, {pipeline_mode = #tpu.pipeline_mode<synchronous>, transform_indices = @transform_12, window_bounds = array<i64: 32, 32>}, {pipeline_mode = #tpu.pipeline_mode<synchronous>, transform_indices = @transform_13, window_bounds = array<i64: 1, 32>}, {pipeline_mode = #tpu.pipeline_mode<synchronous>, transform_indices = @transform_14, window_bounds = array<i64: 3, 32, 32>}, {pipeline_mode = #tpu.pipeline_mode<synchronous>, transform_indices = @transform_15, window_bounds = array<i64: 1, 32>}, {pipeline_mode = #tpu.pipeline_mode<synchronous>, transform_indices = @transform_16, window_bounds = array<i64: 1, 32>}, {pipeline_mode = #tpu.pipeline_mode<synchronous>, transform_indices = @transform_17, window_bounds = array<i64: 1, 32>}, {pipeline_mode = #tpu.pipeline_mode<synchronous>, transform_indices = @transform_18, window_bounds = array<i64: 2, 32, 96>}, {pipeline_mode = #tpu.pipeline_mode<synchronous>, transform_indices = @transform_19, window_bounds = array<i64: 2, 1, 96>}, {pipeline_mode = #tpu.pipeline_mode<synchronous>, transform_indices = @transform_20, window_bounds = array<i64: 2, 32, 32>}, {pipeline_mode = #tpu.pipeline_mode<synchronous>, transform_indices = @transform_21, window_bounds = array<i64: 2, 1, 32>}, {pipeline_mode = #tpu.pipeline_mode<synchronous>, transform_indices = @transform_22, window_bounds = array<i64: 2, 1, 32>}, {pipeline_mode = #tpu.pipeline_mode<synchronous>, transform_indices = @transform_23, window_bounds = array<i64: 2, 1, 32>}, {pipeline_mode = #tpu.pipeline_mode<synchronous>, transform_indices = @transform_24, window_bounds = array<i64: 2, 32, 64>}, {pipeline_mode = #tpu.pipeline_mode<synchronous>, transform_indices = @transform_25, window_bounds = array<i64: 2, 1, 64>}, {pipeline_mode = #tpu.pipeline_mode<synchronous>, transform_indices = @transform_26, window_bounds = array<i64: 2, 64, 32>}, {pipeline_mode = #tpu.pipeline_mode<synchronous>, transform_indices = @transform_27, window_bounds = array<i64: 2, 1, 32>}, {pipeline_mode = #tpu.pipeline_mode<synchronous>, transform_indices = @transform_28, window_bounds = array<i64: 2, 1, 32>}, {pipeline_mode = #tpu.pipeline_mode<synchronous>, transform_indices = @transform_29, window_bounds = array<i64: 2, 1, 32>}, {transform_indices = @transform_30, window_bounds = array<i64: 3, 1, 4, 32>}]} {
    %c0 = arith.constant 0 : index
    %c0_0 = arith.constant 0 : index
    %0 = vector.load %arg2[%c0, %c0_0] : memref<32x10xbf16, #tpu.memory_space<vmem>>, vector<32x10xbf16>
    %c0_1 = arith.constant 0 : index
    %c0_2 = arith.constant 0 : index
    %c0_3 = arith.constant 0 : index
    %1 = vector.load %arg1[%c0_1, %c0_2, %c0_3] : memref<1x10x319xbf16, #tpu.memory_space<vmem>>, vector<1x10x319xbf16>
    %2 = vector.shape_cast %1 : vector<1x10x319xbf16> to vector<10x319xbf16>
    %cst = arith.constant dense<0.000000e+00> : vector<32x319xf32>
    %3 = tpu.matmul %0, %2, %cst {dimension_numbers = #tpu.dot_dimension_numbers<[1], [0], [0], [1], [0, 0, 1, 1], [], []>} : vector<32x10xbf16>, vector<10x319xbf16>, vector<32x319xf32> -> vector<32x319xf32>
    %cst_4 = arith.constant dense<0.000000e+00> : vector<32xf32>
    %4 = vector.multi_reduction <add>, %3, %cst_4 [1] : vector<32x319xf32> to vector<32xf32>
    %5 = vector.shape_cast %4 : vector<32xf32> to vector<32x1xf32>
    %cst_5 = arith.constant 3.190000e+02 : f32
    %6 = vector.broadcast %cst_5 : f32 to vector<32x1xf32>
    %7 = arith.divf %5, %6 : vector<32x1xf32>
    %8 = vector.broadcast %7 : vector<32x1xf32> to vector<32x319xf32>
    %9 = arith.subf %3, %8 : vector<32x319xf32>
    %10 = arith.mulf %9, %9 : vector<32x319xf32>
    %cst_6 = arith.constant dense<0.000000e+00> : vector<32xf32>
    %11 = vector.multi_reduction <add>, %10, %cst_6 [1] : vector<32x319xf32> to vector<32xf32>
    %12 = vector.shape_cast %11 : vector<32xf32> to vector<32x1xf32>
    %cst_7 = arith.constant 3.190000e+02 : f32
    %13 = vector.broadcast %cst_7 : f32 to vector<32x1xf32>
    %14 = arith.divf %12, %13 : vector<32x1xf32>
    %cst_8 = arith.constant 9.99999974E-6 : f32
    %15 = vector.broadcast %cst_8 : f32 to vector<32x1xf32>
    %16 = arith.addf %14, %15 : vector<32x1xf32>
    %17 = math.rsqrt %16 : vector<32x1xf32>
    %18 = vector.broadcast %17 : vector<32x1xf32> to vector<32x319xf32>
    %19 = arith.mulf %9, %18 : vector<32x319xf32>
    %c0_9 = arith.constant 0 : index
    %c0_10 = arith.constant 0 : index
    %20 = vector.load %arg3[%c0_9, %c0_10] : memref<32x1xf32, #tpu.memory_space<vmem>>, vector<32x1xf32>
    %21 = vector.broadcast %20 : vector<32x1xf32> to vector<32x319xf32>
    %22 = arith.mulf %19, %21 : vector<32x319xf32>
    %c0_11 = arith.constant 0 : index
    %c0_12 = arith.constant 0 : index
    %23 = vector.load %arg4[%c0_11, %c0_12] : memref<32x1xf32, #tpu.memory_space<vmem>>, vector<32x1xf32>
    %24 = vector.broadcast %23 : vector<32x1xf32> to vector<32x319xf32>
    %25 = arith.addf %22, %24 : vector<32x319xf32>
    %26 = arith.mulf %25, %25 : vector<32x319xf32>
    %27 = arith.mulf %25, %26 : vector<32x319xf32>
    %cst_13 = arith.constant 4.471500e-02 : f32
    %28 = vector.broadcast %cst_13 : f32 to vector<32x319xf32>
    %29 = arith.mulf %28, %27 : vector<32x319xf32>
    %30 = arith.addf %25, %29 : vector<32x319xf32>
    %cst_14 = arith.constant 0.797884583 : f32
    %31 = vector.broadcast %cst_14 : f32 to vector<32x319xf32>
    %32 = arith.mulf %31, %30 : vector<32x319xf32>
    %33 = math.tanh %32 : vector<32x319xf32>
    %cst_15 = arith.constant 1.000000e+00 : f32
    %34 = vector.broadcast %cst_15 : f32 to vector<32x319xf32>
    %35 = arith.addf %34, %33 : vector<32x319xf32>
    %cst_16 = arith.constant 5.000000e-01 : f32
    %36 = vector.broadcast %cst_16 : f32 to vector<32x319xf32>
    %37 = arith.mulf %36, %35 : vector<32x319xf32>
    %38 = arith.mulf %25, %37 : vector<32x319xf32>
    %39 = tpu.transpose %38, [1, 0] : vector<32x319xf32> -> vector<319x32xf32>
    %c0_17 = arith.constant 0 : index
    %c0_18 = arith.constant 0 : index
    %40 = vector.load %arg32[%c0_17, %c0_18] : memref<319x32xf32, #tpu.memory_space<vmem>>, vector<319x32xf32>
    tpu.vector_store %arg32[%c0_17, %c0_18], %39 {strides = array<i32>} : memref<319x32xf32, #tpu.memory_space<vmem>>, vector<319x32xf32>,
    %c0_19 = arith.constant 0 : index
    %c0_20 = arith.constant 0 : index
    %41 = tpu.strided_load %arg32[%c0_19, %c0_20] {strides = array<i32: 2, 1>} : memref<319x32xf32, #tpu.memory_space<vmem>>, vector<159x32xf32>
    %c0_21 = arith.constant 0 : index
    %c0_22 = arith.constant 0 : index
    %c0_23 = arith.constant 0 : index
    %42 = vector.load %arg5[%c0_21, %c0_22, %c0_23] : memref<3x32x32xbf16, #tpu.memory_space<vmem>>, vector<1x32x32xbf16>
    %43 = vector.shape_cast %42 : vector<1x32x32xbf16> to vector<32x32xbf16>
    %44 = arith.truncf %41 : vector<159x32xf32> to vector<159x32xbf16>
    %cst_24 = arith.constant dense<0.000000e+00> : vector<159x32xf32>
    %45 = tpu.matmul %44, %43, %cst_24 {dimension_numbers = #tpu.dot_dimension_numbers<[1], [0], [0], [1], [0, 0, 1, 1], [], []>} : vector<159x32xbf16>, vector<32x32xbf16>, vector<159x32xf32> -> vector<159x32xf32>
    %c1 = arith.constant 1 : index
    %c0_25 = arith.constant 0 : index
    %46 = tpu.strided_load %arg32[%c1, %c0_25] {strides = array<i32: 2, 1>} : memref<319x32xf32, #tpu.memory_space<vmem>>, vector<159x32xf32>
    %c1_26 = arith.constant 1 : index
    %c0_27 = arith.constant 0 : index
    %c0_28 = arith.constant 0 : index
    %47 = vector.load %arg5[%c1_26, %c0_27, %c0_28] : memref<3x32x32xbf16, #tpu.memory_space<vmem>>, vector<1x32x32xbf16>
    %48 = vector.shape_cast %47 : vector<1x32x32xbf16> to vector<32x32xbf16>
    %49 = arith.truncf %46 : vector<159x32xf32> to vector<159x32xbf16>
    %cst_29 = arith.constant dense<0.000000e+00> : vector<159x32xf32>
    %50 = tpu.matmul %49, %48, %cst_29 {dimension_numbers = #tpu.dot_dimension_numbers<[1], [0], [0], [1], [0, 0, 1, 1], [], []>} : vector<159x32xbf16>, vector<32x32xbf16>, vector<159x32xf32> -> vector<159x32xf32>
    %51 = arith.addf %45, %50 : vector<159x32xf32>
    %c2 = arith.constant 2 : index
    %c0_30 = arith.constant 0 : index
    %52 = tpu.strided_load %arg32[%c2, %c0_30] {strides = array<i32: 2, 1>} : memref<319x32xf32, #tpu.memory_space<vmem>>, vector<159x32xf32>
    %c2_31 = arith.constant 2 : index
    %c0_32 = arith.constant 0 : index
    %c0_33 = arith.constant 0 : index
    %53 = vector.load %arg5[%c2_31, %c0_32, %c0_33] : memref<3x32x32xbf16, #tpu.memory_space<vmem>>, vector<1x32x32xbf16>
    %54 = vector.shape_cast %53 : vector<1x32x32xbf16> to vector<32x32xbf16>
    %55 = arith.truncf %52 : vector<159x32xf32> to vector<159x32xbf16>
    %cst_34 = arith.constant dense<0.000000e+00> : vector<159x32xf32>
    %56 = tpu.matmul %55, %54, %cst_34 {dimension_numbers = #tpu.dot_dimension_numbers<[1], [0], [0], [1], [0, 0, 1, 1], [], []>} : vector<159x32xbf16>, vector<32x32xbf16>, vector<159x32xf32> -> vector<159x32xf32>
    %57 = arith.addf %51, %56 : vector<159x32xf32>
    %58 = arith.mulf %57, %57 : vector<159x32xf32>
    %59 = arith.mulf %57, %58 : vector<159x32xf32>
    %cst_35 = arith.constant 4.471500e-02 : f32
    %60 = vector.broadcast %cst_35 : f32 to vector<159x32xf32>
    %61 = arith.mulf %60, %59 : vector<159x32xf32>
    %62 = arith.addf %57, %61 : vector<159x32xf32>
    %cst_36 = arith.constant 0.797884583 : f32
    %63 = vector.broadcast %cst_36 : f32 to vector<159x32xf32>
    %64 = arith.mulf %63, %62 : vector<159x32xf32>
    %65 = math.tanh %64 : vector<159x32xf32>
    %cst_37 = arith.constant 1.000000e+00 : f32
    %66 = vector.broadcast %cst_37 : f32 to vector<159x32xf32>
    %67 = arith.addf %66, %65 : vector<159x32xf32>
    %cst_38 = arith.constant 5.000000e-01 : f32
    %68 = vector.broadcast %cst_38 : f32 to vector<159x32xf32>
    %69 = arith.mulf %68, %67 : vector<159x32xf32>
    %70 = arith.mulf %57, %69 : vector<159x32xf32>
    %c0_39 = arith.constant 0 : index
    %c0_40 = arith.constant 0 : index
    %71 = vector.load %arg33[%c0_39, %c0_40] : memref<319x32xf32, #tpu.memory_space<vmem>>, vector<159x32xf32>
    tpu.vector_store %arg33[%c0_39, %c0_40], %70 {strides = array<i32>} : memref<319x32xf32, #tpu.memory_space<vmem>>, vector<159x32xf32>,
    %c0_41 = arith.constant 0 : index
    %c0_42 = arith.constant 0 : index
    %72 = tpu.strided_load %arg33[%c0_41, %c0_42] {strides = array<i32: 2, 1>} : memref<319x32xf32, #tpu.memory_space<vmem>>, vector<79x32xf32>
    %c0_43 = arith.constant 0 : index
    %c0_44 = arith.constant 0 : index
    %c0_45 = arith.constant 0 : index
    %73 = vector.load %arg6[%c0_43, %c0_44, %c0_45] : memref<3x32x32xbf16, #tpu.memory_space<vmem>>, vector<1x32x32xbf16>
    %74 = vector.shape_cast %73 : vector<1x32x32xbf16> to vector<32x32xbf16>
    %75 = arith.truncf %72 : vector<79x32xf32> to vector<79x32xbf16>
    %cst_46 = arith.constant dense<0.000000e+00> : vector<79x32xf32>
    %76 = tpu.matmul %75, %74, %cst_46 {dimension_numbers = #tpu.dot_dimension_numbers<[1], [0], [0], [1], [0, 0, 1, 1], [], []>} : vector<79x32xbf16>, vector<32x32xbf16>, vector<79x32xf32> -> vector<79x32xf32>
    %c1_47 = arith.constant 1 : index
    %c0_48 = arith.constant 0 : index
    %77 = tpu.strided_load %arg33[%c1_47, %c0_48] {strides = array<i32: 2, 1>} : memref<319x32xf32, #tpu.memory_space<vmem>>, vector<79x32xf32>
    %c1_49 = arith.constant 1 : index
    %c0_50 = arith.constant 0 : index
    %c0_51 = arith.constant 0 : index
    %78 = vector.load %arg6[%c1_49, %c0_50, %c0_51] : memref<3x32x32xbf16, #tpu.memory_space<vmem>>, vector<1x32x32xbf16>
    %79 = vector.shape_cast %78 : vector<1x32x32xbf16> to vector<32x32xbf16>
    %80 = arith.truncf %77 : vector<79x32xf32> to vector<79x32xbf16>
    %cst_52 = arith.constant dense<0.000000e+00> : vector<79x32xf32>
    %81 = tpu.matmul %80, %79, %cst_52 {dimension_numbers = #tpu.dot_dimension_numbers<[1], [0], [0], [1], [0, 0, 1, 1], [], []>} : vector<79x32xbf16>, vector<32x32xbf16>, vector<79x32xf32> -> vector<79x32xf32>
    %82 = arith.addf %76, %81 : vector<79x32xf32>
    %c2_53 = arith.constant 2 : index
    %c0_54 = arith.constant 0 : index
    %83 = tpu.strided_load %arg33[%c2_53, %c0_54] {strides = array<i32: 2, 1>} : memref<319x32xf32, #tpu.memory_space<vmem>>, vector<79x32xf32>
    %c2_55 = arith.constant 2 : index
    %c0_56 = arith.constant 0 : index
    %c0_57 = arith.constant 0 : index
    %84 = vector.load %arg6[%c2_55, %c0_56, %c0_57] : memref<3x32x32xbf16, #tpu.memory_space<vmem>>, vector<1x32x32xbf16>
    %85 = vector.shape_cast %84 : vector<1x32x32xbf16> to vector<32x32xbf16>
    %86 = arith.truncf %83 : vector<79x32xf32> to vector<79x32xbf16>
    %cst_58 = arith.constant dense<0.000000e+00> : vector<79x32xf32>
    %87 = tpu.matmul %86, %85, %cst_58 {dimension_numbers = #tpu.dot_dimension_numbers<[1], [0], [0], [1], [0, 0, 1, 1], [], []>} : vector<79x32xbf16>, vector<32x32xbf16>, vector<79x32xf32> -> vector<79x32xf32>
    %88 = arith.addf %82, %87 : vector<79x32xf32>
    %89 = arith.mulf %88, %88 : vector<79x32xf32>
    %90 = arith.mulf %88, %89 : vector<79x32xf32>
    %cst_59 = arith.constant 4.471500e-02 : f32
    %91 = vector.broadcast %cst_59 : f32 to vector<79x32xf32>
    %92 = arith.mulf %91, %90 : vector<79x32xf32>
    %93 = arith.addf %88, %92 : vector<79x32xf32>
    %cst_60 = arith.constant 0.797884583 : f32
    %94 = vector.broadcast %cst_60 : f32 to vector<79x32xf32>
    %95 = arith.mulf %94, %93 : vector<79x32xf32>
    %96 = math.tanh %95 : vector<79x32xf32>
    %cst_61 = arith.constant 1.000000e+00 : f32
    %97 = vector.broadcast %cst_61 : f32 to vector<79x32xf32>
    %98 = arith.addf %97, %96 : vector<79x32xf32>
    %cst_62 = arith.constant 5.000000e-01 : f32
    %99 = vector.broadcast %cst_62 : f32 to vector<79x32xf32>
    %100 = arith.mulf %99, %98 : vector<79x32xf32>
    %101 = arith.mulf %88, %100 : vector<79x32xf32>
    %c0_63 = arith.constant 0 : index
    %c0_64 = arith.constant 0 : index
    %102 = vector.load %arg32[%c0_63, %c0_64] : memref<319x32xf32, #tpu.memory_space<vmem>>, vector<79x32xf32>
    tpu.vector_store %arg32[%c0_63, %c0_64], %101 {strides = array<i32>} : memref<319x32xf32, #tpu.memory_space<vmem>>, vector<79x32xf32>,
    %c0_65 = arith.constant 0 : index
    %c0_66 = arith.constant 0 : index
    %103 = tpu.strided_load %arg32[%c0_65, %c0_66] {strides = array<i32: 2, 1>} : memref<319x32xf32, #tpu.memory_space<vmem>>, vector<39x32xf32>
    %c0_67 = arith.constant 0 : index
    %c0_68 = arith.constant 0 : index
    %c0_69 = arith.constant 0 : index
    %104 = vector.load %arg7[%c0_67, %c0_68, %c0_69] : memref<3x32x32xbf16, #tpu.memory_space<vmem>>, vector<1x32x32xbf16>
    %105 = vector.shape_cast %104 : vector<1x32x32xbf16> to vector<32x32xbf16>
    %106 = arith.truncf %103 : vector<39x32xf32> to vector<39x32xbf16>
    %cst_70 = arith.constant dense<0.000000e+00> : vector<39x32xf32>
    %107 = tpu.matmul %106, %105, %cst_70 {dimension_numbers = #tpu.dot_dimension_numbers<[1], [0], [0], [1], [0, 0, 1, 1], [], []>} : vector<39x32xbf16>, vector<32x32xbf16>, vector<39x32xf32> -> vector<39x32xf32>
    %c1_71 = arith.constant 1 : index
    %c0_72 = arith.constant 0 : index
    %108 = tpu.strided_load %arg32[%c1_71, %c0_72] {strides = array<i32: 2, 1>} : memref<319x32xf32, #tpu.memory_space<vmem>>, vector<39x32xf32>
    %c1_73 = arith.constant 1 : index
    %c0_74 = arith.constant 0 : index
    %c0_75 = arith.constant 0 : index
    %109 = vector.load %arg7[%c1_73, %c0_74, %c0_75] : memref<3x32x32xbf16, #tpu.memory_space<vmem>>, vector<1x32x32xbf16>
    %110 = vector.shape_cast %109 : vector<1x32x32xbf16> to vector<32x32xbf16>
    %111 = arith.truncf %108 : vector<39x32xf32> to vector<39x32xbf16>
    %cst_76 = arith.constant dense<0.000000e+00> : vector<39x32xf32>
    %112 = tpu.matmul %111, %110, %cst_76 {dimension_numbers = #tpu.dot_dimension_numbers<[1], [0], [0], [1], [0, 0, 1, 1], [], []>} : vector<39x32xbf16>, vector<32x32xbf16>, vector<39x32xf32> -> vector<39x32xf32>
    %113 = arith.addf %107, %112 : vector<39x32xf32>
    %c2_77 = arith.constant 2 : index
    %c0_78 = arith.constant 0 : index
    %114 = tpu.strided_load %arg32[%c2_77, %c0_78] {strides = array<i32: 2, 1>} : memref<319x32xf32, #tpu.memory_space<vmem>>, vector<39x32xf32>
    %c2_79 = arith.constant 2 : index
    %c0_80 = arith.constant 0 : index
    %c0_81 = arith.constant 0 : index
    %115 = vector.load %arg7[%c2_79, %c0_80, %c0_81] : memref<3x32x32xbf16, #tpu.memory_space<vmem>>, vector<1x32x32xbf16>
    %116 = vector.shape_cast %115 : vector<1x32x32xbf16> to vector<32x32xbf16>
    %117 = arith.truncf %114 : vector<39x32xf32> to vector<39x32xbf16>
    %cst_82 = arith.constant dense<0.000000e+00> : vector<39x32xf32>
    %118 = tpu.matmul %117, %116, %cst_82 {dimension_numbers = #tpu.dot_dimension_numbers<[1], [0], [0], [1], [0, 0, 1, 1], [], []>} : vector<39x32xbf16>, vector<32x32xbf16>, vector<39x32xf32> -> vector<39x32xf32>
    %119 = arith.addf %113, %118 : vector<39x32xf32>
    %120 = arith.mulf %119, %119 : vector<39x32xf32>
    %121 = arith.mulf %119, %120 : vector<39x32xf32>
    %cst_83 = arith.constant 4.471500e-02 : f32
    %122 = vector.broadcast %cst_83 : f32 to vector<39x32xf32>
    %123 = arith.mulf %122, %121 : vector<39x32xf32>
    %124 = arith.addf %119, %123 : vector<39x32xf32>
    %cst_84 = arith.constant 0.797884583 : f32
    %125 = vector.broadcast %cst_84 : f32 to vector<39x32xf32>
    %126 = arith.mulf %125, %124 : vector<39x32xf32>
    %127 = math.tanh %126 : vector<39x32xf32>
    %cst_85 = arith.constant 1.000000e+00 : f32
    %128 = vector.broadcast %cst_85 : f32 to vector<39x32xf32>
    %129 = arith.addf %128, %127 : vector<39x32xf32>
    %cst_86 = arith.constant 5.000000e-01 : f32
    %130 = vector.broadcast %cst_86 : f32 to vector<39x32xf32>
    %131 = arith.mulf %130, %129 : vector<39x32xf32>
    %132 = arith.mulf %119, %131 : vector<39x32xf32>
    %c0_87 = arith.constant 0 : index
    %c0_88 = arith.constant 0 : index
    %133 = vector.load %arg33[%c0_87, %c0_88] : memref<319x32xf32, #tpu.memory_space<vmem>>, vector<39x32xf32>
    tpu.vector_store %arg33[%c0_87, %c0_88], %132 {strides = array<i32>} : memref<319x32xf32, #tpu.memory_space<vmem>>, vector<39x32xf32>,
    %c0_89 = arith.constant 0 : index
    %c0_90 = arith.constant 0 : index
    %134 = tpu.strided_load %arg33[%c0_89, %c0_90] {strides = array<i32: 2, 1>} : memref<319x32xf32, #tpu.memory_space<vmem>>, vector<19x32xf32>
    %c0_91 = arith.constant 0 : index
    %c0_92 = arith.constant 0 : index
    %c0_93 = arith.constant 0 : index
    %135 = vector.load %arg8[%c0_91, %c0_92, %c0_93] : memref<3x32x32xbf16, #tpu.memory_space<vmem>>, vector<1x32x32xbf16>
    %136 = vector.shape_cast %135 : vector<1x32x32xbf16> to vector<32x32xbf16>
    %137 = arith.truncf %134 : vector<19x32xf32> to vector<19x32xbf16>
    %cst_94 = arith.constant dense<0.000000e+00> : vector<19x32xf32>
    %138 = tpu.matmul %137, %136, %cst_94 {dimension_numbers = #tpu.dot_dimension_numbers<[1], [0], [0], [1], [0, 0, 1, 1], [], []>} : vector<19x32xbf16>, vector<32x32xbf16>, vector<19x32xf32> -> vector<19x32xf32>
    %c1_95 = arith.constant 1 : index
    %c0_96 = arith.constant 0 : index
    %139 = tpu.strided_load %arg33[%c1_95, %c0_96] {strides = array<i32: 2, 1>} : memref<319x32xf32, #tpu.memory_space<vmem>>, vector<19x32xf32>
    %c1_97 = arith.constant 1 : index
    %c0_98 = arith.constant 0 : index
    %c0_99 = arith.constant 0 : index
    %140 = vector.load %arg8[%c1_97, %c0_98, %c0_99] : memref<3x32x32xbf16, #tpu.memory_space<vmem>>, vector<1x32x32xbf16>
    %141 = vector.shape_cast %140 : vector<1x32x32xbf16> to vector<32x32xbf16>
    %142 = arith.truncf %139 : vector<19x32xf32> to vector<19x32xbf16>
    %cst_100 = arith.constant dense<0.000000e+00> : vector<19x32xf32>
    %143 = tpu.matmul %142, %141, %cst_100 {dimension_numbers = #tpu.dot_dimension_numbers<[1], [0], [0], [1], [0, 0, 1, 1], [], []>} : vector<19x32xbf16>, vector<32x32xbf16>, vector<19x32xf32> -> vector<19x32xf32>
    %144 = arith.addf %138, %143 : vector<19x32xf32>
    %c2_101 = arith.constant 2 : index
    %c0_102 = arith.constant 0 : index
    %145 = tpu.strided_load %arg33[%c2_101, %c0_102] {strides = array<i32: 2, 1>} : memref<319x32xf32, #tpu.memory_space<vmem>>, vector<19x32xf32>
    %c2_103 = arith.constant 2 : index
    %c0_104 = arith.constant 0 : index
    %c0_105 = arith.constant 0 : index
    %146 = vector.load %arg8[%c2_103, %c0_104, %c0_105] : memref<3x32x32xbf16, #tpu.memory_space<vmem>>, vector<1x32x32xbf16>
    %147 = vector.shape_cast %146 : vector<1x32x32xbf16> to vector<32x32xbf16>
    %148 = arith.truncf %145 : vector<19x32xf32> to vector<19x32xbf16>
    %cst_106 = arith.constant dense<0.000000e+00> : vector<19x32xf32>
    %149 = tpu.matmul %148, %147, %cst_106 {dimension_numbers = #tpu.dot_dimension_numbers<[1], [0], [0], [1], [0, 0, 1, 1], [], []>} : vector<19x32xbf16>, vector<32x32xbf16>, vector<19x32xf32> -> vector<19x32xf32>
    %150 = arith.addf %144, %149 : vector<19x32xf32>
    %151 = arith.mulf %150, %150 : vector<19x32xf32>
    %152 = arith.mulf %150, %151 : vector<19x32xf32>
    %cst_107 = arith.constant 4.471500e-02 : f32
    %153 = vector.broadcast %cst_107 : f32 to vector<19x32xf32>
    %154 = arith.mulf %153, %152 : vector<19x32xf32>
    %155 = arith.addf %150, %154 : vector<19x32xf32>
    %cst_108 = arith.constant 0.797884583 : f32
    %156 = vector.broadcast %cst_108 : f32 to vector<19x32xf32>
    %157 = arith.mulf %156, %155 : vector<19x32xf32>
    %158 = math.tanh %157 : vector<19x32xf32>
    %cst_109 = arith.constant 1.000000e+00 : f32
    %159 = vector.broadcast %cst_109 : f32 to vector<19x32xf32>
    %160 = arith.addf %159, %158 : vector<19x32xf32>
    %cst_110 = arith.constant 5.000000e-01 : f32
    %161 = vector.broadcast %cst_110 : f32 to vector<19x32xf32>
    %162 = arith.mulf %161, %160 : vector<19x32xf32>
    %163 = arith.mulf %150, %162 : vector<19x32xf32>
    %c0_111 = arith.constant 0 : index
    %c0_112 = arith.constant 0 : index
    %164 = vector.load %arg32[%c0_111, %c0_112] : memref<319x32xf32, #tpu.memory_space<vmem>>, vector<19x32xf32>
    tpu.vector_store %arg32[%c0_111, %c0_112], %163 {strides = array<i32>} : memref<319x32xf32, #tpu.memory_space<vmem>>, vector<19x32xf32>,
    %c0_113 = arith.constant 0 : index
    %c0_114 = arith.constant 0 : index
    %165 = tpu.strided_load %arg32[%c0_113, %c0_114] {strides = array<i32: 2, 1>} : memref<319x32xf32, #tpu.memory_space<vmem>>, vector<9x32xf32>
    %c0_115 = arith.constant 0 : index
    %c0_116 = arith.constant 0 : index
    %c0_117 = arith.constant 0 : index
    %166 = vector.load %arg9[%c0_115, %c0_116, %c0_117] : memref<2x32x32xbf16, #tpu.memory_space<vmem>>, vector<1x32x32xbf16>
    %167 = vector.shape_cast %166 : vector<1x32x32xbf16> to vector<32x32xbf16>
    %168 = arith.truncf %165 : vector<9x32xf32> to vector<9x32xbf16>
    %cst_118 = arith.constant dense<0.000000e+00> : vector<9x32xf32>
    %169 = tpu.matmul %168, %167, %cst_118 {dimension_numbers = #tpu.dot_dimension_numbers<[1], [0], [0], [1], [0, 0, 1, 1], [], []>} : vector<9x32xbf16>, vector<32x32xbf16>, vector<9x32xf32> -> vector<9x32xf32>
    %c1_119 = arith.constant 1 : index
    %c0_120 = arith.constant 0 : index
    %170 = tpu.strided_load %arg32[%c1_119, %c0_120] {strides = array<i32: 2, 1>} : memref<319x32xf32, #tpu.memory_space<vmem>>, vector<9x32xf32>
    %c1_121 = arith.constant 1 : index
    %c0_122 = arith.constant 0 : index
    %c0_123 = arith.constant 0 : index
    %171 = vector.load %arg9[%c1_121, %c0_122, %c0_123] : memref<2x32x32xbf16, #tpu.memory_space<vmem>>, vector<1x32x32xbf16>
    %172 = vector.shape_cast %171 : vector<1x32x32xbf16> to vector<32x32xbf16>
    %173 = arith.truncf %170 : vector<9x32xf32> to vector<9x32xbf16>
    %cst_124 = arith.constant dense<0.000000e+00> : vector<9x32xf32>
    %174 = tpu.matmul %173, %172, %cst_124 {dimension_numbers = #tpu.dot_dimension_numbers<[1], [0], [0], [1], [0, 0, 1, 1], [], []>} : vector<9x32xbf16>, vector<32x32xbf16>, vector<9x32xf32> -> vector<9x32xf32>
    %175 = arith.addf %169, %174 : vector<9x32xf32>
    %176 = arith.mulf %175, %175 : vector<9x32xf32>
    %177 = arith.mulf %175, %176 : vector<9x32xf32>
    %cst_125 = arith.constant 4.471500e-02 : f32
    %178 = vector.broadcast %cst_125 : f32 to vector<9x32xf32>
    %179 = arith.mulf %178, %177 : vector<9x32xf32>
    %180 = arith.addf %175, %179 : vector<9x32xf32>
    %cst_126 = arith.constant 0.797884583 : f32
    %181 = vector.broadcast %cst_126 : f32 to vector<9x32xf32>
    %182 = arith.mulf %181, %180 : vector<9x32xf32>
    %183 = math.tanh %182 : vector<9x32xf32>
    %cst_127 = arith.constant 1.000000e+00 : f32
    %184 = vector.broadcast %cst_127 : f32 to vector<9x32xf32>
    %185 = arith.addf %184, %183 : vector<9x32xf32>
    %cst_128 = arith.constant 5.000000e-01 : f32
    %186 = vector.broadcast %cst_128 : f32 to vector<9x32xf32>
    %187 = arith.mulf %186, %185 : vector<9x32xf32>
    %188 = arith.mulf %175, %187 : vector<9x32xf32>
    %c0_129 = arith.constant 0 : index
    %c0_130 = arith.constant 0 : index
    %189 = vector.load %arg33[%c0_129, %c0_130] : memref<319x32xf32, #tpu.memory_space<vmem>>, vector<9x32xf32>
    tpu.vector_store %arg33[%c0_129, %c0_130], %188 {strides = array<i32>} : memref<319x32xf32, #tpu.memory_space<vmem>>, vector<9x32xf32>,
    %c0_131 = arith.constant 0 : index
    %c0_132 = arith.constant 0 : index
    %190 = tpu.strided_load %arg33[%c0_131, %c0_132] {strides = array<i32: 2, 1>} : memref<319x32xf32, #tpu.memory_space<vmem>>, vector<4x32xf32>
    %c0_133 = arith.constant 0 : index
    %c0_134 = arith.constant 0 : index
    %c0_135 = arith.constant 0 : index
    %191 = vector.load %arg10[%c0_133, %c0_134, %c0_135] : memref<2x32x32xbf16, #tpu.memory_space<vmem>>, vector<1x32x32xbf16>
    %192 = vector.shape_cast %191 : vector<1x32x32xbf16> to vector<32x32xbf16>
    %193 = arith.truncf %190 : vector<4x32xf32> to vector<4x32xbf16>
    %cst_136 = arith.constant dense<0.000000e+00> : vector<4x32xf32>
    %194 = tpu.matmul %193, %192, %cst_136 {dimension_numbers = #tpu.dot_dimension_numbers<[1], [0], [0], [1], [0, 0, 1, 1], [], []>} : vector<4x32xbf16>, vector<32x32xbf16>, vector<4x32xf32> -> vector<4x32xf32>
    %c1_137 = arith.constant 1 : index
    %c0_138 = arith.constant 0 : index
    %195 = tpu.strided_load %arg33[%c1_137, %c0_138] {strides = array<i32: 2, 1>} : memref<319x32xf32, #tpu.memory_space<vmem>>, vector<4x32xf32>
    %c1_139 = arith.constant 1 : index
    %c0_140 = arith.constant 0 : index
    %c0_141 = arith.constant 0 : index
    %196 = vector.load %arg10[%c1_139, %c0_140, %c0_141] : memref<2x32x32xbf16, #tpu.memory_space<vmem>>, vector<1x32x32xbf16>
    %197 = vector.shape_cast %196 : vector<1x32x32xbf16> to vector<32x32xbf16>
    %198 = arith.truncf %195 : vector<4x32xf32> to vector<4x32xbf16>
    %cst_142 = arith.constant dense<0.000000e+00> : vector<4x32xf32>
    %199 = tpu.matmul %198, %197, %cst_142 {dimension_numbers = #tpu.dot_dimension_numbers<[1], [0], [0], [1], [0, 0, 1, 1], [], []>} : vector<4x32xbf16>, vector<32x32xbf16>, vector<4x32xf32> -> vector<4x32xf32>
    %200 = arith.addf %194, %199 : vector<4x32xf32>
    %201 = arith.mulf %200, %200 : vector<4x32xf32>
    %202 = arith.mulf %200, %201 : vector<4x32xf32>
    %cst_143 = arith.constant 4.471500e-02 : f32
    %203 = vector.broadcast %cst_143 : f32 to vector<4x32xf32>
    %204 = arith.mulf %203, %202 : vector<4x32xf32>
    %205 = arith.addf %200, %204 : vector<4x32xf32>
    %cst_144 = arith.constant 0.797884583 : f32
    %206 = vector.broadcast %cst_144 : f32 to vector<4x32xf32>
    %207 = arith.mulf %206, %205 : vector<4x32xf32>
    %208 = math.tanh %207 : vector<4x32xf32>
    %cst_145 = arith.constant 1.000000e+00 : f32
    %209 = vector.broadcast %cst_145 : f32 to vector<4x32xf32>
    %210 = arith.addf %209, %208 : vector<4x32xf32>
    %cst_146 = arith.constant 5.000000e-01 : f32
    %211 = vector.broadcast %cst_146 : f32 to vector<4x32xf32>
    %212 = arith.mulf %211, %210 : vector<4x32xf32>
    %213 = arith.mulf %200, %212 : vector<4x32xf32>
    %c0_147 = arith.constant 0 : index
    %c0_148 = arith.constant 0 : index
    %214 = vector.load %arg11[%c0_147, %c0_148] : memref<1x32xf32, #tpu.memory_space<vmem>>, vector<1x32xf32>
    %c0_149 = arith.constant 0 : index
    %c0_150 = arith.constant 0 : index
    %215 = vector.load %arg12[%c0_149, %c0_150] : memref<1x32xf32, #tpu.memory_space<vmem>>, vector<1x32xf32>
    %cst_151 = arith.constant dense<0.000000e+00> : vector<4xf32>
    %216 = vector.multi_reduction <add>, %213, %cst_151 [1] : vector<4x32xf32> to vector<4xf32>
    %217 = vector.shape_cast %216 : vector<4xf32> to vector<4x1xf32>
    %cst_152 = arith.constant 3.200000e+01 : f32
    %218 = vector.broadcast %cst_152 : f32 to vector<4x1xf32>
    %219 = arith.divf %217, %218 : vector<4x1xf32>
    %220 = vector.broadcast %219 : vector<4x1xf32> to vector<4x32xf32>
    %221 = arith.subf %213, %220 : vector<4x32xf32>
    %222 = arith.mulf %221, %221 : vector<4x32xf32>
    %cst_153 = arith.constant dense<0.000000e+00> : vector<4xf32>
    %223 = vector.multi_reduction <add>, %222, %cst_153 [1] : vector<4x32xf32> to vector<4xf32>
    %224 = vector.shape_cast %223 : vector<4xf32> to vector<4x1xf32>
    %cst_154 = arith.constant 3.200000e+01 : f32
    %225 = vector.broadcast %cst_154 : f32 to vector<4x1xf32>
    %226 = arith.divf %224, %225 : vector<4x1xf32>
    %227 = vector.broadcast %219 : vector<4x1xf32> to vector<4x32xf32>
    %228 = arith.subf %213, %227 : vector<4x32xf32>
    %cst_155 = arith.constant 9.99999974E-6 : f32
    %229 = vector.broadcast %cst_155 : f32 to vector<4x1xf32>
    %230 = arith.addf %226, %229 : vector<4x1xf32>
    %231 = math.rsqrt %230 : vector<4x1xf32>
    %232 = vector.broadcast %231 : vector<4x1xf32> to vector<4x32xf32>
    %233 = arith.mulf %228, %232 : vector<4x32xf32>
    %234 = vector.broadcast %214 : vector<1x32xf32> to vector<4x32xf32>
    %235 = arith.mulf %233, %234 : vector<4x32xf32>
    %236 = vector.broadcast %215 : vector<1x32xf32> to vector<4x32xf32>
    %237 = arith.addf %235, %236 : vector<4x32xf32>
    %c0_156 = arith.constant 0 : index
    %c0_157 = arith.constant 0 : index
    %238 = vector.load %arg13[%c0_156, %c0_157] : memref<32x32xbf16, #tpu.memory_space<vmem>>, vector<32x32xbf16>
    %239 = arith.truncf %237 : vector<4x32xf32> to vector<4x32xbf16>
    %cst_158 = arith.constant dense<0.000000e+00> : vector<4x32xf32>
    %240 = tpu.matmul %239, %238, %cst_158 {dimension_numbers = #tpu.dot_dimension_numbers<[1], [0], [0], [1], [0, 0, 1, 1], [], []>} : vector<4x32xbf16>, vector<32x32xbf16>, vector<4x32xf32> -> vector<4x32xf32>
    %c0_159 = arith.constant 0 : index
    %c0_160 = arith.constant 0 : index
    %241 = vector.load %arg14[%c0_159, %c0_160] : memref<1x32xf32, #tpu.memory_space<vmem>>, vector<1x32xf32>
    %242 = vector.broadcast %241 : vector<1x32xf32> to vector<4x32xf32>
    %243 = arith.addf %240, %242 : vector<4x32xf32>
    %244 = tpu.iota {dimensions = array<i32: 0>} : vector<4x1xi32>
    %c1_i32 = arith.constant 1 : i32
    %245 = vector.broadcast %c1_i32 : i32 to vector<4x1xi32>
    %246 = arith.cmpi sge, %244, %245 : vector<4x1xi32>
    %c1_i32_161 = arith.constant 1 : i32
    %247 = tpu.dynamic_rotate %243 by %c1_i32_161 dim 0 : vector<4x32xf32>, i32 -> vector<4x32xf32>
    %cst_162 = arith.constant 0.000000e+00 : f32
    %248 = vector.shape_cast %246 : vector<4x1xi1> to vector<4x1xi1>
    %249 = vector.broadcast %248 : vector<4x1xi1> to vector<4x32xi1>
    %250 = vector.broadcast %cst_162 : f32 to vector<4x32xf32>
    %251 = arith.select %249, %247, %250 : vector<4x32xi1>, vector<4x32xf32>
    %c2_i32 = arith.constant 2 : i32
    %252 = vector.broadcast %c2_i32 : i32 to vector<4x1xi32>
    %253 = arith.cmpi sle, %244, %252 : vector<4x1xi32>
    %c3_i32 = arith.constant 3 : i32
    %254 = tpu.dynamic_rotate %243 by %c3_i32 dim 0 : vector<4x32xf32>, i32 -> vector<4x32xf32>
    %cst_163 = arith.constant 0.000000e+00 : f32
    %255 = vector.shape_cast %253 : vector<4x1xi1> to vector<4x1xi1>
    %256 = vector.broadcast %255 : vector<4x1xi1> to vector<4x32xi1>
    %257 = vector.broadcast %cst_163 : f32 to vector<4x32xf32>
    %258 = arith.select %256, %254, %257 : vector<4x32xi1>, vector<4x32xf32>
    %c0_164 = arith.constant 0 : index
    %c0_165 = arith.constant 0 : index
    %c0_166 = arith.constant 0 : index
    %259 = vector.load %arg15[%c0_164, %c0_165, %c0_166] : memref<3x32x32xbf16, #tpu.memory_space<vmem>>, vector<1x32x32xbf16>
    %260 = vector.shape_cast %259 : vector<1x32x32xbf16> to vector<32x32xbf16>
    %261 = arith.truncf %251 : vector<4x32xf32> to vector<4x32xbf16>
    %cst_167 = arith.constant dense<0.000000e+00> : vector<4x32xf32>
    %262 = tpu.matmul %261, %260, %cst_167 {dimension_numbers = #tpu.dot_dimension_numbers<[1], [0], [0], [1], [0, 0, 1, 1], [], []>} : vector<4x32xbf16>, vector<32x32xbf16>, vector<4x32xf32> -> vector<4x32xf32>
    %c1_168 = arith.constant 1 : index
    %c0_169 = arith.constant 0 : index
    %c0_170 = arith.constant 0 : index
    %263 = vector.load %arg15[%c1_168, %c0_169, %c0_170] : memref<3x32x32xbf16, #tpu.memory_space<vmem>>, vector<1x32x32xbf16>
    %264 = vector.shape_cast %263 : vector<1x32x32xbf16> to vector<32x32xbf16>
    %265 = arith.truncf %243 : vector<4x32xf32> to vector<4x32xbf16>
    %cst_171 = arith.constant dense<0.000000e+00> : vector<4x32xf32>
    %266 = tpu.matmul %265, %264, %cst_171 {dimension_numbers = #tpu.dot_dimension_numbers<[1], [0], [0], [1], [0, 0, 1, 1], [], []>} : vector<4x32xbf16>, vector<32x32xbf16>, vector<4x32xf32> -> vector<4x32xf32>
    %267 = arith.addf %262, %266 : vector<4x32xf32>
    %c2_172 = arith.constant 2 : index
    %c0_173 = arith.constant 0 : index
    %c0_174 = arith.constant 0 : index
    %268 = vector.load %arg15[%c2_172, %c0_173, %c0_174] : memref<3x32x32xbf16, #tpu.memory_space<vmem>>, vector<1x32x32xbf16>
    %269 = vector.shape_cast %268 : vector<1x32x32xbf16> to vector<32x32xbf16>
    %270 = arith.truncf %258 : vector<4x32xf32> to vector<4x32xbf16>
    %cst_175 = arith.constant dense<0.000000e+00> : vector<4x32xf32>
    %271 = tpu.matmul %270, %269, %cst_175 {dimension_numbers = #tpu.dot_dimension_numbers<[1], [0], [0], [1], [0, 0, 1, 1], [], []>} : vector<4x32xbf16>, vector<32x32xbf16>, vector<4x32xf32> -> vector<4x32xf32>
    %272 = arith.addf %267, %271 : vector<4x32xf32>
    %c0_176 = arith.constant 0 : index
    %c0_177 = arith.constant 0 : index
    %273 = vector.load %arg16[%c0_176, %c0_177] : memref<1x32xf32, #tpu.memory_space<vmem>>, vector<1x32xf32>
    %274 = vector.broadcast %273 : vector<1x32xf32> to vector<4x32xf32>
    %275 = arith.addf %272, %274 : vector<4x32xf32>
    %276 = arith.mulf %275, %275 : vector<4x32xf32>
    %277 = arith.mulf %275, %276 : vector<4x32xf32>
    %cst_178 = arith.constant 4.471500e-02 : f32
    %278 = vector.broadcast %cst_178 : f32 to vector<4x32xf32>
    %279 = arith.mulf %278, %277 : vector<4x32xf32>
    %280 = arith.addf %275, %279 : vector<4x32xf32>
    %cst_179 = arith.constant 0.797884583 : f32
    %281 = vector.broadcast %cst_179 : f32 to vector<4x32xf32>
    %282 = arith.mulf %281, %280 : vector<4x32xf32>
    %283 = math.tanh %282 : vector<4x32xf32>
    %cst_180 = arith.constant 1.000000e+00 : f32
    %284 = vector.broadcast %cst_180 : f32 to vector<4x32xf32>
    %285 = arith.addf %284, %283 : vector<4x32xf32>
    %cst_181 = arith.constant 5.000000e-01 : f32
    %286 = vector.broadcast %cst_181 : f32 to vector<4x32xf32>
    %287 = arith.mulf %286, %285 : vector<4x32xf32>
    %288 = arith.mulf %275, %287 : vector<4x32xf32>
    %289 = arith.addf %243, %288 : vector<4x32xf32>
    %c0_182 = arith.constant 0 : index
    %c0_183 = arith.constant 0 : index
    %290 = vector.load %arg17[%c0_182, %c0_183] : memref<1x32xf32, #tpu.memory_space<vmem>>, vector<1x32xf32>
    %c0_184 = arith.constant 0 : index
    %c0_185 = arith.constant 0 : index
    %291 = vector.load %arg18[%c0_184, %c0_185] : memref<1x32xf32, #tpu.memory_space<vmem>>, vector<1x32xf32>
    %cst_186 = arith.constant dense<0.000000e+00> : vector<4xf32>
    %292 = vector.multi_reduction <add>, %289, %cst_186 [1] : vector<4x32xf32> to vector<4xf32>
    %293 = vector.shape_cast %292 : vector<4xf32> to vector<4x1xf32>
    %cst_187 = arith.constant 3.200000e+01 : f32
    %294 = vector.broadcast %cst_187 : f32 to vector<4x1xf32>
    %295 = arith.divf %293, %294 : vector<4x1xf32>
    %296 = vector.broadcast %295 : vector<4x1xf32> to vector<4x32xf32>
    %297 = arith.subf %289, %296 : vector<4x32xf32>
    %298 = arith.mulf %297, %297 : vector<4x32xf32>
    %cst_188 = arith.constant dense<0.000000e+00> : vector<4xf32>
    %299 = vector.multi_reduction <add>, %298, %cst_188 [1] : vector<4x32xf32> to vector<4xf32>
    %300 = vector.shape_cast %299 : vector<4xf32> to vector<4x1xf32>
    %cst_189 = arith.constant 3.200000e+01 : f32
    %301 = vector.broadcast %cst_189 : f32 to vector<4x1xf32>
    %302 = arith.divf %300, %301 : vector<4x1xf32>
    %303 = vector.broadcast %295 : vector<4x1xf32> to vector<4x32xf32>
    %304 = arith.subf %289, %303 : vector<4x32xf32>
    %cst_190 = arith.constant 9.99999974E-6 : f32
    %305 = vector.broadcast %cst_190 : f32 to vector<4x1xf32>
    %306 = arith.addf %302, %305 : vector<4x1xf32>
    %307 = math.rsqrt %306 : vector<4x1xf32>
    %308 = vector.broadcast %307 : vector<4x1xf32> to vector<4x32xf32>
    %309 = arith.mulf %304, %308 : vector<4x32xf32>
    %310 = vector.broadcast %290 : vector<1x32xf32> to vector<4x32xf32>
    %311 = arith.mulf %309, %310 : vector<4x32xf32>
    %312 = vector.broadcast %291 : vector<1x32xf32> to vector<4x32xf32>
    %313 = arith.addf %311, %312 : vector<4x32xf32>
    %c0_191 = arith.constant 0 : index
    %c0_192 = arith.constant 0 : index
    %c0_193 = arith.constant 0 : index
    %c0_194 = arith.constant 0 : index
    %314 = vector.load %arg31[%c0_191, %c0_192, %c0_193, %c0_194] : memref<3x1x4x32xf32, #tpu.memory_space<vmem>>, vector<1x1x4x32xf32>
    %315 = vector.shape_cast %314 : vector<1x1x4x32xf32> to vector<4x32xf32>
    %316 = vector.shape_cast %313 : vector<4x32xf32> to vector<1x1x4x32xf32>
    tpu.vector_store %arg31[%c0_191, %c0_192, %c0_193, %c0_194], %316 {strides = array<i32>} : memref<3x1x4x32xf32, #tpu.memory_space<vmem>>, vector<1x1x4x32xf32>,
    %c0_195 = arith.constant 0 : index
    %c0_196 = arith.constant 0 : index
    %c0_197 = arith.constant 0 : index
    %317 = vector.load %arg19[%c0_195, %c0_196, %c0_197] : memref<2x32x96xbf16, #tpu.memory_space<vmem>>, vector<1x32x96xbf16>
    %318 = vector.shape_cast %317 : vector<1x32x96xbf16> to vector<32x96xbf16>
    %319 = arith.truncf %313 : vector<4x32xf32> to vector<4x32xbf16>
    %cst_198 = arith.constant dense<0.000000e+00> : vector<4x96xf32>
    %320 = tpu.matmul %319, %318, %cst_198 {dimension_numbers = #tpu.dot_dimension_numbers<[1], [0], [0], [1], [0, 0, 1, 1], [], []>} : vector<4x32xbf16>, vector<32x96xbf16>, vector<4x96xf32> -> vector<4x96xf32>
    %c0_199 = arith.constant 0 : index
    %c0_200 = arith.constant 0 : index
    %c0_201 = arith.constant 0 : index
    %321 = vector.load %arg20[%c0_199, %c0_200, %c0_201] : memref<2x1x96xf32, #tpu.memory_space<vmem>>, vector<1x1x96xf32>
    %322 = vector.shape_cast %321 : vector<1x1x96xf32> to vector<1x96xf32>
    %323 = vector.broadcast %322 : vector<1x96xf32> to vector<4x96xf32>
    %324 = arith.addf %320, %323 : vector<4x96xf32>
    %325 = vector.extract_strided_slice %324 {offsets = [0, 0], sizes = [4, 8], strides = [1, 1]} : vector<4x96xf32> to vector<4x8xf32>
    %cst_202 = arith.constant 0.353553385 : f32
    %326 = vector.broadcast %cst_202 : f32 to vector<4x8xf32>
    %327 = arith.mulf %325, %326 : vector<4x8xf32>
    %328 = vector.extract_strided_slice %324 {offsets = [0, 32], sizes = [4, 8], strides = [1, 1]} : vector<4x96xf32> to vector<4x8xf32>
    %329 = vector.extract_strided_slice %324 {offsets = [0, 64], sizes = [4, 8], strides = [1, 1]} : vector<4x96xf32> to vector<4x8xf32>
    %330 = arith.truncf %327 : vector<4x8xf32> to vector<4x8xbf16>
    %331 = arith.truncf %328 : vector<4x8xf32> to vector<4x8xbf16>
    %cst_203 = arith.constant dense<0.000000e+00> : vector<4x4xf32>
    %332 = tpu.matmul %330, %331, %cst_203 {dimension_numbers = #tpu.dot_dimension_numbers<[1], [1], [0], [0], [0, 0, 1, 0], [], []>} : vector<4x8xbf16>, vector<4x8xbf16>, vector<4x4xf32> -> vector<4x4xf32>
    %cst_204 = arith.constant dense<0xFF800000> : vector<4xf32>
    %333 = vector.multi_reduction <maximumf>, %332, %cst_204 [1] : vector<4x4xf32> to vector<4xf32>
    %334 = vector.shape_cast %333 : vector<4xf32> to vector<4x1xf32>
    %335 = vector.broadcast %334 : vector<4x1xf32> to vector<4x4xf32>
    %336 = arith.subf %332, %335 : vector<4x4xf32>
    %337 = math.exp %336 : vector<4x4xf32>
    %cst_205 = arith.constant dense<0.000000e+00> : vector<4xf32>
    %338 = vector.multi_reduction <add>, %337, %cst_205 [1] : vector<4x4xf32> to vector<4xf32>
    %339 = vector.shape_cast %338 : vector<4xf32> to vector<4x1xf32>
    %340 = tpu.reciprocal %339 {approx = true} : vector<4x1xf32> -> vector<4x1xf32>
    %341 = vector.broadcast %340 : vector<4x1xf32> to vector<4x4xf32>
    %342 = arith.mulf %337, %341 : vector<4x4xf32>
    %343 = arith.truncf %342 : vector<4x4xf32> to vector<4x4xbf16>
    %344 = arith.truncf %329 : vector<4x8xf32> to vector<4x8xbf16>
    %cst_206 = arith.constant dense<0.000000e+00> : vector<4x8xf32>
    %345 = tpu.matmul %343, %344, %cst_206 {dimension_numbers = #tpu.dot_dimension_numbers<[1], [0], [0], [1], [0, 0, 1, 1], [], []>} : vector<4x4xbf16>, vector<4x8xbf16>, vector<4x8xf32> -> vector<4x8xf32>
    %346 = vector.extract_strided_slice %324 {offsets = [0, 8], sizes = [4, 8], strides = [1, 1]} : vector<4x96xf32> to vector<4x8xf32>
    %cst_207 = arith.constant 0.353553385 : f32
    %347 = vector.broadcast %cst_207 : f32 to vector<4x8xf32>
    %348 = arith.mulf %346, %347 : vector<4x8xf32>
    %349 = vector.extract_strided_slice %324 {offsets = [0, 40], sizes = [4, 8], strides = [1, 1]} : vector<4x96xf32> to vector<4x8xf32>
    %350 = vector.extract_strided_slice %324 {offsets = [0, 72], sizes = [4, 8], strides = [1, 1]} : vector<4x96xf32> to vector<4x8xf32>
    %351 = arith.truncf %348 : vector<4x8xf32> to vector<4x8xbf16>
    %352 = arith.truncf %349 : vector<4x8xf32> to vector<4x8xbf16>
    %cst_208 = arith.constant dense<0.000000e+00> : vector<4x4xf32>
    %353 = tpu.matmul %351, %352, %cst_208 {dimension_numbers = #tpu.dot_dimension_numbers<[1], [1], [0], [0], [0, 0, 1, 0], [], []>} : vector<4x8xbf16>, vector<4x8xbf16>, vector<4x4xf32> -> vector<4x4xf32>
    %cst_209 = arith.constant dense<0xFF800000> : vector<4xf32>
    %354 = vector.multi_reduction <maximumf>, %353, %cst_209 [1] : vector<4x4xf32> to vector<4xf32>
    %355 = vector.shape_cast %354 : vector<4xf32> to vector<4x1xf32>
    %356 = vector.broadcast %355 : vector<4x1xf32> to vector<4x4xf32>
    %357 = arith.subf %353, %356 : vector<4x4xf32>
    %358 = math.exp %357 : vector<4x4xf32>
    %cst_210 = arith.constant dense<0.000000e+00> : vector<4xf32>
    %359 = vector.multi_reduction <add>, %358, %cst_210 [1] : vector<4x4xf32> to vector<4xf32>
    %360 = vector.shape_cast %359 : vector<4xf32> to vector<4x1xf32>
    %361 = tpu.reciprocal %360 {approx = true} : vector<4x1xf32> -> vector<4x1xf32>
    %362 = vector.broadcast %361 : vector<4x1xf32> to vector<4x4xf32>
    %363 = arith.mulf %358, %362 : vector<4x4xf32>
    %364 = arith.truncf %363 : vector<4x4xf32> to vector<4x4xbf16>
    %365 = arith.truncf %350 : vector<4x8xf32> to vector<4x8xbf16>
    %cst_211 = arith.constant dense<0.000000e+00> : vector<4x8xf32>
    %366 = tpu.matmul %364, %365, %cst_211 {dimension_numbers = #tpu.dot_dimension_numbers<[1], [0], [0], [1], [0, 0, 1, 1], [], []>} : vector<4x4xbf16>, vector<4x8xbf16>, vector<4x8xf32> -> vector<4x8xf32>
    %367 = vector.extract_strided_slice %324 {offsets = [0, 16], sizes = [4, 8], strides = [1, 1]} : vector<4x96xf32> to vector<4x8xf32>
    %cst_212 = arith.constant 0.353553385 : f32
    %368 = vector.broadcast %cst_212 : f32 to vector<4x8xf32>
    %369 = arith.mulf %367, %368 : vector<4x8xf32>
    %370 = vector.extract_strided_slice %324 {offsets = [0, 48], sizes = [4, 8], strides = [1, 1]} : vector<4x96xf32> to vector<4x8xf32>
    %371 = vector.extract_strided_slice %324 {offsets = [0, 80], sizes = [4, 8], strides = [1, 1]} : vector<4x96xf32> to vector<4x8xf32>
    %372 = arith.truncf %369 : vector<4x8xf32> to vector<4x8xbf16>
    %373 = arith.truncf %370 : vector<4x8xf32> to vector<4x8xbf16>
    %cst_213 = arith.constant dense<0.000000e+00> : vector<4x4xf32>
    %374 = tpu.matmul %372, %373, %cst_213 {dimension_numbers = #tpu.dot_dimension_numbers<[1], [1], [0], [0], [0, 0, 1, 0], [], []>} : vector<4x8xbf16>, vector<4x8xbf16>, vector<4x4xf32> -> vector<4x4xf32>
    %cst_214 = arith.constant dense<0xFF800000> : vector<4xf32>
    %375 = vector.multi_reduction <maximumf>, %374, %cst_214 [1] : vector<4x4xf32> to vector<4xf32>
    %376 = vector.shape_cast %375 : vector<4xf32> to vector<4x1xf32>
    %377 = vector.broadcast %376 : vector<4x1xf32> to vector<4x4xf32>
    %378 = arith.subf %374, %377 : vector<4x4xf32>
    %379 = math.exp %378 : vector<4x4xf32>
    %cst_215 = arith.constant dense<0.000000e+00> : vector<4xf32>
    %380 = vector.multi_reduction <add>, %379, %cst_215 [1] : vector<4x4xf32> to vector<4xf32>
    %381 = vector.shape_cast %380 : vector<4xf32> to vector<4x1xf32>
    %382 = tpu.reciprocal %381 {approx = true} : vector<4x1xf32> -> vector<4x1xf32>
    %383 = vector.broadcast %382 : vector<4x1xf32> to vector<4x4xf32>
    %384 = arith.mulf %379, %383 : vector<4x4xf32>
    %385 = arith.truncf %384 : vector<4x4xf32> to vector<4x4xbf16>
    %386 = arith.truncf %371 : vector<4x8xf32> to vector<4x8xbf16>
    %cst_216 = arith.constant dense<0.000000e+00> : vector<4x8xf32>
    %387 = tpu.matmul %385, %386, %cst_216 {dimension_numbers = #tpu.dot_dimension_numbers<[1], [0], [0], [1], [0, 0, 1, 1], [], []>} : vector<4x4xbf16>, vector<4x8xbf16>, vector<4x8xf32> -> vector<4x8xf32>
    %388 = vector.extract_strided_slice %324 {offsets = [0, 24], sizes = [4, 8], strides = [1, 1]} : vector<4x96xf32> to vector<4x8xf32>
    %cst_217 = arith.constant 0.353553385 : f32
    %389 = vector.broadcast %cst_217 : f32 to vector<4x8xf32>
    %390 = arith.mulf %388, %389 : vector<4x8xf32>
    %391 = vector.extract_strided_slice %324 {offsets = [0, 56], sizes = [4, 8], strides = [1, 1]} : vector<4x96xf32> to vector<4x8xf32>
    %392 = vector.extract_strided_slice %324 {offsets = [0, 88], sizes = [4, 8], strides = [1, 1]} : vector<4x96xf32> to vector<4x8xf32>
    %393 = arith.truncf %390 : vector<4x8xf32> to vector<4x8xbf16>
    %394 = arith.truncf %391 : vector<4x8xf32> to vector<4x8xbf16>
    %cst_218 = arith.constant dense<0.000000e+00> : vector<4x4xf32>
    %395 = tpu.matmul %393, %394, %cst_218 {dimension_numbers = #tpu.dot_dimension_numbers<[1], [1], [0], [0], [0, 0, 1, 0], [], []>} : vector<4x8xbf16>, vector<4x8xbf16>, vector<4x4xf32> -> vector<4x4xf32>
    %cst_219 = arith.constant dense<0xFF800000> : vector<4xf32>
    %396 = vector.multi_reduction <maximumf>, %395, %cst_219 [1] : vector<4x4xf32> to vector<4xf32>
    %397 = vector.shape_cast %396 : vector<4xf32> to vector<4x1xf32>
    %398 = vector.broadcast %397 : vector<4x1xf32> to vector<4x4xf32>
    %399 = arith.subf %395, %398 : vector<4x4xf32>
    %400 = math.exp %399 : vector<4x4xf32>
    %cst_220 = arith.constant dense<0.000000e+00> : vector<4xf32>
    %401 = vector.multi_reduction <add>, %400, %cst_220 [1] : vector<4x4xf32> to vector<4xf32>
    %402 = vector.shape_cast %401 : vector<4xf32> to vector<4x1xf32>
    %403 = tpu.reciprocal %402 {approx = true} : vector<4x1xf32> -> vector<4x1xf32>
    %404 = vector.broadcast %403 : vector<4x1xf32> to vector<4x4xf32>
    %405 = arith.mulf %400, %404 : vector<4x4xf32>
    %406 = arith.truncf %405 : vector<4x4xf32> to vector<4x4xbf16>
    %407 = arith.truncf %392 : vector<4x8xf32> to vector<4x8xbf16>
    %cst_221 = arith.constant dense<0.000000e+00> : vector<4x8xf32>
    %408 = tpu.matmul %406, %407, %cst_221 {dimension_numbers = #tpu.dot_dimension_numbers<[1], [0], [0], [1], [0, 0, 1, 1], [], []>} : vector<4x4xbf16>, vector<4x8xbf16>, vector<4x8xf32> -> vector<4x8xf32>
    %409 = tpu.concatenate %345, %366, %387, %408 in 1 : vector<4x8xf32>, vector<4x8xf32>, vector<4x8xf32>, vector<4x8xf32> -> vector<4x32xf32>
    %c0_222 = arith.constant 0 : index
    %c0_223 = arith.constant 0 : index
    %c0_224 = arith.constant 0 : index
    %410 = vector.load %arg21[%c0_222, %c0_223, %c0_224] : memref<2x32x32xbf16, #tpu.memory_space<vmem>>, vector<1x32x32xbf16>
    %411 = vector.shape_cast %410 : vector<1x32x32xbf16> to vector<32x32xbf16>
    %412 = arith.truncf %409 : vector<4x32xf32> to vector<4x32xbf16>
    %cst_225 = arith.constant dense<0.000000e+00> : vector<4x32xf32>
    %413 = tpu.matmul %412, %411, %cst_225 {dimension_numbers = #tpu.dot_dimension_numbers<[1], [0], [0], [1], [0, 0, 1, 1], [], []>} : vector<4x32xbf16>, vector<32x32xbf16>, vector<4x32xf32> -> vector<4x32xf32>
    %c0_226 = arith.constant 0 : index
    %c0_227 = arith.constant 0 : index
    %c0_228 = arith.constant 0 : index
    %414 = vector.load %arg22[%c0_226, %c0_227, %c0_228] : memref<2x1x32xf32, #tpu.memory_space<vmem>>, vector<1x1x32xf32>
    %415 = vector.shape_cast %414 : vector<1x1x32xf32> to vector<1x32xf32>
    %416 = vector.broadcast %415 : vector<1x32xf32> to vector<4x32xf32>
    %417 = arith.addf %413, %416 : vector<4x32xf32>
    %418 = arith.addf %313, %417 : vector<4x32xf32>
    %c0_229 = arith.constant 0 : index
    %c0_230 = arith.constant 0 : index
    %c0_231 = arith.constant 0 : index
    %419 = vector.load %arg23[%c0_229, %c0_230, %c0_231] : memref<2x1x32xf32, #tpu.memory_space<vmem>>, vector<1x1x32xf32>
    %420 = vector.shape_cast %419 : vector<1x1x32xf32> to vector<1x32xf32>
    %c0_232 = arith.constant 0 : index
    %c0_233 = arith.constant 0 : index
    %c0_234 = arith.constant 0 : index
    %421 = vector.load %arg24[%c0_232, %c0_233, %c0_234] : memref<2x1x32xf32, #tpu.memory_space<vmem>>, vector<1x1x32xf32>
    %422 = vector.shape_cast %421 : vector<1x1x32xf32> to vector<1x32xf32>
    %cst_235 = arith.constant dense<0.000000e+00> : vector<4xf32>
    %423 = vector.multi_reduction <add>, %418, %cst_235 [1] : vector<4x32xf32> to vector<4xf32>
    %424 = vector.shape_cast %423 : vector<4xf32> to vector<4x1xf32>
    %cst_236 = arith.constant 3.200000e+01 : f32
    %425 = vector.broadcast %cst_236 : f32 to vector<4x1xf32>
    %426 = arith.divf %424, %425 : vector<4x1xf32>
    %427 = vector.broadcast %426 : vector<4x1xf32> to vector<4x32xf32>
    %428 = arith.subf %418, %427 : vector<4x32xf32>
    %429 = arith.mulf %428, %428 : vector<4x32xf32>
    %cst_237 = arith.constant dense<0.000000e+00> : vector<4xf32>
    %430 = vector.multi_reduction <add>, %429, %cst_237 [1] : vector<4x32xf32> to vector<4xf32>
    %431 = vector.shape_cast %430 : vector<4xf32> to vector<4x1xf32>
    %cst_238 = arith.constant 3.200000e+01 : f32
    %432 = vector.broadcast %cst_238 : f32 to vector<4x1xf32>
    %433 = arith.divf %431, %432 : vector<4x1xf32>
    %434 = vector.broadcast %426 : vector<4x1xf32> to vector<4x32xf32>
    %435 = arith.subf %418, %434 : vector<4x32xf32>
    %cst_239 = arith.constant 9.99999974E-6 : f32
    %436 = vector.broadcast %cst_239 : f32 to vector<4x1xf32>
    %437 = arith.addf %433, %436 : vector<4x1xf32>
    %438 = math.rsqrt %437 : vector<4x1xf32>
    %439 = vector.broadcast %438 : vector<4x1xf32> to vector<4x32xf32>
    %440 = arith.mulf %435, %439 : vector<4x32xf32>
    %441 = vector.broadcast %420 : vector<1x32xf32> to vector<4x32xf32>
    %442 = arith.mulf %440, %441 : vector<4x32xf32>
    %443 = vector.broadcast %422 : vector<1x32xf32> to vector<4x32xf32>
    %444 = arith.addf %442, %443 : vector<4x32xf32>
    %c0_240 = arith.constant 0 : index
    %c0_241 = arith.constant 0 : index
    %c0_242 = arith.constant 0 : index
    %445 = vector.load %arg25[%c0_240, %c0_241, %c0_242] : memref<2x32x64xbf16, #tpu.memory_space<vmem>>, vector<1x32x64xbf16>
    %446 = vector.shape_cast %445 : vector<1x32x64xbf16> to vector<32x64xbf16>
    %447 = arith.truncf %444 : vector<4x32xf32> to vector<4x32xbf16>
    %cst_243 = arith.constant dense<0.000000e+00> : vector<4x64xf32>
    %448 = tpu.matmul %447, %446, %cst_243 {dimension_numbers = #tpu.dot_dimension_numbers<[1], [0], [0], [1], [0, 0, 1, 1], [], []>} : vector<4x32xbf16>, vector<32x64xbf16>, vector<4x64xf32> -> vector<4x64xf32>
    %c0_244 = arith.constant 0 : index
    %c0_245 = arith.constant 0 : index
    %c0_246 = arith.constant 0 : index
    %449 = vector.load %arg26[%c0_244, %c0_245, %c0_246] : memref<2x1x64xf32, #tpu.memory_space<vmem>>, vector<1x1x64xf32>
    %450 = vector.shape_cast %449 : vector<1x1x64xf32> to vector<1x64xf32>
    %451 = vector.broadcast %450 : vector<1x64xf32> to vector<4x64xf32>
    %452 = arith.addf %448, %451 : vector<4x64xf32>
    %453 = arith.mulf %452, %452 : vector<4x64xf32>
    %454 = arith.mulf %452, %453 : vector<4x64xf32>
    %cst_247 = arith.constant 4.471500e-02 : f32
    %455 = vector.broadcast %cst_247 : f32 to vector<4x64xf32>
    %456 = arith.mulf %455, %454 : vector<4x64xf32>
    %457 = arith.addf %452, %456 : vector<4x64xf32>
    %cst_248 = arith.constant 0.797884583 : f32
    %458 = vector.broadcast %cst_248 : f32 to vector<4x64xf32>
    %459 = arith.mulf %458, %457 : vector<4x64xf32>
    %460 = math.tanh %459 : vector<4x64xf32>
    %cst_249 = arith.constant 1.000000e+00 : f32
    %461 = vector.broadcast %cst_249 : f32 to vector<4x64xf32>
    %462 = arith.addf %461, %460 : vector<4x64xf32>
    %cst_250 = arith.constant 5.000000e-01 : f32
    %463 = vector.broadcast %cst_250 : f32 to vector<4x64xf32>
    %464 = arith.mulf %463, %462 : vector<4x64xf32>
    %465 = arith.mulf %452, %464 : vector<4x64xf32>
    %c0_251 = arith.constant 0 : index
    %c0_252 = arith.constant 0 : index
    %c0_253 = arith.constant 0 : index
    %466 = vector.load %arg27[%c0_251, %c0_252, %c0_253] : memref<2x64x32xbf16, #tpu.memory_space<vmem>>, vector<1x64x32xbf16>
    %467 = vector.shape_cast %466 : vector<1x64x32xbf16> to vector<64x32xbf16>
    %468 = arith.truncf %465 : vector<4x64xf32> to vector<4x64xbf16>
    %cst_254 = arith.constant dense<0.000000e+00> : vector<4x32xf32>
    %469 = tpu.matmul %468, %467, %cst_254 {dimension_numbers = #tpu.dot_dimension_numbers<[1], [0], [0], [1], [0, 0, 1, 1], [], []>} : vector<4x64xbf16>, vector<64x32xbf16>, vector<4x32xf32> -> vector<4x32xf32>
    %c0_255 = arith.constant 0 : index
    %c0_256 = arith.constant 0 : index
    %c0_257 = arith.constant 0 : index
    %470 = vector.load %arg28[%c0_255, %c0_256, %c0_257] : memref<2x1x32xf32, #tpu.memory_space<vmem>>, vector<1x1x32xf32>
    %471 = vector.shape_cast %470 : vector<1x1x32xf32> to vector<1x32xf32>
    %472 = vector.broadcast %471 : vector<1x32xf32> to vector<4x32xf32>
    %473 = arith.addf %469, %472 : vector<4x32xf32>
    %474 = arith.addf %444, %473 : vector<4x32xf32>
    %c0_258 = arith.constant 0 : index
    %c0_259 = arith.constant 0 : index
    %c0_260 = arith.constant 0 : index
    %475 = vector.load %arg29[%c0_258, %c0_259, %c0_260] : memref<2x1x32xf32, #tpu.memory_space<vmem>>, vector<1x1x32xf32>
    %476 = vector.shape_cast %475 : vector<1x1x32xf32> to vector<1x32xf32>
    %c0_261 = arith.constant 0 : index
    %c0_262 = arith.constant 0 : index
    %c0_263 = arith.constant 0 : index
    %477 = vector.load %arg30[%c0_261, %c0_262, %c0_263] : memref<2x1x32xf32, #tpu.memory_space<vmem>>, vector<1x1x32xf32>
    %478 = vector.shape_cast %477 : vector<1x1x32xf32> to vector<1x32xf32>
    %cst_264 = arith.constant dense<0.000000e+00> : vector<4xf32>
    %479 = vector.multi_reduction <add>, %474, %cst_264 [1] : vector<4x32xf32> to vector<4xf32>
    %480 = vector.shape_cast %479 : vector<4xf32> to vector<4x1xf32>
    %cst_265 = arith.constant 3.200000e+01 : f32
    %481 = vector.broadcast %cst_265 : f32 to vector<4x1xf32>
    %482 = arith.divf %480, %481 : vector<4x1xf32>
    %483 = vector.broadcast %482 : vector<4x1xf32> to vector<4x32xf32>
    %484 = arith.subf %474, %483 : vector<4x32xf32>
    %485 = arith.mulf %484, %484 : vector<4x32xf32>
    %cst_266 = arith.constant dense<0.000000e+00> : vector<4xf32>
    %486 = vector.multi_reduction <add>, %485, %cst_266 [1] : vector<4x32xf32> to vector<4xf32>
    %487 = vector.shape_cast %486 : vector<4xf32> to vector<4x1xf32>
    %cst_267 = arith.constant 3.200000e+01 : f32
    %488 = vector.broadcast %cst_267 : f32 to vector<4x1xf32>
    %489 = arith.divf %487, %488 : vector<4x1xf32>
    %490 = vector.broadcast %482 : vector<4x1xf32> to vector<4x32xf32>
    %491 = arith.subf %474, %490 : vector<4x32xf32>
    %cst_268 = arith.constant 9.99999974E-6 : f32
    %492 = vector.broadcast %cst_268 : f32 to vector<4x1xf32>
    %493 = arith.addf %489, %492 : vector<4x1xf32>
    %494 = math.rsqrt %493 : vector<4x1xf32>
    %495 = vector.broadcast %494 : vector<4x1xf32> to vector<4x32xf32>
    %496 = arith.mulf %491, %495 : vector<4x32xf32>
    %497 = vector.broadcast %476 : vector<1x32xf32> to vector<4x32xf32>
    %498 = arith.mulf %496, %497 : vector<4x32xf32>
    %499 = vector.broadcast %478 : vector<1x32xf32> to vector<4x32xf32>
    %500 = arith.addf %498, %499 : vector<4x32xf32>
    %c1_269 = arith.constant 1 : index
    %c0_270 = arith.constant 0 : index
    %c0_271 = arith.constant 0 : index
    %c0_272 = arith.constant 0 : index
    %501 = vector.load %arg31[%c1_269, %c0_270, %c0_271, %c0_272] : memref<3x1x4x32xf32, #tpu.memory_space<vmem>>, vector<1x1x4x32xf32>
    %502 = vector.shape_cast %501 : vector<1x1x4x32xf32> to vector<4x32xf32>
    %503 = vector.shape_cast %500 : vector<4x32xf32> to vector<1x1x4x32xf32>
    tpu.vector_store %arg31[%c1_269, %c0_270, %c0_271, %c0_272], %503 {strides = array<i32>} : memref<3x1x4x32xf32, #tpu.memory_space<vmem>>, vector<1x1x4x32xf32>,
    %c1_273 = arith.constant 1 : index
    %c0_274 = arith.constant 0 : index
    %c0_275 = arith.constant 0 : index
    %504 = vector.load %arg19[%c1_273, %c0_274, %c0_275] : memref<2x32x96xbf16, #tpu.memory_space<vmem>>, vector<1x32x96xbf16>
    %505 = vector.shape_cast %504 : vector<1x32x96xbf16> to vector<32x96xbf16>
    %506 = arith.truncf %500 : vector<4x32xf32> to vector<4x32xbf16>
    %cst_276 = arith.constant dense<0.000000e+00> : vector<4x96xf32>
    %507 = tpu.matmul %506, %505, %cst_276 {dimension_numbers = #tpu.dot_dimension_numbers<[1], [0], [0], [1], [0, 0, 1, 1], [], []>} : vector<4x32xbf16>, vector<32x96xbf16>, vector<4x96xf32> -> vector<4x96xf32>
    %c1_277 = arith.constant 1 : index
    %c0_278 = arith.constant 0 : index
    %c0_279 = arith.constant 0 : index
    %508 = vector.load %arg20[%c1_277, %c0_278, %c0_279] : memref<2x1x96xf32, #tpu.memory_space<vmem>>, vector<1x1x96xf32>
    %509 = vector.shape_cast %508 : vector<1x1x96xf32> to vector<1x96xf32>
    %510 = vector.broadcast %509 : vector<1x96xf32> to vector<4x96xf32>
    %511 = arith.addf %507, %510 : vector<4x96xf32>
    %512 = vector.extract_strided_slice %511 {offsets = [0, 0], sizes = [4, 8], strides = [1, 1]} : vector<4x96xf32> to vector<4x8xf32>
    %cst_280 = arith.constant 0.353553385 : f32
    %513 = vector.broadcast %cst_280 : f32 to vector<4x8xf32>
    %514 = arith.mulf %512, %513 : vector<4x8xf32>
    %515 = vector.extract_strided_slice %511 {offsets = [0, 32], sizes = [4, 8], strides = [1, 1]} : vector<4x96xf32> to vector<4x8xf32>
    %516 = vector.extract_strided_slice %511 {offsets = [0, 64], sizes = [4, 8], strides = [1, 1]} : vector<4x96xf32> to vector<4x8xf32>
    %517 = arith.truncf %514 : vector<4x8xf32> to vector<4x8xbf16>
    %518 = arith.truncf %515 : vector<4x8xf32> to vector<4x8xbf16>
    %cst_281 = arith.constant dense<0.000000e+00> : vector<4x4xf32>
    %519 = tpu.matmul %517, %518, %cst_281 {dimension_numbers = #tpu.dot_dimension_numbers<[1], [1], [0], [0], [0, 0, 1, 0], [], []>} : vector<4x8xbf16>, vector<4x8xbf16>, vector<4x4xf32> -> vector<4x4xf32>
    %cst_282 = arith.constant dense<0xFF800000> : vector<4xf32>
    %520 = vector.multi_reduction <maximumf>, %519, %cst_282 [1] : vector<4x4xf32> to vector<4xf32>
    %521 = vector.shape_cast %520 : vector<4xf32> to vector<4x1xf32>
    %522 = vector.broadcast %521 : vector<4x1xf32> to vector<4x4xf32>
    %523 = arith.subf %519, %522 : vector<4x4xf32>
    %524 = math.exp %523 : vector<4x4xf32>
    %cst_283 = arith.constant dense<0.000000e+00> : vector<4xf32>
    %525 = vector.multi_reduction <add>, %524, %cst_283 [1] : vector<4x4xf32> to vector<4xf32>
    %526 = vector.shape_cast %525 : vector<4xf32> to vector<4x1xf32>
    %527 = tpu.reciprocal %526 {approx = true} : vector<4x1xf32> -> vector<4x1xf32>
    %528 = vector.broadcast %527 : vector<4x1xf32> to vector<4x4xf32>
    %529 = arith.mulf %524, %528 : vector<4x4xf32>
    %530 = arith.truncf %529 : vector<4x4xf32> to vector<4x4xbf16>
    %531 = arith.truncf %516 : vector<4x8xf32> to vector<4x8xbf16>
    %cst_284 = arith.constant dense<0.000000e+00> : vector<4x8xf32>
    %532 = tpu.matmul %530, %531, %cst_284 {dimension_numbers = #tpu.dot_dimension_numbers<[1], [0], [0], [1], [0, 0, 1, 1], [], []>} : vector<4x4xbf16>, vector<4x8xbf16>, vector<4x8xf32> -> vector<4x8xf32>
    %533 = vector.extract_strided_slice %511 {offsets = [0, 8], sizes = [4, 8], strides = [1, 1]} : vector<4x96xf32> to vector<4x8xf32>
    %cst_285 = arith.constant 0.353553385 : f32
    %534 = vector.broadcast %cst_285 : f32 to vector<4x8xf32>
    %535 = arith.mulf %533, %534 : vector<4x8xf32>
    %536 = vector.extract_strided_slice %511 {offsets = [0, 40], sizes = [4, 8], strides = [1, 1]} : vector<4x96xf32> to vector<4x8xf32>
    %537 = vector.extract_strided_slice %511 {offsets = [0, 72], sizes = [4, 8], strides = [1, 1]} : vector<4x96xf32> to vector<4x8xf32>
    %538 = arith.truncf %535 : vector<4x8xf32> to vector<4x8xbf16>
    %539 = arith.truncf %536 : vector<4x8xf32> to vector<4x8xbf16>
    %cst_286 = arith.constant dense<0.000000e+00> : vector<4x4xf32>
    %540 = tpu.matmul %538, %539, %cst_286 {dimension_numbers = #tpu.dot_dimension_numbers<[1], [1], [0], [0], [0, 0, 1, 0], [], []>} : vector<4x8xbf16>, vector<4x8xbf16>, vector<4x4xf32> -> vector<4x4xf32>
    %cst_287 = arith.constant dense<0xFF800000> : vector<4xf32>
    %541 = vector.multi_reduction <maximumf>, %540, %cst_287 [1] : vector<4x4xf32> to vector<4xf32>
    %542 = vector.shape_cast %541 : vector<4xf32> to vector<4x1xf32>
    %543 = vector.broadcast %542 : vector<4x1xf32> to vector<4x4xf32>
    %544 = arith.subf %540, %543 : vector<4x4xf32>
    %545 = math.exp %544 : vector<4x4xf32>
    %cst_288 = arith.constant dense<0.000000e+00> : vector<4xf32>
    %546 = vector.multi_reduction <add>, %545, %cst_288 [1] : vector<4x4xf32> to vector<4xf32>
    %547 = vector.shape_cast %546 : vector<4xf32> to vector<4x1xf32>
    %548 = tpu.reciprocal %547 {approx = true} : vector<4x1xf32> -> vector<4x1xf32>
    %549 = vector.broadcast %548 : vector<4x1xf32> to vector<4x4xf32>
    %550 = arith.mulf %545, %549 : vector<4x4xf32>
    %551 = arith.truncf %550 : vector<4x4xf32> to vector<4x4xbf16>
    %552 = arith.truncf %537 : vector<4x8xf32> to vector<4x8xbf16>
    %cst_289 = arith.constant dense<0.000000e+00> : vector<4x8xf32>
    %553 = tpu.matmul %551, %552, %cst_289 {dimension_numbers = #tpu.dot_dimension_numbers<[1], [0], [0], [1], [0, 0, 1, 1], [], []>} : vector<4x4xbf16>, vector<4x8xbf16>, vector<4x8xf32> -> vector<4x8xf32>
    %554 = vector.extract_strided_slice %511 {offsets = [0, 16], sizes = [4, 8], strides = [1, 1]} : vector<4x96xf32> to vector<4x8xf32>
    %cst_290 = arith.constant 0.353553385 : f32
    %555 = vector.broadcast %cst_290 : f32 to vector<4x8xf32>
    %556 = arith.mulf %554, %555 : vector<4x8xf32>
    %557 = vector.extract_strided_slice %511 {offsets = [0, 48], sizes = [4, 8], strides = [1, 1]} : vector<4x96xf32> to vector<4x8xf32>
    %558 = vector.extract_strided_slice %511 {offsets = [0, 80], sizes = [4, 8], strides = [1, 1]} : vector<4x96xf32> to vector<4x8xf32>
    %559 = arith.truncf %556 : vector<4x8xf32> to vector<4x8xbf16>
    %560 = arith.truncf %557 : vector<4x8xf32> to vector<4x8xbf16>
    %cst_291 = arith.constant dense<0.000000e+00> : vector<4x4xf32>
    %561 = tpu.matmul %559, %560, %cst_291 {dimension_numbers = #tpu.dot_dimension_numbers<[1], [1], [0], [0], [0, 0, 1, 0], [], []>} : vector<4x8xbf16>, vector<4x8xbf16>, vector<4x4xf32> -> vector<4x4xf32>
    %cst_292 = arith.constant dense<0xFF800000> : vector<4xf32>
    %562 = vector.multi_reduction <maximumf>, %561, %cst_292 [1] : vector<4x4xf32> to vector<4xf32>
    %563 = vector.shape_cast %562 : vector<4xf32> to vector<4x1xf32>
    %564 = vector.broadcast %563 : vector<4x1xf32> to vector<4x4xf32>
    %565 = arith.subf %561, %564 : vector<4x4xf32>
    %566 = math.exp %565 : vector<4x4xf32>
    %cst_293 = arith.constant dense<0.000000e+00> : vector<4xf32>
    %567 = vector.multi_reduction <add>, %566, %cst_293 [1] : vector<4x4xf32> to vector<4xf32>
    %568 = vector.shape_cast %567 : vector<4xf32> to vector<4x1xf32>
    %569 = tpu.reciprocal %568 {approx = true} : vector<4x1xf32> -> vector<4x1xf32>
    %570 = vector.broadcast %569 : vector<4x1xf32> to vector<4x4xf32>
    %571 = arith.mulf %566, %570 : vector<4x4xf32>
    %572 = arith.truncf %571 : vector<4x4xf32> to vector<4x4xbf16>
    %573 = arith.truncf %558 : vector<4x8xf32> to vector<4x8xbf16>
    %cst_294 = arith.constant dense<0.000000e+00> : vector<4x8xf32>
    %574 = tpu.matmul %572, %573, %cst_294 {dimension_numbers = #tpu.dot_dimension_numbers<[1], [0], [0], [1], [0, 0, 1, 1], [], []>} : vector<4x4xbf16>, vector<4x8xbf16>, vector<4x8xf32> -> vector<4x8xf32>
    %575 = vector.extract_strided_slice %511 {offsets = [0, 24], sizes = [4, 8], strides = [1, 1]} : vector<4x96xf32> to vector<4x8xf32>
    %cst_295 = arith.constant 0.353553385 : f32
    %576 = vector.broadcast %cst_295 : f32 to vector<4x8xf32>
    %577 = arith.mulf %575, %576 : vector<4x8xf32>
    %578 = vector.extract_strided_slice %511 {offsets = [0, 56], sizes = [4, 8], strides = [1, 1]} : vector<4x96xf32> to vector<4x8xf32>
    %579 = vector.extract_strided_slice %511 {offsets = [0, 88], sizes = [4, 8], strides = [1, 1]} : vector<4x96xf32> to vector<4x8xf32>
    %580 = arith.truncf %577 : vector<4x8xf32> to vector<4x8xbf16>
    %581 = arith.truncf %578 : vector<4x8xf32> to vector<4x8xbf16>
    %cst_296 = arith.constant dense<0.000000e+00> : vector<4x4xf32>
    %582 = tpu.matmul %580, %581, %cst_296 {dimension_numbers = #tpu.dot_dimension_numbers<[1], [1], [0], [0], [0, 0, 1, 0], [], []>} : vector<4x8xbf16>, vector<4x8xbf16>, vector<4x4xf32> -> vector<4x4xf32>
    %cst_297 = arith.constant dense<0xFF800000> : vector<4xf32>
    %583 = vector.multi_reduction <maximumf>, %582, %cst_297 [1] : vector<4x4xf32> to vector<4xf32>
    %584 = vector.shape_cast %583 : vector<4xf32> to vector<4x1xf32>
    %585 = vector.broadcast %584 : vector<4x1xf32> to vector<4x4xf32>
    %586 = arith.subf %582, %585 : vector<4x4xf32>
    %587 = math.exp %586 : vector<4x4xf32>
    %cst_298 = arith.constant dense<0.000000e+00> : vector<4xf32>
    %588 = vector.multi_reduction <add>, %587, %cst_298 [1] : vector<4x4xf32> to vector<4xf32>
    %589 = vector.shape_cast %588 : vector<4xf32> to vector<4x1xf32>
    %590 = tpu.reciprocal %589 {approx = true} : vector<4x1xf32> -> vector<4x1xf32>
    %591 = vector.broadcast %590 : vector<4x1xf32> to vector<4x4xf32>
    %592 = arith.mulf %587, %591 : vector<4x4xf32>
    %593 = arith.truncf %592 : vector<4x4xf32> to vector<4x4xbf16>
    %594 = arith.truncf %579 : vector<4x8xf32> to vector<4x8xbf16>
    %cst_299 = arith.constant dense<0.000000e+00> : vector<4x8xf32>
    %595 = tpu.matmul %593, %594, %cst_299 {dimension_numbers = #tpu.dot_dimension_numbers<[1], [0], [0], [1], [0, 0, 1, 1], [], []>} : vector<4x4xbf16>, vector<4x8xbf16>, vector<4x8xf32> -> vector<4x8xf32>
    %596 = tpu.concatenate %532, %553, %574, %595 in 1 : vector<4x8xf32>, vector<4x8xf32>, vector<4x8xf32>, vector<4x8xf32> -> vector<4x32xf32>
    %c1_300 = arith.constant 1 : index
    %c0_301 = arith.constant 0 : index
    %c0_302 = arith.constant 0 : index
    %597 = vector.load %arg21[%c1_300, %c0_301, %c0_302] : memref<2x32x32xbf16, #tpu.memory_space<vmem>>, vector<1x32x32xbf16>
    %598 = vector.shape_cast %597 : vector<1x32x32xbf16> to vector<32x32xbf16>
    %599 = arith.truncf %596 : vector<4x32xf32> to vector<4x32xbf16>
    %cst_303 = arith.constant dense<0.000000e+00> : vector<4x32xf32>
    %600 = tpu.matmul %599, %598, %cst_303 {dimension_numbers = #tpu.dot_dimension_numbers<[1], [0], [0], [1], [0, 0, 1, 1], [], []>} : vector<4x32xbf16>, vector<32x32xbf16>, vector<4x32xf32> -> vector<4x32xf32>
    %c1_304 = arith.constant 1 : index
    %c0_305 = arith.constant 0 : index
    %c0_306 = arith.constant 0 : index
    %601 = vector.load %arg22[%c1_304, %c0_305, %c0_306] : memref<2x1x32xf32, #tpu.memory_space<vmem>>, vector<1x1x32xf32>
    %602 = vector.shape_cast %601 : vector<1x1x32xf32> to vector<1x32xf32>
    %603 = vector.broadcast %602 : vector<1x32xf32> to vector<4x32xf32>
    %604 = arith.addf %600, %603 : vector<4x32xf32>
    %605 = arith.addf %500, %604 : vector<4x32xf32>
    %c1_307 = arith.constant 1 : index
    %c0_308 = arith.constant 0 : index
    %c0_309 = arith.constant 0 : index
    %606 = vector.load %arg23[%c1_307, %c0_308, %c0_309] : memref<2x1x32xf32, #tpu.memory_space<vmem>>, vector<1x1x32xf32>
    %607 = vector.shape_cast %606 : vector<1x1x32xf32> to vector<1x32xf32>
    %c1_310 = arith.constant 1 : index
    %c0_311 = arith.constant 0 : index
    %c0_312 = arith.constant 0 : index
    %608 = vector.load %arg24[%c1_310, %c0_311, %c0_312] : memref<2x1x32xf32, #tpu.memory_space<vmem>>, vector<1x1x32xf32>
    %609 = vector.shape_cast %608 : vector<1x1x32xf32> to vector<1x32xf32>
    %cst_313 = arith.constant dense<0.000000e+00> : vector<4xf32>
    %610 = vector.multi_reduction <add>, %605, %cst_313 [1] : vector<4x32xf32> to vector<4xf32>
    %611 = vector.shape_cast %610 : vector<4xf32> to vector<4x1xf32>
    %cst_314 = arith.constant 3.200000e+01 : f32
    %612 = vector.broadcast %cst_314 : f32 to vector<4x1xf32>
    %613 = arith.divf %611, %612 : vector<4x1xf32>
    %614 = vector.broadcast %613 : vector<4x1xf32> to vector<4x32xf32>
    %615 = arith.subf %605, %614 : vector<4x32xf32>
    %616 = arith.mulf %615, %615 : vector<4x32xf32>
    %cst_315 = arith.constant dense<0.000000e+00> : vector<4xf32>
    %617 = vector.multi_reduction <add>, %616, %cst_315 [1] : vector<4x32xf32> to vector<4xf32>
    %618 = vector.shape_cast %617 : vector<4xf32> to vector<4x1xf32>
    %cst_316 = arith.constant 3.200000e+01 : f32
    %619 = vector.broadcast %cst_316 : f32 to vector<4x1xf32>
    %620 = arith.divf %618, %619 : vector<4x1xf32>
    %621 = vector.broadcast %613 : vector<4x1xf32> to vector<4x32xf32>
    %622 = arith.subf %605, %621 : vector<4x32xf32>
    %cst_317 = arith.constant 9.99999974E-6 : f32
    %623 = vector.broadcast %cst_317 : f32 to vector<4x1xf32>
    %624 = arith.addf %620, %623 : vector<4x1xf32>
    %625 = math.rsqrt %624 : vector<4x1xf32>
    %626 = vector.broadcast %625 : vector<4x1xf32> to vector<4x32xf32>
    %627 = arith.mulf %622, %626 : vector<4x32xf32>
    %628 = vector.broadcast %607 : vector<1x32xf32> to vector<4x32xf32>
    %629 = arith.mulf %627, %628 : vector<4x32xf32>
    %630 = vector.broadcast %609 : vector<1x32xf32> to vector<4x32xf32>
    %631 = arith.addf %629, %630 : vector<4x32xf32>
    %c1_318 = arith.constant 1 : index
    %c0_319 = arith.constant 0 : index
    %c0_320 = arith.constant 0 : index
    %632 = vector.load %arg25[%c1_318, %c0_319, %c0_320] : memref<2x32x64xbf16, #tpu.memory_space<vmem>>, vector<1x32x64xbf16>
    %633 = vector.shape_cast %632 : vector<1x32x64xbf16> to vector<32x64xbf16>
    %634 = arith.truncf %631 : vector<4x32xf32> to vector<4x32xbf16>
    %cst_321 = arith.constant dense<0.000000e+00> : vector<4x64xf32>
    %635 = tpu.matmul %634, %633, %cst_321 {dimension_numbers = #tpu.dot_dimension_numbers<[1], [0], [0], [1], [0, 0, 1, 1], [], []>} : vector<4x32xbf16>, vector<32x64xbf16>, vector<4x64xf32> -> vector<4x64xf32>
    %c1_322 = arith.constant 1 : index
    %c0_323 = arith.constant 0 : index
    %c0_324 = arith.constant 0 : index
    %636 = vector.load %arg26[%c1_322, %c0_323, %c0_324] : memref<2x1x64xf32, #tpu.memory_space<vmem>>, vector<1x1x64xf32>
    %637 = vector.shape_cast %636 : vector<1x1x64xf32> to vector<1x64xf32>
    %638 = vector.broadcast %637 : vector<1x64xf32> to vector<4x64xf32>
    %639 = arith.addf %635, %638 : vector<4x64xf32>
    %640 = arith.mulf %639, %639 : vector<4x64xf32>
    %641 = arith.mulf %639, %640 : vector<4x64xf32>
    %cst_325 = arith.constant 4.471500e-02 : f32
    %642 = vector.broadcast %cst_325 : f32 to vector<4x64xf32>
    %643 = arith.mulf %642, %641 : vector<4x64xf32>
    %644 = arith.addf %639, %643 : vector<4x64xf32>
    %cst_326 = arith.constant 0.797884583 : f32
    %645 = vector.broadcast %cst_326 : f32 to vector<4x64xf32>
    %646 = arith.mulf %645, %644 : vector<4x64xf32>
    %647 = math.tanh %646 : vector<4x64xf32>
    %cst_327 = arith.constant 1.000000e+00 : f32
    %648 = vector.broadcast %cst_327 : f32 to vector<4x64xf32>
    %649 = arith.addf %648, %647 : vector<4x64xf32>
    %cst_328 = arith.constant 5.000000e-01 : f32
    %650 = vector.broadcast %cst_328 : f32 to vector<4x64xf32>
    %651 = arith.mulf %650, %649 : vector<4x64xf32>
    %652 = arith.mulf %639, %651 : vector<4x64xf32>
    %c1_329 = arith.constant 1 : index
    %c0_330 = arith.constant 0 : index
    %c0_331 = arith.constant 0 : index
    %653 = vector.load %arg27[%c1_329, %c0_330, %c0_331] : memref<2x64x32xbf16, #tpu.memory_space<vmem>>, vector<1x64x32xbf16>
    %654 = vector.shape_cast %653 : vector<1x64x32xbf16> to vector<64x32xbf16>
    %655 = arith.truncf %652 : vector<4x64xf32> to vector<4x64xbf16>
    %cst_332 = arith.constant dense<0.000000e+00> : vector<4x32xf32>
    %656 = tpu.matmul %655, %654, %cst_332 {dimension_numbers = #tpu.dot_dimension_numbers<[1], [0], [0], [1], [0, 0, 1, 1], [], []>} : vector<4x64xbf16>, vector<64x32xbf16>, vector<4x32xf32> -> vector<4x32xf32>
    %c1_333 = arith.constant 1 : index
    %c0_334 = arith.constant 0 : index
    %c0_335 = arith.constant 0 : index
    %657 = vector.load %arg28[%c1_333, %c0_334, %c0_335] : memref<2x1x32xf32, #tpu.memory_space<vmem>>, vector<1x1x32xf32>
    %658 = vector.shape_cast %657 : vector<1x1x32xf32> to vector<1x32xf32>
    %659 = vector.broadcast %658 : vector<1x32xf32> to vector<4x32xf32>
    %660 = arith.addf %656, %659 : vector<4x32xf32>
    %661 = arith.addf %631, %660 : vector<4x32xf32>
    %c1_336 = arith.constant 1 : index
    %c0_337 = arith.constant 0 : index
    %c0_338 = arith.constant 0 : index
    %662 = vector.load %arg29[%c1_336, %c0_337, %c0_338] : memref<2x1x32xf32, #tpu.memory_space<vmem>>, vector<1x1x32xf32>
    %663 = vector.shape_cast %662 : vector<1x1x32xf32> to vector<1x32xf32>
    %c1_339 = arith.constant 1 : index
    %c0_340 = arith.constant 0 : index
    %c0_341 = arith.constant 0 : index
    %664 = vector.load %arg30[%c1_339, %c0_340, %c0_341] : memref<2x1x32xf32, #tpu.memory_space<vmem>>, vector<1x1x32xf32>
    %665 = vector.shape_cast %664 : vector<1x1x32xf32> to vector<1x32xf32>
    %cst_342 = arith.constant dense<0.000000e+00> : vector<4xf32>
    %666 = vector.multi_reduction <add>, %661, %cst_342 [1] : vector<4x32xf32> to vector<4xf32>
    %667 = vector.shape_cast %666 : vector<4xf32> to vector<4x1xf32>
    %cst_343 = arith.constant 3.200000e+01 : f32
    %668 = vector.broadcast %cst_343 : f32 to vector<4x1xf32>
    %669 = arith.divf %667, %668 : vector<4x1xf32>
    %670 = vector.broadcast %669 : vector<4x1xf32> to vector<4x32xf32>
    %671 = arith.subf %661, %670 : vector<4x32xf32>
    %672 = arith.mulf %671, %671 : vector<4x32xf32>
    %cst_344 = arith.constant dense<0.000000e+00> : vector<4xf32>
    %673 = vector.multi_reduction <add>, %672, %cst_344 [1] : vector<4x32xf32> to vector<4xf32>
    %674 = vector.shape_cast %673 : vector<4xf32> to vector<4x1xf32>
    %cst_345 = arith.constant 3.200000e+01 : f32
    %675 = vector.broadcast %cst_345 : f32 to vector<4x1xf32>
    %676 = arith.divf %674, %675 : vector<4x1xf32>
    %677 = vector.broadcast %669 : vector<4x1xf32> to vector<4x32xf32>
    %678 = arith.subf %661, %677 : vector<4x32xf32>
    %cst_346 = arith.constant 9.99999974E-6 : f32
    %679 = vector.broadcast %cst_346 : f32 to vector<4x1xf32>
    %680 = arith.addf %676, %679 : vector<4x1xf32>
    %681 = math.rsqrt %680 : vector<4x1xf32>
    %682 = vector.broadcast %681 : vector<4x1xf32> to vector<4x32xf32>
    %683 = arith.mulf %678, %682 : vector<4x32xf32>
    %684 = vector.broadcast %663 : vector<1x32xf32> to vector<4x32xf32>
    %685 = arith.mulf %683, %684 : vector<4x32xf32>
    %686 = vector.broadcast %665 : vector<1x32xf32> to vector<4x32xf32>
    %687 = arith.addf %685, %686 : vector<4x32xf32>
    %c2_347 = arith.constant 2 : index
    %c0_348 = arith.constant 0 : index
    %c0_349 = arith.constant 0 : index
    %c0_350 = arith.constant 0 : index
    %688 = vector.load %arg31[%c2_347, %c0_348, %c0_349, %c0_350] : memref<3x1x4x32xf32, #tpu.memory_space<vmem>>, vector<1x1x4x32xf32>
    %689 = vector.shape_cast %688 : vector<1x1x4x32xf32> to vector<4x32xf32>
    %690 = vector.shape_cast %687 : vector<4x32xf32> to vector<1x1x4x32xf32>
    tpu.vector_store %arg31[%c2_347, %c0_348, %c0_349, %c0_350], %690 {strides = array<i32>} : memref<3x1x4x32xf32, #tpu.memory_space<vmem>>, vector<1x1x4x32xf32>,
    return
  }
  func.func @transform_0(%arg0: i32) -> (i32, i32, i32) {
    %c0_i32 = arith.constant 0 : i32
    %c0_i32_0 = arith.constant 0 : i32
    %c0_i32_1 = arith.constant 0 : i32
    return %arg0, %c0_i32, %c0_i32_0 : i32, i32, i32
  }
  func.func @transform_1(%arg0: i32) -> (i32, i32) {
    %c0_i32 = arith.constant 0 : i32
    %c0_i32_0 = arith.constant 0 : i32
    %c0_i32_1 = arith.constant 0 : i32
    return %c0_i32, %c0_i32_0 : i32, i32
  }
  func.func @transform_2(%arg0: i32) -> (i32, i32) {
    %c0_i32 = arith.constant 0 : i32
    %c0_i32_0 = arith.constant 0 : i32
    %c0_i32_1 = arith.constant 0 : i32
    return %c0_i32, %c0_i32_0 : i32, i32
  }
  func.func @transform_3(%arg0: i32) -> (i32, i32) {
    %c0_i32 = arith.constant 0 : i32
    %c0_i32_0 = arith.constant 0 : i32
    %c0_i32_1 = arith.constant 0 : i32
    return %c0_i32, %c0_i32_0 : i32, i32
  }
  func.func @transform_4(%arg0: i32) -> (i32, i32, i32) {
    %c0_i32 = arith.constant 0 : i32
    %c0_i32_0 = arith.constant 0 : i32
    %c0_i32_1 = arith.constant 0 : i32
    %c0_i32_2 = arith.constant 0 : i32
    return %c0_i32, %c0_i32_0, %c0_i32_1 : i32, i32, i32
  }
  func.func @transform_5(%arg0: i32) -> (i32, i32, i32) {
    %c0_i32 = arith.constant 0 : i32
    %c0_i32_0 = arith.constant 0 : i32
    %c0_i32_1 = arith.constant 0 : i32
    %c0_i32_2 = arith.constant 0 : i32
    return %c0_i32, %c0_i32_0, %c0_i32_1 : i32, i32, i32
  }
  func.func @transform_6(%arg0: i32) -> (i32, i32, i32) {
    %c0_i32 = arith.constant 0 : i32
    %c0_i32_0 = arith.constant 0 : i32
    %c0_i32_1 = arith.constant 0 : i32
    %c0_i32_2 = arith.constant 0 : i32
    return %c0_i32, %c0_i32_0, %c0_i32_1 : i32, i32, i32
  }
  func.func @transform_7(%arg0: i32) -> (i32, i32, i32) {
    %c0_i32 = arith.constant 0 : i32
    %c0_i32_0 = arith.constant 0 : i32
    %c0_i32_1 = arith.constant 0 : i32
    %c0_i32_2 = arith.constant 0 : i32
    return %c0_i32, %c0_i32_0, %c0_i32_1 : i32, i32, i32
  }
  func.func @transform_8(%arg0: i32) -> (i32, i32, i32) {
    %c0_i32 = arith.constant 0 : i32
    %c0_i32_0 = arith.constant 0 : i32
    %c0_i32_1 = arith.constant 0 : i32
    %c0_i32_2 = arith.constant 0 : i32
    return %c0_i32, %c0_i32_0, %c0_i32_1 : i32, i32, i32
  }
  func.func @transform_9(%arg0: i32) -> (i32, i32, i32) {
    %c0_i32 = arith.constant 0 : i32
    %c0_i32_0 = arith.constant 0 : i32
    %c0_i32_1 = arith.constant 0 : i32
    %c0_i32_2 = arith.constant 0 : i32
    return %c0_i32, %c0_i32_0, %c0_i32_1 : i32, i32, i32
  }
  func.func @transform_10(%arg0: i32) -> (i32, i32) {
    %c0_i32 = arith.constant 0 : i32
    %c0_i32_0 = arith.constant 0 : i32
    %c0_i32_1 = arith.constant 0 : i32
    return %c0_i32, %c0_i32_0 : i32, i32
  }
  func.func @transform_11(%arg0: i32) -> (i32, i32) {
    %c0_i32 = arith.constant 0 : i32
    %c0_i32_0 = arith.constant 0 : i32
    %c0_i32_1 = arith.constant 0 : i32
    return %c0_i32, %c0_i32_0 : i32, i32
  }
  func.func @transform_12(%arg0: i32) -> (i32, i32) {
    %c0_i32 = arith.constant 0 : i32
    %c0_i32_0 = arith.constant 0 : i32
    %c0_i32_1 = arith.constant 0 : i32
    return %c0_i32, %c0_i32_0 : i32, i32
  }
  func.func @transform_13(%arg0: i32) -> (i32, i32) {
    %c0_i32 = arith.constant 0 : i32
    %c0_i32_0 = arith.constant 0 : i32
    %c0_i32_1 = arith.constant 0 : i32
    return %c0_i32, %c0_i32_0 : i32, i32
  }
  func.func @transform_14(%arg0: i32) -> (i32, i32, i32) {
    %c0_i32 = arith.constant 0 : i32
    %c0_i32_0 = arith.constant 0 : i32
    %c0_i32_1 = arith.constant 0 : i32
    %c0_i32_2 = arith.constant 0 : i32
    return %c0_i32, %c0_i32_0, %c0_i32_1 : i32, i32, i32
  }
  func.func @transform_15(%arg0: i32) -> (i32, i32) {
    %c0_i32 = arith.constant 0 : i32
    %c0_i32_0 = arith.constant 0 : i32
    %c0_i32_1 = arith.constant 0 : i32
    return %c0_i32, %c0_i32_0 : i32, i32
  }
  func.func @transform_16(%arg0: i32) -> (i32, i32) {
    %c0_i32 = arith.constant 0 : i32
    %c0_i32_0 = arith.constant 0 : i32
    %c0_i32_1 = arith.constant 0 : i32
    return %c0_i32, %c0_i32_0 : i32, i32
  }
  func.func @transform_17(%arg0: i32) -> (i32, i32) {
    %c0_i32 = arith.constant 0 : i32
    %c0_i32_0 = arith.constant 0 : i32
    %c0_i32_1 = arith.constant 0 : i32
    return %c0_i32, %c0_i32_0 : i32, i32
  }
  func.func @transform_18(%arg0: i32) -> (i32, i32, i32) {
    %c0_i32 = arith.constant 0 : i32
    %c0_i32_0 = arith.constant 0 : i32
    %c0_i32_1 = arith.constant 0 : i32
    %c0_i32_2 = arith.constant 0 : i32
    return %c0_i32, %c0_i32_0, %c0_i32_1 : i32, i32, i32
  }
  func.func @transform_19(%arg0: i32) -> (i32, i32, i32) {
    %c0_i32 = arith.constant 0 : i32
    %c0_i32_0 = arith.constant 0 : i32
    %c0_i32_1 = arith.constant 0 : i32
    %c0_i32_2 = arith.constant 0 : i32
    return %c0_i32, %c0_i32_0, %c0_i32_1 : i32, i32, i32
  }
  func.func @transform_20(%arg0: i32) -> (i32, i32, i32) {
    %c0_i32 = arith.constant 0 : i32
    %c0_i32_0 = arith.constant 0 : i32
    %c0_i32_1 = arith.constant 0 : i32
    %c0_i32_2 = arith.constant 0 : i32
    return %c0_i32, %c0_i32_0, %c0_i32_1 : i32, i32, i32
  }
  func.func @transform_21(%arg0: i32) -> (i32, i32, i32) {
    %c0_i32 = arith.constant 0 : i32
    %c0_i32_0 = arith.constant 0 : i32
    %c0_i32_1 = arith.constant 0 : i32
    %c0_i32_2 = arith.constant 0 : i32
    return %c0_i32, %c0_i32_0, %c0_i32_1 : i32, i32, i32
  }
  func.func @transform_22(%arg0: i32) -> (i32, i32, i32) {
    %c0_i32 = arith.constant 0 : i32
    %c0_i32_0 = arith.constant 0 : i32
    %c0_i32_1 = arith.constant 0 : i32
    %c0_i32_2 = arith.constant 0 : i32
    return %c0_i32, %c0_i32_0, %c0_i32_1 : i32, i32, i32
  }
  func.func @transform_23(%arg0: i32) -> (i32, i32, i32) {
    %c0_i32 = arith.constant 0 : i32
    %c0_i32_0 = arith.constant 0 : i32
    %c0_i32_1 = arith.constant 0 : i32
    %c0_i32_2 = arith.constant 0 : i32
    return %c0_i32, %c0_i32_0, %c0_i32_1 : i32, i32, i32
  }
  func.func @transform_24(%arg0: i32) -> (i32, i32, i32) {
    %c0_i32 = arith.constant 0 : i32
    %c0_i32_0 = arith.constant 0 : i32
    %c0_i32_1 = arith.constant 0 : i32
    %c0_i32_2 = arith.constant 0 : i32
    return %c0_i32, %c0_i32_0, %c0_i32_1 : i32, i32, i32
  }
  func.func @transform_25(%arg0: i32) -> (i32, i32, i32) {
    %c0_i32 = arith.constant 0 : i32
    %c0_i32_0 = arith.constant 0 : i32
    %c0_i32_1 = arith.constant 0 : i32
    %c0_i32_2 = arith.constant 0 : i32
    return %c0_i32, %c0_i32_0, %c0_i32_1 : i32, i32, i32
  }
  func.func @transform_26(%arg0: i32) -> (i32, i32, i32) {
    %c0_i32 = arith.constant 0 : i32
    %c0_i32_0 = arith.constant 0 : i32
    %c0_i32_1 = arith.constant 0 : i32
    %c0_i32_2 = arith.constant 0 : i32
    return %c0_i32, %c0_i32_0, %c0_i32_1 : i32, i32, i32
  }
  func.func @transform_27(%arg0: i32) -> (i32, i32, i32) {
    %c0_i32 = arith.constant 0 : i32
    %c0_i32_0 = arith.constant 0 : i32
    %c0_i32_1 = arith.constant 0 : i32
    %c0_i32_2 = arith.constant 0 : i32
    return %c0_i32, %c0_i32_0, %c0_i32_1 : i32, i32, i32
  }
  func.func @transform_28(%arg0: i32) -> (i32, i32, i32) {
    %c0_i32 = arith.constant 0 : i32
    %c0_i32_0 = arith.constant 0 : i32
    %c0_i32_1 = arith.constant 0 : i32
    %c0_i32_2 = arith.constant 0 : i32
    return %c0_i32, %c0_i32_0, %c0_i32_1 : i32, i32, i32
  }
  func.func @transform_29(%arg0: i32) -> (i32, i32, i32) {
    %c0_i32 = arith.constant 0 : i32
    %c0_i32_0 = arith.constant 0 : i32
    %c0_i32_1 = arith.constant 0 : i32
    %c0_i32_2 = arith.constant 0 : i32
    return %c0_i32, %c0_i32_0, %c0_i32_1 : i32, i32, i32
  }
  func.func @transform_30(%arg0: i32) -> (i32, i32, i32, i32) {
    %c0_i32 = arith.constant 0 : i32
    %c0_i32_0 = arith.constant 0 : i32
    %c0_i32_1 = arith.constant 0 : i32
    %c0_i32_2 = arith.constant 0 : i32
    return %c0_i32, %arg0, %c0_i32_0, %c0_i32_1 : i32, i32, i32, i32
  }
}

</mosaic_0001>

<bundles_post_ra>
// kernel: wav2vec2_forward.1
= control target key start
LH: loop header
LB: loop body
LE: loop exit
PB: predicated region body
PF: predicated region fallthrough
CT: control target
= control target key end

     0   :  { %s7082_s6 = smov 1   ;;  %s7083_s10 = smov 2   ;;  %s8361_s0 = inlined_call_operand.smem [shape: u32[31], index: -1, kind: input, shape index: {}] }
   0x1   :  { %s7140_s5 = sld [smem:[%s8361_s0]]   ;;  %s7084_s14 = smov 3  }
   0x2   :  { %s7145_s9 = sld [smem:[%s8361_s0 + %s7082_s6]]   ;;  %s7085_s18 = smov 4  }
   0x3   :  { %s7150_s13 = sld [smem:[%s8361_s0 + %s7083_s10]]   ;;  %s7086_s22 = smov 5  }
   0x4   :  { %s7155_s17 = sld [smem:[%s8361_s0 + %s7084_s14]]   ;;  %s7087_s26 = smov 6  }
   0x5   :  { %s7160_s21 = sld [smem:[%s8361_s0 + %s7085_s18]]   ;;  %s7088_s30 = smov 7  }
   0x6   :  { %s7165_s25 = sld [smem:[%s8361_s0 + %s7086_s22]]   ;;  %s7089_s4 = smov 8  }
   0x7   :  { %8398 = sst [smem:[#allocation7_spill]] %s7140_s5  ;;  %s7090_s10 = smov 9  }
   0x8   :  { %8399 = sst [smem:[#allocation8_spill]] %s7145_s9  ;;  %s7091_s15 = smov 10  }
   0x9   :  { %8400 = sst [smem:[#allocation9_spill]] %s7150_s13  ;;  %s7092_s20 = smov 11  }
   0xa   :  { %8401 = sst [smem:[#allocation10_spill]] %s7155_s17  ;;  %s7094_s1 = smov 13  }
   0xb   :  { %8402 = sst [smem:[#allocation11_spill]] %s7160_s21  ;;  %s7095_s7 = smov 14  }
   0xc   :  { %s7170_s29 = sld [smem:[%s8361_s0 + %s7087_s26]]   ;;  %s7093_s26 = smov 12  }
   0xd   :  { %s7175_s3 = sld [smem:[%s8361_s0 + %s7088_s30]]   ;;  %s7097_s22 = smov 16  }
   0xe   :  { %s7180_s8 = sld [smem:[%s8361_s0 + %s7089_s4]]   ;;  %s7098_s28 = smov 17  }
   0xf   :  { %s7185_s14 = sld [smem:[%s8361_s0 + %s7090_s10]]  }
  0x10   :  { %s7190_s19 = sld [smem:[%s8361_s0 + %s7091_s15]]   ;;  %s7096_s15 = smov 15  }
  0x11   :  { %s7195_s24 = sld [smem:[%s8361_s0 + %s7092_s20]]  }
  0x12   :  { %s7200_s30 = sld [smem:[%s8361_s0 + %s7093_s26]]  }
  0x13   :  { %8403 = sst [smem:[#allocation12_spill]] %s7175_s3 }
  0x14   :  { %8404 = sst [smem:[#allocation13_spill]] %s7180_s8 }
  0x15   :  { %8405 = sst [smem:[#allocation14_spill]] %s7185_s14 }
  0x16   :  { %8406 = sst [smem:[#allocation15_spill]] %s7190_s19 }
  0x17   :  { %8407 = sst [smem:[#allocation16_spill]] %s7195_s24 }
  0x18   :  { %s7205_s6 = sld [smem:[%s8361_s0 + %s7094_s1]]  }
  0x19   :  { %s7210_s12 = sld [smem:[%s8361_s0 + %s7095_s7]]   ;;  %s7099_s7 = smov 18  }
  0x1a   :  { %s7215_s20 = sld [smem:[%s8361_s0 + %s7096_s15]]   ;;  %s7100_s15 = smov 19  }
  0x1b   :  { %s7220_s27 = sld [smem:[%s8361_s0 + %s7097_s22]]   ;;  %s7101_s22 = smov 20  }
  0x1c   :  { %s7225_s4 = sld [smem:[%s8361_s0 + %s7098_s28]]   ;;  %s7102_s28 = smov 21  }
  0x1e   :  { %8408 = sst [smem:[#allocation17_spill]] %s7205_s6 }
  0x1f   :  { %8409 = sst [smem:[#allocation18_spill]] %s7210_s12 }
  0x20   :  { %8410 = sst [smem:[#allocation19_spill]] %s7215_s20 }
  0x21   :  { %8411 = sst [smem:[#allocation20_spill]] %s7220_s27 }
  0x22   :  { %8412 = sst [smem:[#allocation21_spill]] %s7225_s4 }
  0x23   :  { %s7230_s6 = sld [smem:[%s8361_s0 + %s7099_s7]]   ;;  %s7103_s7 = smov 22  }
  0x24   :  { %s7235_s20 = sld [smem:[%s8361_s0 + %s7100_s15]]   ;;  %s7104_s15 = smov 23  }
  0x25   :  { %s7240_s27 = sld [smem:[%s8361_s0 + %s7101_s22]]   ;;  %s7105_s22 = smov 24  }
  0x26   :  { %s7245_s4 = sld [smem:[%s8361_s0 + %s7102_s28]]   ;;  %s7106_s28 = smov 25  }
  0x29   :  { %8413 = sst [smem:[#allocation22_spill]] %s7230_s6 }
  0x2a   :  { %8414 = sst [smem:[#allocation23_spill]] %s7235_s20 }
  0x2b   :  { %8415 = sst [smem:[#allocation24_spill]] %s7240_s27 }
  0x2c   :  { %8416 = sst [smem:[#allocation25_spill]] %s7245_s4 }
  0x2d   :  { %s7250_s6 = sld [smem:[%s8361_s0 + %s7103_s7]]   ;;  %s7107_s7 = smov 26  }
  0x2e   :  { %s7255_s20 = sld [smem:[%s8361_s0 + %s7104_s15]]   ;;  %s7108_s15 = smov 27  }
  0x2f   :  { %s7260_s27 = sld [smem:[%s8361_s0 + %s7105_s22]]   ;;  %s7109_s22 = smov 28  }
  0x30   :  { %s7265_s4 = sld [smem:[%s8361_s0 + %s7106_s28]]   ;;  %s7110_s28 = smov 29  }
  0x33   :  { %8417 = sst [smem:[#allocation26_spill]] %s7250_s6 }
  0x34   :  { %8418 = sst [smem:[#allocation27_spill]] %s7255_s20 }
  0x35   :  { %8419 = sst [smem:[#allocation28_spill]] %s7260_s27 }
  0x36   :  { %8420 = sst [smem:[#allocation29_spill]] %s7265_s4 }
  0x37   :  { %s7270_s6 = sld [smem:[%s8361_s0 + %s7107_s7]]   ;;  %s7111_s7 = smov 30  }
  0x38   :  { %s7275_s20 = sld [smem:[%s8361_s0 + %s7108_s15]]  }
  0x39   :  { %s7280_s27 = sld [smem:[%s8361_s0 + %s7109_s22]]  }
  0x3a   :  { %s7285_s4 = sld [smem:[%s8361_s0 + %s7110_s28]]  }
  0x3d   :  { %8421 = sst [smem:[#allocation30_spill]] %s7270_s6 }
  0x3e   :  { %s7290_s6 = sld [smem:[%s8361_s0 + %s7111_s7]]  }
  0x3f   :  { %66 = vsyncpa [#allocation5], 0 }
  0x40   :  { %68 = vsyncpa [#allocation5 + $0x1], 0  ;;  %s7292_s15 = smov 0   ;;  %s7294_s16 = smov 0  }
  0x41   :  { %s7296_s18 = smov 0   ;;  %s7298_s22 = smov 0  }
  0x42 LB: > { %s8422_s21 = sld [smem:[#allocation11_spill]]  ;;  %s7313_s0 = sadd.s32 4294967295, %s7080_s22   ;;  %s7080_s22 = sphi %s7298_s22, %s8466_s22   ;;  %s7076_s18 = sphi %s7296_s18, %s8465_s18   ;;  %s7072_s16 = sphi %s7294_s16, %s8464_s16   ;;  %s7068_s15 = sphi %s7292_s15, %s8463_s15  }
  0x43   : > { %s8423_s17 = sld [smem:[#allocation10_spill]]  ;;  %s5802_s23 = sadd.s32 4294967294, %s7080_s22  }
  0x44   : > { %s8424_s14 = sld [smem:[#allocation14_spill]]  ;;  %s7317_s26 = sadd.s32 1, %s7080_s22  }
  0x45   : > { %s8425_s13 = sld [smem:[#allocation9_spill]]  ;;  %s716_s28 = sadd.s32 1, %s7076_s18 }
  0x46   : > { %s8426_s12 = sld [smem:[#allocation18_spill]]  ;;  %s713_s1 = ssub.s32 %s7080_s22, %s7317_s26 }
  0x47   : > { %s8427_s9 = sld [smem:[#allocation8_spill]]  ;;  %p726_p0 = scmp.ne.s32.totalorder %s7076_s18, %s7072_s16 }
  0x48   : > { %s8428_s8 = sld [smem:[#allocation13_spill]]  ;;  %p714_p1 = scmp.eq.s32.totalorder %s713_s1, 0 }
  0x49   : > { %s8429_s3 = sld [smem:[#allocation12_spill]]  ;;  %p727_p2 = scmp.eq.s32.totalorder %s7313_s0, 1 }
  0x4a   : > { %p732_p3 = scmp.ne.s32.totalorder %s7072_s16, %s7068_s15  ;;  %p733_p4 = scmp.eq.s32.totalorder %s5802_s23, 1 }
  0x4b   : > { %s7328_s2 = scalar_select %p714_p1, %s7076_s18, %s716_s28  }
  0x4c   : > { %p7330_p5 = por %p727_p2, %p726_p0  ;;  %p7334_p6 = por %p733_p4, %p732_p3 }
  0x4d   : > { %p5805_p7 = scmp.ge.s32.totalorder %s7080_s22, 1  ;;  %p846_p8 = scmp.lt.s32.totalorder %s7080_s22, 3 }
  0x4f   : > { %p847_p9 = pnand %p5805_p7, %p846_p8 }
  0x50   : > { %s8432_s5 = sld [smem:[#allocation7_spill]] (!%p847_p9)  ;;  %p924_p10 = scmp.lt.s32.totalorder (!%p847_p9), %s7313_s0, 1 }
  0x51   : > { %850 = sbr.rel (%p847_p9) target bundleno = 8423 (0x20e7), region = 140  ;;  %s8433_s19 = sld [smem:[#allocation15_spill]] (!%p847_p9) }
  0x52   : > { %s8434_s24 = sld [smem:[#allocation16_spill]] (!%p847_p9) }
  0x53   : > { %s8435_s1 = sld [smem:[#allocation17_spill]] (!%p847_p9) }
  0x56   : > { %v6794_v0 = vld [vmem:[%s8427_s9] sm:$0xff]   ;;  %v7112_v1 = vmov 0   ;;  %vm961_vm0 = vcmask 80896   ;;  %s925_s11 = scalar_select %p924_p10, %s7313_s0, 1  ;;  %vm968_vm1 = vcmask 1044480   ;;  %v6795_v5 = vld [vmem:[%s8427_s9 + $0x8] sm:$0xff]  }
  0x57   : > { %1010 = vmatprep.mubr.bf16.mxu0 %v7112_v1  ;;  %6789 = vset.pattern.permute.xlu1 %v7112_v1  ;;  %vm1081_vm2 = vcmask 515072   ;;  %vm1450_vm3 = vcmask 261120   ;;  %vm1490_vm4 = vcmask 260096   ;;  %vm7114_vm5 = vmmov 0   ;;  %s8389_s9 = smov 112  }
  0x58   : > { %6245 = vmatprep.mubr.msk.bf16.mxu1 %vm961_vm0, %v6794_v0  ;;  %6788 = vset.pattern.permute.xlu0 %v7112_v1  ;;  %s6699_s23 = smul.u32 24, %s925_s11  ;;  %vm3421_vm6 = vcmask 256000   ;;  %vm3569_vm7 = vcmask 253952   ;;  %vm3705_vm8 = vcmask 257024   ;;  %vm3804_vm9 = vcmask 1047556   ;;  %s8436_s11 = sld [smem:[#allocation19_spill]] }
  0x59   : > { %vm4125_vm12 = vcmask 64512   ;;  %vm4172_vm13 = vcmask 27648   ;;  %vm4191_vm14 = vcmask 1041408   ;;  %vm4187_vm15 = vcmask 31744  }
  0x5a   : > { %s928_s28 = scalar_lea.vmem %s8432_s5, %s6699_s23  ;;  %s8437_s23 = sld [smem:[#allocation22_spill]] }
  0x5b   : > { %v6790_v2 = vld [vmem:[%s928_s28 + $0x4] ss:$12 sps:$4 sm:$0x1f]   ;;  %v6792_v3 = vld [vmem:[%s928_s28 + $0x8] ss:$12 sps:$4 sm:$0x1f]  }
  0x5c   : > { %5812 = vmatprep.subr.msk.bf16.mxu0 %vm968_vm1, %v6790_v2  ;;  %v6793_v4 = vld [vmem:[%s928_s28] ss:$12 sps:$4 sm:$0x1f]   ;;  %6697 = vmatprep.subr.msk.bf16.mxu1 %vm968_vm1, %v6792_v3  ;;  %v976_v7 = vsel %vm968_vm1, %v6792_v3, 0  ;;  %v1176_v3 = vld [vmem:[%s8425_s13 + $0x10] sm:$0xff]  ;;  %s8438_s28 = sld [smem:[#allocation20_spill]] }
  0x5d   : > { %v970_v6 = vsel %vm968_vm1, %v6793_v4, 0  ;;  %6244 = vmatpush3.bf16.msra.mxu1 %v976_v7  ;;  %v1210_v2 = vld [vmem:[%s8423_s17] sm:$0xff]  ;;  %v1212_v7 = vld [vmem:[%s8423_s17 + $0x10] sm:$0xff]  ;;  %vm4581_vm1 = vcmask 195584  }
  0x5e   : > { %993 = vmatpush1.bf16.msra.mxu0 %v970_v6  ;;  %v1174_v4 = vld [vmem:[%s8425_s13] sm:$0xff]  ;;  %v1177_v6 = vld [vmem:[%s8425_s13 + $0x18] sm:$0xff] }
  0x60   : > { %6246 = vmatmul.mubr.msk.bf16.vlgmr.msra.gmra.mxu1 %vm961_vm0, %v6795_v5 }
  0x61   : > { %5813 = vmatmul.mubr.msk.bf16.vlgmr.msra.gmra.mxu0 %vm961_vm0, %v6794_v0 }
  0x62   : > { %1020 = vmatprep.mubr.bf16.mxu0 %v7112_v1  ;;  %v1175_v1 = vld [vmem:[%s8425_s13 + $0x8] sm:$0xff]  ;;  %s8447_s13 = sld [smem:[#allocation29_spill]] }
  0x69   : > { %5814 = vmatmul.mubr.msk.bf16.gmra.mxu0 %vm961_vm0, %v6795_v5  ;;  %v1211_v5 = vld [vmem:[%s8423_s17 + $0x8] sm:$0xff]  ;;  %vm4579_vm0 = vcmask 130048  }
 0x120   : > { %v6247_v9 = vpop.f32.mrf.mxu1 }
 0x121   : > { %v1012_v8 = vpop.f32.mrf.mxu0  ;;  %v1092_v26 = vsel %vm1081_vm2, %v6247_v9, 0.0 }
 0x122   : > { %v1065_v11 = vpop.f32.mrf.mxu1 }
 0x123   : > { %v1014_v10 = vpop.f32.mrf.mxu0  ;;  %v1082_v13 = vsel %vm1081_vm2, %v1065_v11, 0.0 }
 0x124   : > { %v1080_v12 = vadd.f32 %v1014_v10, %v1012_v8  ;;  %v7350_v15 = vpop.f32.mrf.mxu1 }
 0x125   : > { %v1016_v14 = vpop.f32.mrf.mxu0  ;;  %v1097_v30 = vsel %vm1081_vm2, %v7350_v15, 0.0 }
 0x126   : > { %v1083_v16 = vadd.f32 %v1082_v13, %v1080_v12  ;;  %v1068_v18 = vpop.f32.mrf.mxu1 }
 0x127   : > { %v1018_v17 = vpop.f32.mrf.mxu0  ;;  %v1087_v20 = vsel %vm1081_vm2, %v1068_v18, 0.0 }
 0x128   : > { %1084 = vadd.xlane.f32.xlu0 %v1083_v16  ;;  %v1086_v19 = vadd.f32 %v1018_v17, %v1016_v14 }
 0x129   : > { %v1022_v21 = vpop.f32.mrf.mxu0 }
 0x12a   : > { %v1088_v22 = vadd.f32 %v1087_v20, %v1086_v19  ;;  %v1213_v20 = vld [vmem:[%s8423_s17 + $0x18] sm:$0xff]  ;;  %s8449_s17 = smov 96  }
 0x12b   : > { %v1024_v23 = vpop.f32.mrf.mxu0 }
 0x12c   : > { %v1091_v24 = vadd.f32 %v1024_v23, %v1022_v21  ;;  %1089 = vadd.xlane.f32.xlu0 %v1088_v22 }
 0x12d   : > { %v1026_v25 = vpop.f32.mrf.mxu0 }
 0x12e   : > { %v1093_v27 = vadd.f32 %v1092_v26, %v1091_v24 }
 0x12f   : > { %v1028_v28 = vpop.f32.mrf.mxu0 }
 0x130   : > { %1094 = vadd.xlane.f32.xlu1 %v1093_v27  ;;  %v1096_v29 = vadd.f32 %v1028_v28, %v1026_v25 }
 0x132   : > { %v1098_v31 = vadd.f32 %v1097_v30, %v1096_v29 }
 0x134   : > { %1099 = vadd.xlane.f32.xlu1 %v1098_v31 }
 0x1b1   : > { %v1085_v32 = vpop.xlane.xlu0 %1084 }
 0x1b2   : > { %v1102_v33 = vmul.f32 0.0031347962, %v1085_v32 }
 0x1b4   : > { %v7356_v34 = vsub.f32 %v1012_v8, %v1102_v33  ;;  %v7358_v35 = vsub.f32 %v1014_v10, %v1102_v33  ;;  %v7360_v36 = vsub.f32 %v1065_v11, %v1102_v33 }
 0x1b5   : > { %v1090_v37 = vpop.xlane.xlu0 %1089 }
 0x1b6   : > { %v1103_v38 = vmul.f32 0.0031347962, %v1090_v37  ;;  %v1118_v39 = vmul.f32 %v7356_v34, %v7356_v34  ;;  %v1119_v40 = vmul.f32 %v7358_v35, %v7358_v35  ;;  %v1120_v41 = vmul.f32 %v7360_v36, %v7360_v36 }
 0x1b8   : > { %v7368_v42 = vsub.f32 %v1016_v14, %v1103_v38  ;;  %v7370_v43 = vsub.f32 %v1018_v17, %v1103_v38  ;;  %v7372_v44 = vsub.f32 %v1068_v18, %v1103_v38  ;;  %v1130_v45 = vadd.f32 %v1119_v40, %v1118_v39 }
 0x1b9   : > { %v1095_v46 = vpop.xlane.xlu1 %1094  ;;  %v1131_v47 = vsel %vm1081_vm2, %v1120_v41, 0.0 }
 0x1ba   : > { %v1104_v48 = vmul.f32 0.0031347962, %v1095_v46  ;;  %v1132_v49 = vadd.f32 %v1131_v47, %v1130_v45  ;;  %v1121_v50 = vmul.f32 %v7368_v42, %v7368_v42  ;;  %v1122_v51 = vmul.f32 %v7370_v43, %v7370_v43 }
 0x1bb   : > { %v1123_v52 = vmul.f32 %v7372_v44, %v7372_v44 }
 0x1bc   : > { %v7381_v53 = vsub.f32 %v1022_v21, %v1104_v48  ;;  %v7383_v54 = vsub.f32 %v1024_v23, %v1104_v48  ;;  %v7385_v55 = vsub.f32 %v6247_v9, %v1104_v48  ;;  %1133 = vadd.xlane.f32.xlu0 %v1132_v49  ;;  %v1135_v56 = vadd.f32 %v1122_v51, %v1121_v50 }
 0x1bd   : > { %v1136_v57 = vsel %vm1081_vm2, %v1123_v52, 0.0  ;;  %v1100_v8 = vpop.xlane.xlu1 %1099 }
 0x1be   : > { %v1137_v58 = vadd.f32 %v1136_v57, %v1135_v56  ;;  %v1124_v59 = vmul.f32 %v7381_v53, %v7381_v53  ;;  %v1125_v60 = vmul.f32 %v7383_v54, %v7383_v54  ;;  %v1126_v61 = vmul.f32 %v7385_v55, %v7385_v55 }
 0x1bf   : > { %v1105_v9 = vmul.f32 0.0031347962, %v1100_v8 }
 0x1c0   : > { %1138 = vadd.xlane.f32.xlu1 %v1137_v58  ;;  %v1140_v62 = vadd.f32 %v1125_v60, %v1124_v59  ;;  %v1141_v63 = vsel %vm1081_vm2, %v1126_v61, 0.0 }
 0x1c1   : > { %v7402_v10 = vsub.f32 %v1026_v25, %v1105_v9  ;;  %v7404_v11 = vsub.f32 %v1028_v28, %v1105_v9  ;;  %v7407_v12 = vsub.f32 %v7350_v15, %v1105_v9 }
 0x1c2   : > { %v1142_v0 = vadd.f32 %v1141_v63, %v1140_v62 }
 0x1c3   : > { %v1127_v13 = vmul.f32 %v7402_v10, %v7402_v10  ;;  %v1128_v14 = vmul.f32 %v7404_v11, %v7404_v11  ;;  %v1129_v16 = vmul.f32 %v7407_v12, %v7407_v12 }
 0x1c4   : > { %1143 = vadd.xlane.f32.xlu0 %v1142_v0 }
 0x1c5   : > { %v1145_v17 = vadd.f32 %v1128_v14, %v1127_v13  ;;  %v1146_v18 = vsel %vm1081_vm2, %v1129_v16, 0.0  ;;  %vm4796_vm2 = vcmask 523264  }
 0x1c7   : > { %v1147_v19 = vadd.f32 %v1146_v18, %v1145_v17 }
 0x1d1   : > { %1185 = vperm.xlu1 %6789, %v1175_v1  }
 0x1d5   : > { %1216 = vperm.xlu1 %6789, %v1210_v2  }
 0x1d9   : > { %1190 = vperm.xlu1 %6789, %v1176_v3  }
 0x1da   : > { %1180 = vperm.xlu0 %6788, %v1174_v4  }
 0x1dd   : > { %1221 = vperm.xlu1 %6789, %v1211_v5  }
 0x1e1   : > { %1195 = vperm.xlu1 %6789, %v1177_v6  }
 0x1e5   : > { %1226 = vperm.xlu1 %6789, %v1212_v7  }
 0x209   : > { %1148 = vadd.xlane.f32.xlu1 %v1147_v19 }
 0x21a   : > { %1231 = vperm.xlu1 %6789, %v1213_v20  }
 0x245   : > { %v1134_v21 = vpop.xlane.xlu0 %1133 }
 0x246   : > { %v1150_v22 = vmul.f32 0.0031347962, %v1134_v21 }
 0x248   : > { %v1154_v15 = vadd.f32 1e-05, %v1150_v22 }
 0x249   : > { %v1139_v23 = vpop.xlane.xlu1 %1138 }
 0x24a   : > { %6856 = vrsqrt.f32 %v1154_v15  ;;  %v1151_v24 = vmul.f32 0.0031347962, %v1139_v23 }
 0x24c   : > { %v1155_v25 = vadd.f32 1e-05, %v1151_v24 }
 0x24d   : > { %v1144_v26 = vpop.xlane.xlu0 %1143  ;;  %v7417_v27 = vpop.permute.xlu1 %1185 }
 0x24e   : > { %6858 = vrsqrt.f32 %v1155_v25  ;;  %v1152_v28 = vmul.f32 0.0031347962, %v1144_v26 }
 0x250   : > { %v1156_v29 = vadd.f32 1e-05, %v1152_v28 }
 0x251   : > { %v7419_v30 = vpop.permute.xlu1 %1216 }
 0x252   : > { %6860 = vrsqrt.f32 %v1156_v29 }
 0x255   : > { %v7421_v31 = vpop.permute.xlu1 %1190  ;;  %v7425_v33 = vpop.permute.xlu0 %1180 }
 0x257   : > { %v7423_v32 = vpop.eup %6856 }
 0x258   : > { %v1162_v37 = vmul.f32 %v7423_v32, %v7356_v34  ;;  %v1163_v38 = vmul.f32 %v7423_v32, %v7358_v35 }
 0x259   : > { %v7431_v39 = vpop.permute.xlu1 %1221 }
 0x25a   : > { %v1198_v40 = vmul.f32 %v7425_v33, %v1162_v37  ;;  %v1199_v41 = vmul.f32 %v7425_v33, %v1163_v38 }
 0x25b   : > { %v7435_v45 = vpop.eup %6858 }
 0x25c   : > { %v1165_v46 = vmul.f32 %v7435_v45, %v7368_v42  ;;  %v1166_v47 = vmul.f32 %v7435_v45, %v7370_v43  ;;  %v7442_v48 = vadd.f32 %v7419_v30, %v1198_v40  ;;  %v1235_v34 = vadd.f32 %v7419_v30, %v1199_v41 }
 0x25d   : > { %v7445_v35 = vpop.permute.xlu1 %1195 }
 0x25e   : > { %v1201_v49 = vmul.f32 %v7417_v27, %v1165_v46  ;;  %v1202_v50 = vmul.f32 %v7417_v27, %v1166_v47  ;;  %v1246_v51 = vmul.f32 %v7442_v48, %v7442_v48  ;;  %v1247_v42 = vmul.f32 %v1235_v34, %v1235_v34 }
 0x25f   : > { %v7451_v52 = vpop.eup %6860 }
 0x260   : > { %v1168_v43 = vmul.f32 %v7451_v52, %v7381_v53  ;;  %v1169_v56 = vmul.f32 %v7451_v52, %v7383_v54  ;;  %v1237_v57 = vadd.f32 %v7431_v39, %v1201_v49  ;;  %v1238_v58 = vadd.f32 %v7431_v39, %v1202_v50 }
 0x261   : > { %v1259_v59 = vmul.f32 %v1247_v42, %v1235_v34  ;;  %v1258_v60 = vmul.f32 %v1246_v51, %v7442_v48  ;;  %v7462_v1 = vpop.permute.xlu1 %1226 }
 0x262   : > { %v1204_v61 = vmul.f32 %v7421_v31, %v1168_v43  ;;  %v1205_v62 = vmul.f32 %v7421_v31, %v1169_v56  ;;  %v1249_v63 = vmul.f32 %v1237_v57, %v1237_v57  ;;  %v1250_v0 = vmul.f32 %v1238_v58, %v1238_v58 }
 0x263   : > { %v1271_v2 = vmul.f32 0.044715, %v1259_v59  ;;  %v1270_v53 = vmul.f32 0.044715, %v1258_v60 }
 0x264   : > { %v1261_v3 = vmul.f32 %v1249_v63, %v1237_v57  ;;  %v1240_v54 = vadd.f32 %v7462_v1, %v1204_v61  ;;  %v1241_v4 = vadd.f32 %v7462_v1, %v1205_v62  ;;  %v1262_v5 = vmul.f32 %v1250_v0, %v1238_v58 }
 0x265   : > { %v1283_v6 = vadd.f32 %v1271_v2, %v1235_v34  ;;  %v1282_v7 = vadd.f32 %v1270_v53, %v7442_v48 }
 0x266   : > { %v1273_v8 = vmul.f32 0.044715, %v1261_v3  ;;  %v1252_v9 = vmul.f32 %v1240_v54, %v1240_v54  ;;  %v1253_v13 = vmul.f32 %v1241_v4, %v1241_v4  ;;  %v1274_v14 = vmul.f32 0.044715, %v1262_v5 }
 0x267   : > { %v1295_v16 = vmul.f32 0.7978846, %v1283_v6  ;;  %v1294_v21 = vmul.f32 0.7978846, %v1282_v7 }
 0x268   : > { %v1285_v17 = vadd.f32 %v1273_v8, %v1237_v57  ;;  %v1264_v18 = vmul.f32 %v1252_v9, %v1240_v54  ;;  %v1265_v19 = vmul.f32 %v1253_v13, %v1241_v4  ;;  %v1286_v20 = vadd.f32 %v1274_v14, %v1238_v58 }
 0x269   : > { %6862 = vtanh.f32 %v1295_v16 }
 0x26a   : > { %v1276_v22 = vmul.f32 0.044715, %v1264_v18  ;;  %v1277_v15 = vmul.f32 0.044715, %v1265_v19  ;;  %6864 = vtanh.f32 %v1294_v21  ;;  %v1298_v23 = vmul.f32 0.7978846, %v1286_v20 }
 0x26b   : > { %v1297_v24 = vmul.f32 0.7978846, %v1285_v17 }
 0x26c   : > { %v1288_v25 = vadd.f32 %v1276_v22, %v1240_v54  ;;  %v1289_v26 = vadd.f32 %v1277_v15, %v1241_v4  ;;  %6866 = vtanh.f32 %v1298_v23 }
 0x26d   : > { %6868 = vtanh.f32 %v1297_v24 }
 0x26e   : > { %v1301_v28 = vmul.f32 0.7978846, %v1289_v26  ;;  %v1300_v29 = vmul.f32 0.7978846, %v1288_v25 }
 0x270   : > { %6870 = vtanh.f32 %v1301_v28 }
 0x271   : > { %6872 = vtanh.f32 %v1300_v29 }
 0x276   : > { %v6863_v37 = vpop.eup %6862 }
 0x277   : > { %v1319_v38 = vadd.f32 1.0, %v6863_v37  ;;  %v6865_v40 = vpop.eup %6864  ;;  %v1167_v37 = vmul.f32 %v7435_v45, %v7372_v44 }
 0x278   : > { %v1318_v46 = vadd.f32 1.0, %v6865_v40 }
 0x279   : > { %v1331_v41 = vmul.f32 0.5, %v1319_v38  ;;  %v6867_v47 = vpop.eup %6866 }
 0x27a   : > { %v6869_v49 = vpop.eup %6868  ;;  %v1330_v51 = vmul.f32 0.5, %v1318_v46  ;;  %v1322_v42 = vadd.f32 1.0, %v6867_v47 }
 0x27b   : > { %v1343_v50 = vmul.f32 %v1331_v41, %v1235_v34  ;;  %v1321_v43 = vadd.f32 1.0, %v6869_v49  ;;  %v1203_v49 = vmul.f32 %v7417_v27, %v1167_v37 }
 0x27c   : > { %v1342_v59 = vmul.f32 %v1330_v51, %v7442_v48  ;;  %v1334_v60 = vmul.f32 0.5, %v1322_v42 }
 0x27d   : > { %v6871_v56 = vpop.eup %6870  ;;  %1386 = vxpose.xlu0.b32.start [1/4] (short) %v1343_v50, 128  ;;  %v1333_v62 = vmul.f32 0.5, %v1321_v43  ;;  %v1170_v50 = vmul.f32 %v7451_v52, %v7385_v55  ;;  %v1239_v44 = vadd.f32 %v7431_v39, %v1203_v49 }
 0x27e   : > { %v6873_v61 = vpop.eup %6872  ;;  %v1325_v63 = vadd.f32 1.0, %v6871_v56  ;;  %1354 = vxpose.xlu1.b32.start [1/4] (short) %v1342_v59, 128  ;;  %v1346_v0 = vmul.f32 %v1334_v60, %v1238_v58  ;;  %v6796_v59 = vld [vmem:[%s8422_s21 + $0x18] sm:$0xff]   ;;  %v6797_v60 = vld [vmem:[%s8422_s21 + $0x8] sm:$0xff]  }
 0x27f   : > { %v1324_v2 = vadd.f32 1.0, %v6873_v61  ;;  %v1345_v53 = vmul.f32 %v1333_v62, %v1237_v57  ;;  %v1251_v51 = vmul.f32 %v1239_v44, %v1239_v44  ;;  %6249 = vmatprep.subr.bf16.mxu1 %v6796_v59  ;;  %6273 = vmatprep.subr.bf16.mxu0 %v6797_v60 }
 0x280   : > { %v1337_v3 = vmul.f32 0.5, %v1325_v63  ;;  %6250 = vmatpush3.bf16.msra.mxu1 %v6796_v59  ;;  %6274 = vmatpush3.bf16.msra.mxu0 %v6797_v60 }
 0x281   : > { %1387 = vxpose.xlu0.b32.cont [2/4] (short) %v1346_v0, 128  ;;  %v1336_v5 = vmul.f32 0.5, %v1324_v2  ;;  %v1263_v52 = vmul.f32 %v1251_v51, %v1239_v44 }
 0x282   : > { %v1349_v6 = vmul.f32 %v1337_v3, %v1241_v4  ;;  %1355 = vxpose.xlu1.b32.cont [2/4] (short) %v1345_v53, 128 }
 0x283   : > { %v1348_v34 = vmul.f32 %v1336_v5, %v1240_v54 }
 0x285   : > { %1388 = vxpose.xlu0.b32.cont [3/4] (short) %v1349_v6, 128 }
 0x286   : > { %1356 = vxpose.xlu1.b32.cont [3/4] (short) %v1348_v34, 128 }
 0x292   : > { %v1149_v7 = vpop.xlane.xlu1 %1148 }
 0x293   : > { %v1153_v8 = vmul.f32 0.0031347962, %v1149_v7 }
 0x295   : > { %v1157_v9 = vadd.f32 1e-05, %v1153_v8 }
 0x296   : > { %v1232_v16 = vpop.permute.xlu1 %1231 }
 0x297   : > { %6874 = vrsqrt.f32 %v1157_v9 }
 0x2a4   : > { %v6875_v48 = vpop.eup %6874 }
 0x2a5   : > { %v1171_v13 = vmul.f32 %v6875_v48, %v7402_v10  ;;  %v1172_v14 = vmul.f32 %v6875_v48, %v7404_v11  ;;  %v1164_v10 = vmul.f32 %v7423_v32, %v7360_v36  ;;  %v1206_v32 = vmul.f32 %v7421_v31, %v1170_v50 }
 0x2a6   : > { %v1275_v31 = vmul.f32 0.044715, %v1263_v52 }
 0x2a7   : > { %v1207_v58 = vmul.f32 %v7445_v35, %v1171_v13  ;;  %v1208_v57 = vmul.f32 %v7445_v35, %v1172_v14  ;;  %v1200_v38 = vmul.f32 %v7425_v33, %v1164_v10  ;;  %v1173_v33 = vmul.f32 %v6875_v48, %v7407_v12  ;;  %v6798_v12 = vld [vmem:[%s8422_s21 + $0x10] sm:$0xff]  }
 0x2a8   : > { %v1242_v42 = vadd.f32 %v7462_v1, %v1206_v32  ;;  %v6799_v1 = vld [vmem:[%s8422_s21] sm:$0xff]   ;;  %6251 = vmatprep.subr.bf16.mxu1 %v6798_v12 }
 0x2a9   : > { %v1243_v17 = vadd.f32 %v1232_v16, %v1207_v58  ;;  %v1244_v4 = vadd.f32 %v1232_v16, %v1208_v57  ;;  %v1236_v36 = vadd.f32 %v7419_v30, %v1200_v38  ;;  %v1209_v27 = vmul.f32 %v7445_v35, %v1173_v33  ;;  %6275 = vmatprep.subr.bf16.mxu0 %v6799_v1 }
 0x2aa   : > { %v1254_v30 = vmul.f32 %v1242_v42, %v1242_v42  ;;  %v1287_v35 = vadd.f32 %v1275_v31, %v1239_v44  ;;  %6252 = vmatpush3.bf16.msra.mxu1 %v6798_v12  ;;  %6276 = vmatpush3.bf16.msra.mxu0 %v6799_v1 }
 0x2ab   : > { %v1255_v18 = vmul.f32 %v1243_v17, %v1243_v17  ;;  %v1256_v54 = vmul.f32 %v1244_v4, %v1244_v4  ;;  %v1248_v45 = vmul.f32 %v1236_v36, %v1236_v36  ;;  %v1245_v43 = vadd.f32 %v1232_v16, %v1209_v27 }
 0x2ac   : > { %v1266_v61 = vmul.f32 %v1254_v30, %v1242_v42  ;;  %v1299_v5 = vmul.f32 0.7978846, %v1287_v35 }
 0x2ad   : > { %v1267_v19 = vmul.f32 %v1255_v18, %v1243_v17  ;;  %v1268_v20 = vmul.f32 %v1256_v54, %v1244_v4  ;;  %v1260_v55 = vmul.f32 %v1248_v45, %v1236_v36  ;;  %v1257_v39 = vmul.f32 %v1245_v43, %v1245_v43 }
 0x2ae   : > { %v1278_v63 = vmul.f32 0.044715, %v1266_v61  ;;  %v6801_v61 = vld [vmem:[%s8422_s21 + $0x20] sm:$0xff]  }
 0x2af   : > { %v1279_v21 = vmul.f32 0.044715, %v1267_v19  ;;  %v1280_v22 = vmul.f32 0.044715, %v1268_v20  ;;  %v1272_v56 = vmul.f32 0.044715, %v1260_v55  ;;  %v1269_v0 = vmul.f32 %v1257_v39, %v1245_v43 }
 0x2b0   : > { %v1290_v53 = vadd.f32 %v1278_v63, %v1242_v42 }
 0x2b1   : > { %v1291_v15 = vadd.f32 %v1279_v21, %v1243_v17  ;;  %v1292_v23 = vadd.f32 %v1280_v22, %v1244_v4  ;;  %v1284_v62 = vadd.f32 %v1272_v56, %v1236_v36  ;;  %v1281_v3 = vmul.f32 0.044715, %v1269_v0  ;;  %v6800_v22 = vld [vmem:[%s8422_s21 + $0x28] sm:$0xff]   ;;  %s8451_s21 = smov 120  }
 0x2b2   : > { %v1302_v34 = vmul.f32 0.7978846, %v1290_v53  ;;  %6297 = vmatprep.subr.bf16.mxu1 %v6800_v22 }
 0x2b3   : > { %v1303_v24 = vmul.f32 0.7978846, %v1291_v15  ;;  %v1304_v25 = vmul.f32 0.7978846, %v1292_v23  ;;  %v1296_v2 = vmul.f32 0.7978846, %v1284_v62  ;;  %v1293_v6 = vadd.f32 %v1281_v3, %v1245_v43 }
 0x2b5   : > { %6876 = vtanh.f32 %v1303_v24  ;;  %v1305_v7 = vmul.f32 0.7978846, %v1293_v6 }
 0x2b6   : > { %6878 = vtanh.f32 %v1304_v25 }
 0x2b7   : > { %6880 = vtanh.f32 %v1296_v2 }
 0x2b8   : > { %6882 = vtanh.f32 %v1299_v5 }
 0x2b9   : > { %6884 = vtanh.f32 %v1302_v34 }
 0x2ba   : > { %6886 = vtanh.f32 %v1305_v7 }
 0x2c2   : > { %v6877_v11 = vpop.eup %6876 }
 0x2c3   : > { %v6879_v26 = vpop.eup %6878  ;;  %v1327_v28 = vadd.f32 1.0, %v6877_v11 }
 0x2c4   : > { %v1328_v29 = vadd.f32 1.0, %v6879_v26  ;;  %v6881_v8 = vpop.eup %6880 }
 0x2c5   : > { %v1339_v40 = vmul.f32 0.5, %v1327_v28  ;;  %v1320_v9 = vadd.f32 1.0, %v6881_v8  ;;  %v6883_v48 = vpop.eup %6882 }
 0x2c6   : > { %v1340_v41 = vmul.f32 0.5, %v1328_v29  ;;  %v1323_v14 = vadd.f32 1.0, %v6883_v48  ;;  %v6885_v58 = vpop.eup %6884 }
 0x2c7   : > { %v1351_v46 = vmul.f32 %v1339_v40, %v1243_v17  ;;  %v1332_v13 = vmul.f32 0.5, %v1320_v9  ;;  %v1326_v17 = vadd.f32 1.0, %v6885_v58 }
 0x2c8   : > { %v1352_v47 = vmul.f32 %v1340_v41, %v1244_v4  ;;  %v1335_v16 = vmul.f32 0.5, %v1323_v14  ;;  %v6887_v4 = vpop.eup %6886 }
 0x2c9   : > { %1357 = vxpose.xlu1.b32.end [4/4] (short) %v1351_v46, 128  ;;  %v1344_v57 = vmul.f32 %v1332_v13, %v1236_v36  ;;  %v1338_v54 = vmul.f32 0.5, %v1326_v17  ;;  %v1329_v19 = vadd.f32 1.0, %v6887_v4 }
 0x2ca   : > { %1389 = vxpose.xlu0.b32.end [4/4] (short) %v1352_v47, 128  ;;  %v1347_v18 = vmul.f32 %v1335_v16, %v1239_v44 }
 0x2cb   : > { %v1350_v20 = vmul.f32 %v1338_v54, %v1242_v42  ;;  %v1341_v21 = vmul.f32 0.5, %v1329_v19 }
 0x2cd   : > { %v1353_v15 = vmul.f32 %v1341_v21, %v1245_v43 }
 0x2fb   : > { %1418 = vxpose.xlu0.b32.start [1/4] (short) (narrow) %v1344_v57, 64 }
 0x2ff   : > { %1419 = vxpose.xlu0.b32.cont [2/4] (short) (narrow) %v1347_v18, 64 }
 0x303   : > { %1420 = vxpose.xlu0.b32.cont [3/4] (short) (narrow) %v1350_v20, 64 }
 0x307   : > { %1421 = vxpose.xlu0.b32.end [4/4] (short) (narrow) %v1353_v15, 64 }
 0x339   : > { %v1370_v23 = vpop.trf.xlu1 }
 0x33a   : > { %v1402_v24 = vpop.trf.xlu0  ;;  %1451 = vst.msk [vmem:[#allocation2] sm:$0xff] %vm1450_vm3, %v1370_v23 }
 0x33b   : > { %1467 = vst.msk [vmem:[#allocation2 + $0x80] sm:$0xff] %vm1450_vm3, %v1402_v24 }
 0x33d   : > { %v1371_v25 = vpop.trf.xlu1 }
 0x33e   : > { %v1403_v10 = vpop.trf.xlu0  ;;  %1452 = vst.msk [vmem:[#allocation2 + $0x8] sm:$0xff] %vm1450_vm3, %v1371_v25 }
 0x33f   : > { %1468 = vst.msk [vmem:[#allocation2 + $0x88] sm:$0xff] %vm1450_vm3, %v1403_v10 }
 0x341   : > { %v1372_v11 = vpop.trf.xlu1 }
 0x342   : > { %v1404_v26 = vpop.trf.xlu0  ;;  %1453 = vst.msk [vmem:[#allocation2 + $0x10] sm:$0xff] %vm1450_vm3, %v1372_v11 }
 0x343   : > { %1469 = vst.msk [vmem:[#allocation2 + $0x90] sm:$0xff] %vm1450_vm3, %v1404_v26 }
 0x345   : > { %v1373_v28 = vpop.trf.xlu1  ;;  %v1546_v40 = vld [vmem:[#allocation2 + $0x1] ss:$2 sm:$0xff]  ;;  %v1492_v47 = vld [vmem:[#allocation2] ss:$2 sm:$0xff] }
 0x346   : > { %v1405_v29 = vpop.trf.xlu0  ;;  %1454 = vst.msk [vmem:[#allocation2 + $0x18] sm:$0xff] %vm1450_vm3, %v1373_v28  ;;  %v1562_v21 = vld [vmem:[#allocation2 + $0x81] ss:$2 sm:$0xff] }
 0x347   : > { %1470 = vst.msk [vmem:[#allocation2 + $0x98] sm:$0xff] %vm1450_vm3, %v1405_v29 }
 0x349   : > { %v1374_v37 = vpop.trf.xlu1 }
 0x34a   : > { %v1406_v38 = vpop.trf.xlu0  ;;  %1455 = vst.msk [vmem:[#allocation2 + $0x20] sm:$0xff] %vm1450_vm3, %v1374_v37 }
 0x34b   : > { %1471 = vst.msk [vmem:[#allocation2 + $0xa0] sm:$0xff] %vm1450_vm3, %v1406_v38 }
 0x34d   : > { %v1375_v41 = vpop.trf.xlu1  ;;  %v1548_v46 = vld [vmem:[#allocation2 + $0x11] ss:$2 sm:$0xff]  ;;  %v1494_v49 = vld [vmem:[#allocation2 + $0x10] ss:$2 sm:$0xff] }
 0x34e   : > { %v1407_v50 = vpop.trf.xlu0  ;;  %1456 = vst.msk [vmem:[#allocation2 + $0x28] sm:$0xff] %vm1450_vm3, %v1375_v41  ;;  %v1590_v36 = vpack.c.bf16 %v1548_v46, %v1546_v40  ;;  %v1535_v32 = vpack.c.bf16 %v1494_v49, %v1492_v47  ;;  %v1564_v57 = vld [vmem:[#allocation2 + $0x91] ss:$2 sm:$0xff]  ;;  %v1510_v16 = vld [vmem:[#allocation2 + $0x90] ss:$2 sm:$0xff] }
 0x34f   : > { %1472 = vst.msk [vmem:[#allocation2 + $0xa8] sm:$0xff] %vm1450_vm3, %v1407_v50  ;;  %v1594_v15 = vpack.c.bf16 %v1564_v57, %v1562_v21 }
 0x350   : > { %6253 = vmatprep.mubr.msk.bf16.mxu1 %vm1450_vm3, %v1590_v36  ;;  %6277 = vmatprep.mubr.msk.bf16.mxu0 %vm1450_vm3, %v1535_v32 }
 0x351   : > { %v1376_v44 = vpop.trf.xlu1 }
 0x352   : > { %v1408_v33 = vpop.trf.xlu0  ;;  %1457 = vst.msk [vmem:[#allocation2 + $0x30] sm:$0xff] %vm1450_vm3, %v1376_v44 }
 0x353   : > { %1473 = vst.msk [vmem:[#allocation2 + $0xb0] sm:$0xff] %vm1450_vm3, %v1408_v33 }
 0x355   : > { %v1377_v45 = vpop.trf.xlu1  ;;  %v1550_v55 = vld [vmem:[#allocation2 + $0x21] ss:$2 sm:$0xff]  ;;  %v1496_v43 = vld [vmem:[#allocation2 + $0x20] ss:$2 sm:$0xff] }
 0x356   : > { %v1409_v51 = vpop.trf.xlu0  ;;  %1458 = vst.msk [vmem:[#allocation2 + $0x38] sm:$0xff] %vm1450_vm3, %v1377_v45  ;;  %v1566_v28 = vld [vmem:[#allocation2 + $0xa1] ss:$2 sm:$0xff]  ;;  %v1512_v29 = vld [vmem:[#allocation2 + $0xa0] ss:$2 sm:$0xff] }
 0x357   : > { %1474 = vst.msk [vmem:[#allocation2 + $0xb8] sm:$0xff] %vm1450_vm3, %v1409_v51 }
 0x359   : > { %v1378_v42 = vpop.trf.xlu1 }
 0x35a   : > { %v1410_v27 = vpop.trf.xlu0  ;;  %1459 = vst.msk [vmem:[#allocation2 + $0x40] sm:$0xff] %vm1450_vm3, %v1378_v42 }
 0x35b   : > { %1475 = vst.msk [vmem:[#allocation2 + $0xc0] sm:$0xff] %vm1450_vm3, %v1410_v27 }
 0x35d   : > { %v1379_v52 = vpop.trf.xlu1  ;;  %v1552_v30 = vld [vmem:[#allocation2 + $0x31] ss:$2 sm:$0xff]  ;;  %v1498_v56 = vld [vmem:[#allocation2 + $0x30] ss:$2 sm:$0xff] }
 0x35e   : > { %v1411_v59 = vpop.trf.xlu0  ;;  %1460 = vst.msk [vmem:[#allocation2 + $0x48] sm:$0xff] %vm1450_vm3, %v1379_v52  ;;  %v1591_v60 = vpack.c.bf16 %v1552_v30, %v1550_v55  ;;  %v1536_v31 = vpack.c.bf16 %v1498_v56, %v1496_v43  ;;  %v1568_v25 = vld [vmem:[#allocation2 + $0xb1] ss:$2 sm:$0xff]  ;;  %v1514_v10 = vld [vmem:[#allocation2 + $0xb0] ss:$2 sm:$0xff] }
 0x35f   : > { %1476 = vst.msk [vmem:[#allocation2 + $0xc8] sm:$0xff] %vm1450_vm3, %v1411_v59  ;;  %v1595_v38 = vpack.c.bf16 %v1568_v25, %v1566_v28  ;;  %v1540_v40 = vpack.c.bf16 %v1514_v10, %v1512_v29  ;;  %v7113_v10 = vmov 0.0   ;;  %v6803_v28 = vld [vmem:[%s7165_s25 + $0x10] sm:$0xff]   ;;  %v6805_v29 = vld [vmem:[%s7165_s25] sm:$0xff]  }
 0x360   : > { %6254 = vmatmul.mubr.msk.bf16.vlgmr.msra.gmra.mxu1 %vm1450_vm3, %v1591_v60  ;;  %6278 = vmatmul.mubr.msk.bf16.vlgmr.msra.gmra.mxu0 %vm1450_vm3, %v1536_v31 }
 0x361   : > { %v1380_v39 = vpop.trf.xlu1  ;;  %6298 = vmatpush3.bf16.msra.mxu1 %v6800_v22  ;;  %v1508_v22 = vld [vmem:[#allocation2 + $0x80] ss:$2 sm:$0xff]  ;;  %6321 = vmatprep.subr.bf16.mxu0 %v7113_v10 }
 0x362   : > { %v1412_v62 = vpop.trf.xlu0  ;;  %1461 = vst.msk [vmem:[#allocation2 + $0x50] sm:$0xff] %vm1450_vm3, %v1380_v39  ;;  %6299 = vmatprep.subr.bf16.mxu1 %v6801_v61  ;;  %v1539_v23 = vpack.c.bf16 %v1510_v16, %v1508_v22  ;;  %v1913_v39 = vld [vmem:[#allocation2 + $0x12] ss:$2 sm:$0xff]  ;;  %v1931_v16 = vld [vmem:[#allocation2 + $0xa2] ss:$2 sm:$0xff] }
 0x363   : > { %1477 = vst.msk [vmem:[#allocation2 + $0xd0] sm:$0xff] %vm1450_vm3, %v1412_v62 }
 0x365   : > { %v1381_v12 = vpop.trf.xlu1  ;;  %6300 = vmatpush3.bf16.msra.mxu1 %v6801_v61  ;;  %v1554_v0 = vld [vmem:[#allocation2 + $0x41] ss:$2 sm:$0xff]  ;;  %v1500_v3 = vld [vmem:[#allocation2 + $0x40] ss:$2 sm:$0xff] }
 0x366   : > { %v1413_v1 = vpop.trf.xlu0  ;;  %1462 = vst.msk [vmem:[#allocation2 + $0x58] sm:$0xff] %vm1450_vm3, %v1381_v12  ;;  %v1570_v41 = vld [vmem:[#allocation2 + $0xc1] ss:$2 sm:$0xff]  ;;  %v1516_v46 = vld [vmem:[#allocation2 + $0xc0] ss:$2 sm:$0xff]  ;;  %6345 = vmatprep.subr.bf16.mxu1 %v7113_v10 }
 0x367   : > { %1478 = vst.msk [vmem:[#allocation2 + $0xd8] sm:$0xff] %vm1450_vm3, %v1413_v1 }
 0x369   : > { %v1382_v35 = vpop.trf.xlu1 }
 0x36a   : > { %v1414_v63 = vpop.trf.xlu0  ;;  %1463 = vst.msk [vmem:[#allocation2 + $0x60] sm:$0xff] %vm1450_vm3, %v1382_v35 }
 0x36b   : > { %1479 = vst.msk [vmem:[#allocation2 + $0xe0] sm:$0xff] %vm1450_vm3, %v1414_v63  ;;  %v1911_v63 = vld [vmem:[#allocation2 + $0x2] ss:$2 sm:$0xff] }
 0x36d   : > { %v1383_v2 = vpop.trf.xlu1  ;;  %v1556_v53 = vld [vmem:[#allocation2 + $0x51] ss:$2 sm:$0xff]  ;;  %v1502_v5 = vld [vmem:[#allocation2 + $0x50] ss:$2 sm:$0xff] }
 0x36e   : > { %v1415_v6 = vpop.trf.xlu0  ;;  %1464 = vst.msk [vmem:[#allocation2 + $0x68] sm:$0xff] %vm1450_vm3, %v1383_v2  ;;  %v1592_v34 = vpack.c.bf16 %v1556_v53, %v1554_v0  ;;  %v1537_v7 = vpack.c.bf16 %v1502_v5, %v1500_v3  ;;  %v1572_v11 = vld [vmem:[#allocation2 + $0xd1] ss:$2 sm:$0xff]  ;;  %v1518_v26 = vld [vmem:[#allocation2 + $0xd0] ss:$2 sm:$0xff]  ;;  %v1955_v0 = vpack.c.bf16 %v1913_v39, %v1911_v63 }
 0x36f   : > { %1480 = vst.msk [vmem:[#allocation2 + $0xe8] sm:$0xff] %vm1450_vm3, %v1415_v6  ;;  %v1596_v47 = vpack.c.bf16 %v1572_v11, %v1570_v41  ;;  %v1541_v49 = vpack.c.bf16 %v1518_v26, %v1516_v46  ;;  %v1917_v2 = vld [vmem:[#allocation2 + $0x32] ss:$2 sm:$0xff]  ;;  %v1915_v3 = vld [vmem:[#allocation2 + $0x22] ss:$2 sm:$0xff] }
 0x370   : > { %6257 = vmatprep.mubr.msk.bf16.mxu1 %vm1450_vm3, %v1592_v34  ;;  %6281 = vmatprep.mubr.msk.bf16.mxu0 %vm1450_vm3, %v1537_v7  ;;  %v1956_v5 = vpack.c.bf16 %v1917_v2, %v1915_v3  ;;  %v1919_v6 = vld [vmem:[#allocation2 + $0x42] ss:$2 sm:$0xff]  ;;  %v6802_v11 = vld [vmem:[%s7165_s25 + $0x18] sm:$0xff]  }
 0x371   : > { %v1384_v8 = vpop.trf.xlu1  ;;  %v1921_v53 = vld [vmem:[#allocation2 + $0x52] ss:$2 sm:$0xff]  ;;  %6322 = vmatpush3.bf16.msra.mxu0 %v6802_v11  ;;  %v6804_v26 = vld [vmem:[%s7165_s25 + $0x8] sm:$0xff]  }
 0x372   : > { %v1416_v9 = vpop.trf.xlu0  ;;  %1465 = vst.msk [vmem:[#allocation2 + $0x70] sm:$0xff] %vm1450_vm3, %v1384_v8  ;;  %v1957_v34 = vpack.c.bf16 %v1921_v53, %v1919_v6  ;;  %v1929_v8 = vld [vmem:[#allocation2 + $0x92] ss:$2 sm:$0xff]  ;;  %6323 = vmatprep.subr.bf16.mxu0 %v7113_v10 }
 0x373   : > { %1481 = vst.msk [vmem:[#allocation2 + $0xf0] sm:$0xff] %vm1450_vm3, %v1416_v9  ;;  %v1937_v57 = vld [vmem:[#allocation2 + $0xd2] ss:$2 sm:$0xff] }
 0x375   : > { %v1385_v48 = vpop.trf.xlu1  ;;  %v1558_v58 = vld [vmem:[#allocation2 + $0x61] ss:$2 sm:$0xff]  ;;  %v1504_v4 = vld [vmem:[#allocation2 + $0x60] ss:$2 sm:$0xff]  ;;  %6324 = vmatpush3.bf16.msra.mxu0 %v6803_v28 }
 0x376   : > { %v1417_v13 = vpop.trf.xlu0  ;;  %1466 = vst.msk [vmem:[#allocation2 + $0x78] sm:$0xff] %vm1450_vm3, %v1385_v48  ;;  %v1574_v44 = vld [vmem:[#allocation2 + $0xe1] ss:$2 sm:$0xff]  ;;  %v1520_v33 = vld [vmem:[#allocation2 + $0xe0] ss:$2 sm:$0xff]  ;;  %6369 = vmatprep.subr.bf16.mxu0 %v7113_v10 }
 0x377   : > { %1482 = vst.msk [vmem:[#allocation2 + $0xf8] sm:$0xff] %vm1450_vm3, %v1417_v13  ;;  %v1927_v13 = vld [vmem:[#allocation2 + $0x82] ss:$2 sm:$0xff] }
 0x379   : > { %v1923_v9 = vld [vmem:[#allocation2 + $0x62] ss:$2 sm:$0xff] }
 0x37a   : > { %v1434_v14 = vpop.trf.xlu0 }
 0x37b   : > { %1483 = vst.msk [vmem:[#allocation2 + $0x100] sm:$0xff] %vm1450_vm3, %v1434_v14  ;;  %v1959_v14 = vpack.c.bf16 %v1929_v8, %v1927_v13 }
 0x37d   : > { %v1560_v17 = vld [vmem:[#allocation2 + $0x71] ss:$2 sm:$0xff]  ;;  %v1506_v18 = vld [vmem:[#allocation2 + $0x70] ss:$2 sm:$0xff] }
 0x37e   : > { %v1435_v54 = vpop.trf.xlu0  ;;  %v1593_v19 = vpack.c.bf16 %v1560_v17, %v1558_v58  ;;  %v1538_v20 = vpack.c.bf16 %v1506_v18, %v1504_v4  ;;  %v1576_v36 = vld [vmem:[#allocation2 + $0xf1] ss:$2 sm:$0xff]  ;;  %v1522_v32 = vld [vmem:[#allocation2 + $0xf0] ss:$2 sm:$0xff] }
 0x37f   : > { %1484 = vst.msk [vmem:[#allocation2 + $0x108] sm:$0xff] %vm1450_vm3, %v1435_v54  ;;  %v1597_v42 = vpack.c.bf16 %v1576_v36, %v1574_v44  ;;  %v1542_v27 = vpack.c.bf16 %v1522_v32, %v1520_v33  ;;  %v1925_v7 = vld [vmem:[#allocation2 + $0x72] ss:$2 sm:$0xff]  ;;  %v1935_v4 = vld [vmem:[#allocation2 + $0xc2] ss:$2 sm:$0xff] }
 0x380   : > { %6258 = vmatmul.mubr.msk.bf16.gmra.mxu1 %vm1450_vm3, %v1593_v19  ;;  %6282 = vmatmul.mubr.msk.bf16.gmra.mxu0 %vm1450_vm3, %v1538_v20  ;;  %v1958_v48 = vpack.c.bf16 %v1925_v7, %v1923_v9  ;;  %v1933_v58 = vld [vmem:[#allocation2 + $0xb2] ss:$2 sm:$0xff]  ;;  %v1961_v18 = vpack.c.bf16 %v1937_v57, %v1935_v4  ;;  %v1939_v20 = vld [vmem:[#allocation2 + $0xe2] ss:$2 sm:$0xff] }
 0x381   : > { %6261 = vmatprep.mubr.msk.bf16.mxu1 %vm1450_vm3, %v1594_v15  ;;  %6285 = vmatprep.mubr.msk.bf16.mxu0 %vm1450_vm3, %v1539_v23  ;;  %v1960_v17 = vpack.c.bf16 %v1933_v58, %v1931_v16 }
 0x382   : > { %v1436_v24 = vpop.trf.xlu0  ;;  %v1941_v54 = vld [vmem:[#allocation2 + $0xf2] ss:$2 sm:$0xff] }
 0x383   : > { %1485 = vst.msk [vmem:[#allocation2 + $0x110] sm:$0xff] %vm1450_vm3, %v1436_v24  ;;  %v1962_v21 = vpack.c.bf16 %v1941_v54, %v1939_v20 }
 0x386   : > { %v1437_v37 = vpop.trf.xlu0  ;;  %v1578_v45 = vld [vmem:[#allocation2 + $0x101] ss:$2 sm:$0xff]  ;;  %v1524_v52 = vld [vmem:[#allocation2 + $0x100] ss:$2 sm:$0xff] }
 0x387   : > { %1486 = vst.msk [vmem:[#allocation2 + $0x118] sm:$0xff] %vm1450_vm3, %v1437_v37 }
 0x388   : > { %6262 = vmatmul.mubr.msk.bf16.gmra.mxu1 %vm1450_vm3, %v1595_v38  ;;  %6286 = vmatmul.mubr.msk.bf16.gmra.mxu0 %vm1450_vm3, %v1540_v40 }
 0x389   : > { %6265 = vmatprep.mubr.msk.bf16.mxu1 %vm1450_vm3, %v1596_v47  ;;  %6289 = vmatprep.mubr.msk.bf16.mxu0 %vm1450_vm3, %v1541_v49 }
 0x38a   : > { %v1438_v50 = vpop.trf.xlu0  ;;  %v1943_v22 = vld [vmem:[#allocation2 + $0x102] ss:$2 sm:$0xff] }
 0x38b   : > { %1487 = vst.msk [vmem:[#allocation2 + $0x120] sm:$0xff] %vm1450_vm3, %v1438_v50 }
 0x38e   : > { %v1439_v51 = vpop.trf.xlu0  ;;  %v1580_v55 = vld [vmem:[#allocation2 + $0x111] ss:$2 sm:$0xff]  ;;  %v1526_v30 = vld [vmem:[#allocation2 + $0x110] ss:$2 sm:$0xff] }
 0x38f   : > { %1488 = vst.msk [vmem:[#allocation2 + $0x128] sm:$0xff] %vm1450_vm3, %v1439_v51  ;;  %v1598_v43 = vpack.c.bf16 %v1580_v55, %v1578_v45  ;;  %v1543_v56 = vpack.c.bf16 %v1526_v30, %v1524_v52 }
 0x390   : > { %6266 = vmatmul.mubr.msk.bf16.gmra.mxu1 %vm1450_vm3, %v1597_v42  ;;  %6290 = vmatmul.mubr.msk.bf16.gmra.mxu0 %vm1450_vm3, %v1542_v27 }
 0x391   : > { %6269 = vmatprep.mubr.msk.bf16.mxu1 %vm1450_vm3, %v1598_v43  ;;  %6293 = vmatprep.mubr.msk.bf16.mxu0 %vm1450_vm3, %v1543_v56 }
 0x392   : > { %v1440_v59 = vpop.trf.xlu0  ;;  %v1945_v19 = vld [vmem:[#allocation2 + $0x112] ss:$2 sm:$0xff] }
 0x393   : > { %1489 = vst.msk [vmem:[#allocation2 + $0x130] sm:$0xff] %vm1450_vm3, %v1440_v59  ;;  %v1963_v15 = vpack.c.bf16 %v1945_v19, %v1943_v22 }
 0x396   : > { %v1441_v60 = vpop.trf.xlu0  ;;  %v1582_v31 = vld [vmem:[#allocation2 + $0x121] ss:$2 sm:$0xff]  ;;  %v1528_v61 = vld [vmem:[#allocation2 + $0x120] ss:$2 sm:$0xff] }
 0x397   : > { %1491 = vst.msk [vmem:[#allocation2 + $0x138] sm:$0x7f] %vm1490_vm4, %v1441_v60 }
 0x39a   : > { %v1947_v24 = vld [vmem:[#allocation2 + $0x122] ss:$2 sm:$0xff] }
 0x39e   : > { %v1584_v62 = vld [vmem:[#allocation2 + $0x131] ss:$2 sm:$0x7f]  ;;  %v1530_v12 = vld [vmem:[#allocation2 + $0x130] ss:$2 sm:$0x7f] }
 0x39f   : > { %v1599_v1 = vpack.c.bf16 %v1584_v62, %v1582_v31  ;;  %v1544_v35 = vpack.c.bf16 %v1530_v12, %v1528_v61  ;;  %v1949_v23 = vld [vmem:[#allocation2 + $0x132] ss:$2 sm:$0x7f] }
 0x3a0   : > { %v1964_v25 = vpack.c.bf16 %v1949_v23, %v1947_v24 }
 0x3a1   : > { %6270 = vmatmul.mubr.msk.bf16.gmra.mxu1 %vm1450_vm3, %v1599_v1  ;;  %6294 = vmatmul.mubr.msk.bf16.gmra.mxu0 %vm1450_vm3, %v1544_v35 }
 0x3a2   : > { %6301 = vmatprep.mubr.msk.bf16.mxu1 %vm1450_vm3, %v1955_v0  ;;  %6325 = vmatprep.mubr.msk.bf16.mxu0 %vm7114_vm5, %v7113_v10 }
 0x3a9   : > { %6302 = vmatmul.mubr.msk.bf16.vlgmr.msra.gmra.mxu1 %vm1450_vm3, %v1956_v5 }
 0x3aa   : > { %6305 = vmatprep.mubr.msk.bf16.mxu1 %vm1450_vm3, %v1957_v34  ;;  %6346 = vmatpush3.bf16.msra.mxu1 %v6804_v26 }
 0x3ab   : > { %6347 = vmatprep.subr.bf16.mxu1 %v7113_v10 }
 0x3ae   : > { %6348 = vmatpush3.bf16.msra.mxu1 %v6805_v29 }
 0x3af   : > { %6393 = vmatprep.subr.bf16.mxu1 %v7113_v10 }
 0x3b1   : > { %6306 = vmatmul.mubr.msk.bf16.gmra.mxu1 %vm1450_vm3, %v1958_v48 }
 0x3b2   : > { %6309 = vmatprep.mubr.msk.bf16.mxu1 %vm1450_vm3, %v1959_v14 }
 0x3b9   : > { %6310 = vmatmul.mubr.msk.bf16.gmra.mxu1 %vm1450_vm3, %v1960_v17 }
 0x3ba   : > { %6313 = vmatprep.mubr.msk.bf16.mxu1 %vm1450_vm3, %v1961_v18 }
 0x3c1   : > { %6314 = vmatmul.mubr.msk.bf16.gmra.mxu1 %vm1450_vm3, %v1962_v21 }
 0x3c2   : > { %6317 = vmatprep.mubr.msk.bf16.mxu1 %vm1450_vm3, %v1963_v15 }
 0x3c9   : > { %6318 = vmatmul.mubr.msk.bf16.gmra.mxu1 %vm1450_vm3, %v1964_v25 }
 0x3ca   : > { %6349 = vmatprep.mubr.msk.bf16.mxu1 %vm7114_vm5, %v7113_v10 }
 0x420   : > { %v6255_v37 = vpop.f32.mrf.mxu1  ;;  %v6279_v40 = vpop.f32.mrf.mxu0 }
 0x421   : > { %v1840_v53 = vadd.f32 %v6279_v40, %v6255_v37 }
 0x422   : > { %v1676_v38 = vpop.f32.mrf.mxu1  ;;  %v1831_v46 = vpop.f32.mrf.mxu0 }
 0x423   : > { %v1832_v5 = vadd.f32 %v1831_v46, %v1676_v38 }
 0x424   : > { %v6256_v41 = vpop.f32.mrf.mxu1  ;;  %v6280_v49 = vpop.f32.mrf.mxu0 }
 0x425   : > { %v1843_v8 = vadd.f32 %v6280_v49, %v6256_v41 }
 0x426   : > { %v1679_v47 = vpop.f32.mrf.mxu1  ;;  %v1834_v32 = vpop.f32.mrf.mxu0 }
 0x427   : > { %v1835_v14 = vadd.f32 %v1834_v32, %v1679_v47 }
 0x440   : > { %v6259_v50 = vpop.f32.mrf.mxu1  ;;  %v6283_v33 = vpop.f32.mrf.mxu0 }
 0x441   : > { %v1856_v21 = vadd.f32 %v6283_v33, %v6259_v50 }
 0x442   : > { %v1692_v36 = vpop.f32.mrf.mxu1  ;;  %v1847_v42 = vpop.f32.mrf.mxu0 }
 0x443   : > { %v1848_v22 = vadd.f32 %v1847_v42, %v1692_v36 }
 0x444   : > { %v6260_v44 = vpop.f32.mrf.mxu1  ;;  %v6284_v52 = vpop.f32.mrf.mxu0 }
 0x445   : > { %v1859_v15 = vadd.f32 %v6284_v52, %v6260_v44 }
 0x446   : > { %v1695_v45 = vpop.f32.mrf.mxu1  ;;  %v1850_v43 = vpop.f32.mrf.mxu0 }
 0x447   : > { %v1851_v23 = vadd.f32 %v1850_v43, %v1695_v45 }
 0x448   : > { %v6263_v51 = vpop.f32.mrf.mxu1  ;;  %v6287_v59 = vpop.f32.mrf.mxu0 }
 0x449   : > { %v1872_v37 = vadd.f32 %v6287_v59, %v6263_v51 }
 0x44a   : > { %v1708_v27 = vpop.f32.mrf.mxu1  ;;  %v1863_v31 = vpop.f32.mrf.mxu0 }
 0x44b   : > { %v1864_v38 = vadd.f32 %v1863_v31, %v1708_v27 }
 0x44c   : > { %v6264_v55 = vpop.f32.mrf.mxu1  ;;  %v6288_v39 = vpop.f32.mrf.mxu0 }
 0x44d   : > { %v1875_v40 = vadd.f32 %v6288_v39, %v6264_v55 }
 0x44e   : > { %v1711_v30 = vpop.f32.mrf.mxu1  ;;  %v1866_v1 = vpop.f32.mrf.mxu0 }
 0x44f   : > { %v1867_v44 = vadd.f32 %v1866_v1, %v1711_v30 }
 0x450   : > { %v6267_v56 = vpop.f32.mrf.mxu1  ;;  %v6291_v0 = vpop.f32.mrf.mxu0 }
 0x451   : > { %v7612_v33 = vadd.f32 %v6291_v0, %v6267_v56 }
 0x452   : > { %v1724_v60 = vpop.f32.mrf.mxu1  ;;  %v1879_v6 = vpop.f32.mrf.mxu0 }
 0x453   : > { %v7619_v43 = vadd.f32 %v1879_v6, %v1724_v60 }
 0x454   : > { %v7576_v61 = vpop.f32.mrf.mxu1  ;;  %v6292_v58 = vpop.f32.mrf.mxu0 }
 0x456   : > { %v7578_v62 = vpop.f32.mrf.mxu1  ;;  %v1882_v25 = vpop.f32.mrf.mxu0 }
 0x461   : > { %v7580_v12 = vpop.f32.mrf.mxu1  ;;  %v6295_v47 = vpop.f32.mrf.mxu0 }
 0x463   : > { %v7582_v35 = vpop.f32.mrf.mxu1  ;;  %v1895_v39 = vpop.f32.mrf.mxu0 }
 0x465   : > { %v7584_v63 = vpop.f32.mrf.mxu1 }
 0x467   : > { %v7586_v2 = vpop.f32.mrf.mxu1 }
 0x469   : > { %v6303_v3 = vpop.f32.mrf.mxu1 }
 0x46a   : > { %v7588_v34 = vadd.f32 %v6303_v3, %v1840_v53  ;;  %v7630_v3 = vadd.f32 %v6292_v58, %v7576_v61 }
 0x46b   : > { %v2041_v7 = vpop.f32.mrf.mxu1 }
 0x46c   : > { %v2142_v9 = vmul.f32 %v7588_v34, %v7588_v34  ;;  %v7592_v48 = vadd.f32 %v2041_v7, %v1832_v5 }
 0x46d   : > { %v6304_v13 = vpop.f32.mrf.mxu1 }
 0x46e   : > { %v2162_v57 = vmul.f32 %v2142_v9, %v7588_v34  ;;  %v2140_v16 = vmul.f32 %v7592_v48, %v7592_v48  ;;  %v7597_v17 = vadd.f32 %v6304_v13, %v1843_v8 }
 0x46f   : > { %v2044_v4 = vpop.f32.mrf.mxu1 }
 0x470   : > { %v2182_v18 = vmul.f32 0.044715, %v2162_v57  ;;  %v2160_v54 = vmul.f32 %v2140_v16, %v7592_v48  ;;  %v2143_v19 = vmul.f32 %v7597_v17, %v7597_v17  ;;  %v7602_v20 = vadd.f32 %v2044_v4, %v1835_v14  ;;  %v6296_v4 = vpop.f32.mrf.mxu0 }
 0x471   : > { %v6307_v24 = vpop.f32.mrf.mxu1  ;;  %v7640_v14 = vadd.f32 %v1882_v25, %v7578_v62 }
 0x472   : > { %v2202_v11 = vadd.f32 %v2182_v18, %v7588_v34  ;;  %v2180_v26 = vmul.f32 0.044715, %v2160_v54  ;;  %v2163_v28 = vmul.f32 %v2143_v19, %v7597_v17  ;;  %v2141_v29 = vmul.f32 %v7602_v20, %v7602_v20 }
 0x473   : > { %v7608_v41 = vadd.f32 %v6307_v24, %v1856_v21  ;;  %v2057_v46 = vpop.f32.mrf.mxu1  ;;  %v7650_v21 = vadd.f32 %v6295_v47, %v7580_v12 }
 0x474   : > { %v2222_v49 = vmul.f32 0.7978846, %v2202_v11  ;;  %v2200_v50 = vadd.f32 %v2180_v26, %v7592_v48  ;;  %v2183_v36 = vmul.f32 0.044715, %v2163_v28  ;;  %v2161_v32 = vmul.f32 %v2141_v29, %v7602_v20 }
 0x475   : > { %v2146_v45 = vmul.f32 %v7608_v41, %v7608_v41  ;;  %v7616_v42 = vadd.f32 %v2057_v46, %v1848_v22  ;;  %v6308_v51 = vpop.f32.mrf.mxu1  ;;  %v7659_v28 = vadd.f32 %v1895_v39, %v7582_v35 }
 0x476   : > { %6888 = vtanh.f32 %v2222_v49  ;;  %v2220_v27 = vmul.f32 0.7978846, %v2200_v50  ;;  %v2203_v55 = vadd.f32 %v2183_v36, %v7597_v17  ;;  %v2181_v52 = vmul.f32 0.044715, %v2161_v32 }
 0x477   : > { %v2166_v59 = vmul.f32 %v2146_v45, %v7608_v41  ;;  %v2144_v30 = vmul.f32 %v7616_v42, %v7616_v42  ;;  %v7624_v56 = vadd.f32 %v6308_v51, %v1859_v15  ;;  %v2060_v31 = vpop.f32.mrf.mxu1 }
 0x478   : > { %6890 = vtanh.f32 %v2220_v27  ;;  %v2223_v1 = vmul.f32 0.7978846, %v2203_v55  ;;  %v2201_v0 = vadd.f32 %v2181_v52, %v7602_v20  ;;  %v7627_v53 = vadd.f32 %v2060_v31, %v1851_v23 }
 0x479   : > { %v2186_v60 = vmul.f32 0.044715, %v2166_v59  ;;  %v2164_v5 = vmul.f32 %v2144_v30, %v7616_v42  ;;  %v2147_v6 = vmul.f32 %v7624_v56, %v7624_v56  ;;  %v6311_v7 = vpop.f32.mrf.mxu1 }
 0x47a   : > { %6892 = vtanh.f32 %v2223_v1  ;;  %v2221_v8 = vmul.f32 0.7978846, %v2201_v0  ;;  %v2145_v9 = vmul.f32 %v7627_v53, %v7627_v53  ;;  %v7637_v13 = vadd.f32 %v6311_v7, %v1872_v37 }
 0x47b   : > { %v2206_v61 = vadd.f32 %v2186_v60, %v7608_v41  ;;  %v2184_v58 = vmul.f32 0.044715, %v2164_v5  ;;  %v2167_v57 = vmul.f32 %v2147_v6, %v7624_v56  ;;  %v2073_v16 = vpop.f32.mrf.mxu1 }
 0x47c   : > { %6894 = vtanh.f32 %v2221_v8  ;;  %v2165_v18 = vmul.f32 %v2145_v9, %v7627_v53  ;;  %v2150_v54 = vmul.f32 %v7637_v13, %v7637_v13  ;;  %v7647_v19 = vadd.f32 %v2073_v16, %v1864_v38  ;;  %v1898_v38 = vpop.f32.mrf.mxu0 }
 0x47d   : > { %v2226_v62 = vmul.f32 0.7978846, %v2206_v61  ;;  %v2204_v22 = vadd.f32 %v2184_v58, %v7616_v42  ;;  %v2187_v15 = vmul.f32 0.044715, %v2167_v57  ;;  %v6312_v23 = vpop.f32.mrf.mxu1  ;;  %v7674_v59 = vadd.f32 %v1898_v38, %v7586_v2 }
 0x47e   : > { %v2185_v24 = vmul.f32 0.044715, %v2165_v18  ;;  %v2170_v25 = vmul.f32 %v2150_v54, %v7637_v13  ;;  %v2148_v11 = vmul.f32 %v7647_v19, %v7647_v19  ;;  %v7656_v26 = vadd.f32 %v6312_v23, %v1875_v40 }
 0x47f   : > { %6896 = vtanh.f32 %v2226_v62  ;;  %v2224_v29 = vmul.f32 0.7978846, %v2204_v22  ;;  %v2207_v12 = vadd.f32 %v2187_v15, %v7624_v56  ;;  %v2076_v37 = vpop.f32.mrf.mxu1  ;;  %v7667_v40 = vadd.f32 %v6296_v4, %v7584_v63 }
 0x480   : > { %v2205_v46 = vadd.f32 %v2185_v24, %v7627_v53  ;;  %v2190_v47 = vmul.f32 0.044715, %v2170_v25  ;;  %v2168_v49 = vmul.f32 %v2148_v11, %v7647_v19  ;;  %v2151_v50 = vmul.f32 %v7656_v26, %v7656_v26 }
 0x481   : > { %6898 = vtanh.f32 %v2224_v29  ;;  %v2227_v35 = vmul.f32 0.7978846, %v2207_v12  ;;  %v7669_v36 = vadd.f32 %v2076_v37, %v1867_v44  ;;  %v6315_v32 = vpop.f32.mrf.mxu1 }
 0x482   : > { %v2225_v45 = vmul.f32 0.7978846, %v2205_v46  ;;  %v2210_v51 = vadd.f32 %v2190_v47, %v7637_v13  ;;  %v2188_v27 = vmul.f32 0.044715, %v2168_v49  ;;  %v2171_v55 = vmul.f32 %v2151_v50, %v7656_v26 }
 0x483   : > { %v6889_v52 = vpop.eup %6888  ;;  %6900 = vtanh.f32 %v2227_v35  ;;  %v2149_v63 = vmul.f32 %v7669_v36, %v7669_v36  ;;  %v7679_v30 = vadd.f32 %v6315_v32, %v7612_v33  ;;  %v2089_v44 = vpop.f32.mrf.mxu1 }
 0x484   : > { %v2262_v31 = vadd.f32 1.0, %v6889_v52  ;;  %6902 = vtanh.f32 %v2225_v45  ;;  %v2230_v39 = vmul.f32 0.7978846, %v2210_v51  ;;  %v2208_v1 = vadd.f32 %v2188_v27, %v7647_v19 }
 0x485   : > { %v6891_v0 = vpop.eup %6890  ;;  %v2191_v60 = vmul.f32 0.044715, %v2171_v55  ;;  %v2169_v5 = vmul.f32 %v2149_v63, %v7669_v36  ;;  %v2154_v2 = vmul.f32 %v7679_v30, %v7679_v30  ;;  %v7686_v6 = vadd.f32 %v2089_v44, %v7619_v43  ;;  %v6316_v7 = vpop.f32.mrf.mxu1 }
 0x486   : > { %v2282_v8 = vmul.f32 0.5, %v2262_v31  ;;  %v2260_v33 = vadd.f32 1.0, %v6891_v0  ;;  %6904 = vtanh.f32 %v2230_v39  ;;  %v2228_v9 = vmul.f32 0.7978846, %v2208_v1 }
 0x487   : > { %v6893_v61 = vpop.eup %6892  ;;  %v2211_v58 = vadd.f32 %v2191_v60, %v7656_v26  ;;  %v2189_v57 = vmul.f32 0.044715, %v2169_v5  ;;  %v2174_v16 = vmul.f32 %v2154_v2, %v7679_v30  ;;  %v2152_v4 = vmul.f32 %v7686_v6, %v7686_v6  ;;  %v2092_v18 = vpop.f32.mrf.mxu1 }
 0x488   : > { %v2302_v54 = vmul.f32 %v2282_v8, %v7588_v34  ;;  %v2280_v62 = vmul.f32 0.5, %v2260_v33  ;;  %v2263_v43 = vadd.f32 1.0, %v6893_v61  ;;  %6906 = vtanh.f32 %v2228_v9 }
 0x489   : > { %v6895_v22 = vpop.eup %6894  ;;  %v2231_v15 = vmul.f32 0.7978846, %v2211_v58  ;;  %v2209_v23 = vadd.f32 %v2189_v57, %v7669_v36  ;;  %v2194_v24 = vmul.f32 0.044715, %v2174_v16  ;;  %v2172_v25 = vmul.f32 %v2152_v4, %v7686_v6  ;;  %v6319_v11 = vpop.f32.mrf.mxu1 }
 0x48a   : > { %2322 = vst.msk [vmem:[#allocation3 + $0x10] sm:$0xff] %vm1450_vm3, %v2302_v54  ;;  %v2300_v29 = vmul.f32 %v2280_v62, %v7592_v48  ;;  %v2283_v12 = vmul.f32 0.5, %v2263_v43  ;;  %v2261_v37 = vadd.f32 1.0, %v6895_v22  ;;  %v7698_v38 = vadd.f32 %v6316_v7, %v7630_v3 }
 0x48b   : > { %6908 = vtanh.f32 %v2231_v15  ;;  %v2229_v34 = vmul.f32 0.7978846, %v2209_v23  ;;  %v2214_v46 = vadd.f32 %v2194_v24, %v7679_v30  ;;  %v2192_v47 = vmul.f32 0.044715, %v2172_v25  ;;  %v2105_v45 = vpop.f32.mrf.mxu1 }
 0x48c   : > { %v6897_v49 = vpop.eup %6896  ;;  %2320 = vst.msk [vmem:[#allocation3] sm:$0xff] %vm1450_vm3, %v2300_v29  ;;  %v2303_v50 = vmul.f32 %v2283_v12, %v7597_v17  ;;  %v2281_v35 = vmul.f32 0.5, %v2261_v37  ;;  %v2155_v32 = vmul.f32 %v7698_v38, %v7698_v38  ;;  %v7706_v48 = vadd.f32 %v2092_v18, %v7640_v14 }
 0x48d   : > { %v2266_v3 = vadd.f32 1.0, %v6897_v49  ;;  %6910 = vtanh.f32 %v2229_v34  ;;  %v2234_v51 = vmul.f32 0.7978846, %v2214_v46  ;;  %v2212_v27 = vadd.f32 %v2192_v47, %v7686_v6  ;;  %v6320_v2 = vpop.f32.mrf.mxu1  ;;  %v6806_v34 = vld [vmem:[%s7165_s25 + $0x28] sm:$0xff]  }
 0x48e   : > { %v6899_v55 = vpop.eup %6898  ;;  %2323 = vst.msk [vmem:[#allocation3 + $0x18] sm:$0xff] %vm1450_vm3, %v2303_v50  ;;  %v2301_v52 = vmul.f32 %v2281_v35, %v7602_v20  ;;  %v2175_v17 = vmul.f32 %v2155_v32, %v7698_v38  ;;  %v2153_v63 = vmul.f32 %v7706_v48, %v7706_v48  ;;  %v7715_v44 = vadd.f32 %v6319_v11, %v7650_v21 }
 0x48f   : > { %v2286_v14 = vmul.f32 0.5, %v2266_v3  ;;  %v2264_v31 = vadd.f32 1.0, %v6899_v55  ;;  %6912 = vtanh.f32 %v2234_v51  ;;  %v2232_v39 = vmul.f32 0.7978846, %v2212_v27  ;;  %v2108_v11 = vpop.f32.mrf.mxu1 }
 0x490   : > { %v6901_v1 = vpop.eup %6900  ;;  %2321 = vst.msk [vmem:[#allocation3 + $0x8] sm:$0xff] %vm1450_vm3, %v2301_v52  ;;  %v2195_v0 = vmul.f32 0.044715, %v2175_v17  ;;  %v2173_v60 = vmul.f32 %v2153_v63, %v7706_v48  ;;  %v2158_v20 = vmul.f32 %v7715_v44, %v7715_v44  ;;  %v7722_v5 = vadd.f32 %v2105_v45, %v7659_v28 }
 0x491   : > { %v6903_v7 = vpop.eup %6902  ;;  %v2306_v21 = vmul.f32 %v2286_v14, %v7608_v41  ;;  %v2284_v8 = vmul.f32 0.5, %v2264_v31  ;;  %v2267_v33 = vadd.f32 1.0, %v6901_v1  ;;  %6914 = vtanh.f32 %v2232_v39 }
 0x492   : > { %v2265_v9 = vadd.f32 1.0, %v6903_v7  ;;  %v2215_v61 = vadd.f32 %v2195_v0, %v7698_v38  ;;  %v2193_v58 = vmul.f32 0.044715, %v2173_v60  ;;  %v2178_v57 = vmul.f32 %v2158_v20, %v7715_v44  ;;  %v6807_v60 = vld [vmem:[%s7165_s25 + $0x20] sm:$0xff]  }
 0x493   : > { %v6905_v16 = vpop.eup %6904  ;;  %2326 = vst.msk [vmem:[#allocation3 + $0x30] sm:$0xff] %vm1450_vm3, %v2306_v21  ;;  %v2304_v4 = vmul.f32 %v2284_v8, %v7616_v42  ;;  %v2287_v28 = vmul.f32 0.5, %v2267_v33  ;;  %v2156_v18 = vmul.f32 %v7722_v5, %v7722_v5  ;;  %v7732_v41 = vadd.f32 %v6320_v2, %v7667_v40 }
 0x494   : > { %v2285_v54 = vmul.f32 0.5, %v2265_v9  ;;  %v2270_v62 = vadd.f32 1.0, %v6905_v16  ;;  %v2235_v43 = vmul.f32 0.7978846, %v2215_v61  ;;  %v2213_v22 = vadd.f32 %v2193_v58, %v7706_v48 }
 0x495   : > { %v6907_v15 = vpop.eup %6906  ;;  %2324 = vst.msk [vmem:[#allocation3 + $0x20] sm:$0xff] %vm1450_vm3, %v2304_v4  ;;  %v2307_v23 = vmul.f32 %v2287_v28, %v7624_v56  ;;  %v2198_v24 = vmul.f32 0.044715, %v2178_v57  ;;  %v2176_v42 = vmul.f32 %v2156_v18, %v7722_v5  ;;  %v2159_v25 = vmul.f32 %v7732_v41, %v7732_v41  ;;  %v2371_v37 = vld [vmem:[#allocation3 + $0x11] ss:$2 sm:$0xff] }
 0x496   : > { %v2305_v40 = vmul.f32 %v2285_v54, %v7627_v53  ;;  %v2290_v29 = vmul.f32 0.5, %v2270_v62  ;;  %v2268_v12 = vadd.f32 1.0, %v6907_v15  ;;  %6916 = vtanh.f32 %v2235_v43  ;;  %v2342_v17 = vld [vmem:[#allocation3 + $0x10] ss:$2 sm:$0xff] }
 0x497   : > { %2327 = vst.msk [vmem:[#allocation3 + $0x38] sm:$0xff] %vm1450_vm3, %v2307_v23  ;;  %v2233_v46 = vmul.f32 0.7978846, %v2213_v22  ;;  %v2218_v47 = vadd.f32 %v2198_v24, %v7715_v44  ;;  %v2196_v56 = vmul.f32 0.044715, %v2176_v42  ;;  %v2179_v49 = vmul.f32 %v2159_v25, %v7732_v41 }
 0x498   : > { %v2369_v50 = vld [vmem:[#allocation3 + $0x1] ss:$2 sm:$0xff]  ;;  %v6909_v35 = vpop.eup %6908  ;;  %2325 = vst.msk [vmem:[#allocation3 + $0x28] sm:$0xff] %vm1450_vm3, %v2305_v40  ;;  %v2310_v32 = vmul.f32 %v2290_v29, %v7637_v13  ;;  %v2288_v53 = vmul.f32 0.5, %v2268_v12  ;;  %v7748_v45 = vadd.f32 %v2108_v11, %v7674_v59  ;;  %v2340_v51 = vld [vmem:[#allocation3] ss:$2 sm:$0xff] }
 0x499   : > { %v2393_v3 = vpack.c.bf16 %v2371_v37, %v2369_v50  ;;  %v2271_v27 = vadd.f32 1.0, %v6909_v35  ;;  %6918 = vtanh.f32 %v2233_v46  ;;  %v2238_v55 = vmul.f32 0.7978846, %v2218_v47 }
 0x49a   : > { %v2216_v52 = vadd.f32 %v2196_v56, %v7722_v5  ;;  %v6911_v63 = vpop.eup %6910  ;;  %2330 = vst.msk [vmem:[#allocation3 + $0x50] sm:$0xff] %vm1450_vm3, %v2310_v32  ;;  %v2308_v14 = vmul.f32 %v2288_v53, %v7647_v19  ;;  %v2199_v31 = vmul.f32 0.044715, %v2179_v49  ;;  %v2157_v13 = vmul.f32 %v7748_v45, %v7748_v45 }
 0x49b   : > { %6326 = vmatmul.mubr.msk.bf16.vlgmr.msra.gmra.mxu0 %vm1450_vm3, %v2393_v3  ;;  %v2363_v59 = vpack.c.bf16 %v2342_v17, %v2340_v51  ;;  %v2291_v39 = vmul.f32 0.5, %v2271_v27  ;;  %v2269_v1 = vadd.f32 1.0, %v6911_v63  ;;  %6920 = vtanh.f32 %v2238_v55 }
 0x49c   : > { %v2236_v0 = vmul.f32 0.7978846, %v2216_v52  ;;  %6370 = vmatpush3.bf16.msra.mxu0 %v6806_v34  ;;  %6329 = vmatprep.mubr.msk.bf16.mxu0 %vm7114_vm5, %v7113_v10  ;;  %v6913_v20 = vpop.eup %6912  ;;  %2328 = vst.msk [vmem:[#allocation3 + $0x40] sm:$0xff] %vm1450_vm3, %v2308_v14  ;;  %v2219_v19 = vadd.f32 %v2199_v31, %v7732_v41  ;;  %v2177_v2 = vmul.f32 %v2157_v13, %v7748_v45 }
 0x49d   : > { %6350 = vmatmul.mubr.msk.bf16.vlgmr.msra.gmra.mxu1 %vm1450_vm3, %v2363_v59  ;;  %6371 = vmatprep.subr.bf16.mxu0 %v7113_v10  ;;  %v2311_v7 = vmul.f32 %v2291_v39, %v7656_v26  ;;  %v2289_v21 = vmul.f32 0.5, %v2269_v1  ;;  %v2274_v8 = vadd.f32 1.0, %v6913_v20 }
 0x49e   : > { %6922 = vtanh.f32 %v2236_v0  ;;  %6353 = vmatprep.mubr.msk.bf16.mxu1 %vm7114_vm5, %v7113_v10  ;;  %v6915_v33 = vpop.eup %6914  ;;  %v2239_v9 = vmul.f32 0.7978846, %v2219_v19  ;;  %v2197_v61 = vmul.f32 0.044715, %v2177_v2  ;;  %v2375_v58 = vld [vmem:[#allocation3 + $0x31] ss:$2 sm:$0xff] }
 0x49f   : > { %2331 = vst.msk [vmem:[#allocation3 + $0x58] sm:$0xff] %vm1450_vm3, %v2311_v7  ;;  %v2309_v57 = vmul.f32 %v2289_v21, %v7669_v36  ;;  %v2294_v16 = vmul.f32 0.5, %v2274_v8  ;;  %v2272_v4 = vadd.f32 1.0, %v6915_v33  ;;  %v2373_v28 = vld [vmem:[#allocation3 + $0x21] ss:$2 sm:$0xff] }
 0x4a0   : > { %v2344_v18 = vld [vmem:[#allocation3 + $0x20] ss:$2 sm:$0xff]  ;;  %6372 = vmatpush3.bf16.msra.mxu0 %v6807_v60  ;;  %6924 = vtanh.f32 %v2239_v9  ;;  %v2217_v26 = vadd.f32 %v2197_v61, %v7748_v45  ;;  %v2394_v54 = vpack.c.bf16 %v2375_v58, %v2373_v28  ;;  %v2346_v62 = vld [vmem:[#allocation3 + $0x30] ss:$2 sm:$0xff] }
 0x4a1   : > { %6409 = vmatprep.subr.bf16.mxu0 %v7113_v10  ;;  %2329 = vst.msk [vmem:[#allocation3 + $0x48] sm:$0xff] %vm1450_vm3, %v2309_v57  ;;  %v2314_v43 = vmul.f32 %v2294_v16, %v7679_v30  ;;  %v2292_v22 = vmul.f32 0.5, %v2272_v4  ;;  %v2364_v15 = vpack.c.bf16 %v2346_v62, %v2344_v18  ;;  %v2599_v7 = vld [vmem:[#allocation3 + $0x2] ss:$2 sm:$0xff]  ;;  %v6808_v62 = vld [vmem:[%s7170_s29 + $0x18] sm:$0xff]  }
 0x4a2   : > { %v2237_v23 = vmul.f32 0.7978846, %v2217_v26  ;;  %v2603_v33 = vld [vmem:[#allocation3 + $0x22] ss:$2 sm:$0xff]  ;;  %6394 = vmatpush3.bf16.msra.mxu1 %v6808_v62 }
 0x4a3   : > { %6330 = vmatmul.mubr.msk.bf16.gmra.mxu0 %vm1450_vm3, %v2394_v54  ;;  %v6917_v36 = vpop.eup %6916  ;;  %2334 = vst.msk [vmem:[#allocation3 + $0x70] sm:$0xff] %vm1450_vm3, %v2314_v43  ;;  %v2312_v24 = vmul.f32 %v2292_v22, %v7686_v6  ;;  %v2605_v8 = vld [vmem:[#allocation3 + $0x32] ss:$2 sm:$0xff]  ;;  %v6810_v43 = vld [vmem:[%s7170_s29 + $0x8] sm:$0xff]   ;;  %6395 = vmatprep.subr.bf16.mxu1 %v7113_v10 }
 0x4a4   : > { %6333 = vmatprep.mubr.msk.bf16.mxu0 %vm7114_vm5, %v7113_v10  ;;  %v2275_v42 = vadd.f32 1.0, %v6917_v36  ;;  %6926 = vtanh.f32 %v2237_v23  ;;  %v2624_v9 = vpack.c.bf16 %v2605_v8, %v2603_v33  ;;  %v6809_v22 = vld [vmem:[%s7170_s29 + $0x10] sm:$0xff]  }
 0x4a5   : > { %6354 = vmatmul.mubr.msk.bf16.gmra.mxu1 %vm1450_vm3, %v2364_v15  ;;  %2332 = vst.msk [vmem:[#allocation3 + $0x60] sm:$0xff] %vm1450_vm3, %v2312_v24  ;;  %v6811_v15 = vld [vmem:[%s7170_s29] sm:$0xff]  }
 0x4a6   : > { %6357 = vmatprep.mubr.msk.bf16.mxu1 %vm7114_vm5, %v7113_v10  ;;  %v6919_v30 = vpop.eup %6918  ;;  %v2295_v25 = vmul.f32 0.5, %v2275_v42  ;;  %v2379_v40 = vld [vmem:[#allocation3 + $0x51] ss:$2 sm:$0xff]  ;;  %v2350_v34 = vld [vmem:[#allocation3 + $0x50] ss:$2 sm:$0xff]  ;;  %6396 = vmatpush3.bf16.msra.mxu1 %v6809_v22 }
 0x4a7   : > { %v2273_v11 = vadd.f32 1.0, %v6919_v30  ;;  %6425 = vmatprep.subr.bf16.mxu1 %v7113_v10 }
 0x4a8   : > { %v6921_v29 = vpop.eup %6920  ;;  %v2315_v12 = vmul.f32 %v2295_v25, %v7698_v38  ;;  %v2377_v6 = vld [vmem:[#allocation3 + $0x41] ss:$2 sm:$0xff]  ;;  %v2348_v37 = vld [vmem:[#allocation3 + $0x40] ss:$2 sm:$0xff] }
 0x4a9   : > { %v2293_v46 = vmul.f32 0.5, %v2273_v11  ;;  %v2278_v47 = vadd.f32 1.0, %v6921_v29  ;;  %v2395_v56 = vpack.c.bf16 %v2379_v40, %v2377_v6  ;;  %v2365_v49 = vpack.c.bf16 %v2350_v34, %v2348_v37  ;;  %v2607_v58 = vld [vmem:[#allocation3 + $0x42] ss:$2 sm:$0xff] }
 0x4aa   : > { %2335 = vst.msk [vmem:[#allocation3 + $0x78] sm:$0xff] %vm1450_vm3, %v2315_v12 }
 0x4ab   : > { %v6923_v50 = vpop.eup %6922  ;;  %v2313_v35 = vmul.f32 %v2293_v46, %v7706_v48  ;;  %v2298_v32 = vmul.f32 0.5, %v2278_v47  ;;  %6334 = vmatmul.mubr.msk.bf16.gmra.mxu0 %vm1450_vm3, %v2395_v56 }
 0x4ac   : > { %v2276_v53 = vadd.f32 1.0, %v6923_v50  ;;  %6337 = vmatprep.mubr.msk.bf16.mxu0 %vm7114_vm5, %v7113_v10  ;;  %v2609_v61 = vld [vmem:[#allocation3 + $0x52] ss:$2 sm:$0xff] }
 0x4ad   : > { %6358 = vmatmul.mubr.msk.bf16.gmra.mxu1 %vm1450_vm3, %v2365_v49  ;;  %v6925_v38 = vpop.eup %6924  ;;  %2333 = vst.msk [vmem:[#allocation3 + $0x68] sm:$0xff] %vm1450_vm3, %v2313_v35  ;;  %v2318_v3 = vmul.f32 %v2298_v32, %v7715_v44  ;;  %v2625_v57 = vpack.c.bf16 %v2609_v61, %v2607_v58 }
 0x4ae   : > { %v2296_v51 = vmul.f32 0.5, %v2276_v53  ;;  %6361 = vmatprep.mubr.msk.bf16.mxu1 %vm7114_vm5, %v7113_v10  ;;  %v2279_v27 = vadd.f32 1.0, %v6925_v38 }
 0x4af   : > { %2338 = vst.msk [vmem:[#allocation3 + $0x90] sm:$0xff] %vm1450_vm3, %v2318_v3 }
 0x4b0   : > { %v2316_v48 = vmul.f32 %v2296_v51, %v7722_v5  ;;  %v2299_v55 = vmul.f32 0.5, %v2279_v27 }
 0x4b1   : > { %v6927_v52 = vpop.eup %6926  ;;  %v2383_v14 = vld [vmem:[#allocation3 + $0x71] ss:$2 sm:$0xff]  ;;  %v2354_v31 = vld [vmem:[#allocation3 + $0x70] ss:$2 sm:$0xff] }
 0x4b2   : > { %2336 = vst.msk [vmem:[#allocation3 + $0x80] sm:$0xff] %vm1450_vm3, %v2316_v48  ;;  %v2319_v17 = vmul.f32 %v2299_v55, %v7732_v41  ;;  %v2277_v63 = vadd.f32 1.0, %v6927_v52 }
 0x4b4   : > { %2339 = vst.msk [vmem:[#allocation3 + $0x98] sm:$0x7f] %vm1490_vm4, %v2319_v17  ;;  %v2297_v44 = vmul.f32 0.5, %v2277_v63  ;;  %v2381_v13 = vld [vmem:[#allocation3 + $0x61] ss:$2 sm:$0xff] }
 0x4b5   : > { %v2352_v59 = vld [vmem:[#allocation3 + $0x60] ss:$2 sm:$0xff]  ;;  %v2396_v39 = vpack.c.bf16 %v2383_v14, %v2381_v13 }
 0x4b6   : > { %v2366_v1 = vpack.c.bf16 %v2354_v31, %v2352_v59  ;;  %v2317_v0 = vmul.f32 %v2297_v44, %v7748_v45  ;;  %v2601_v45 = vld [vmem:[#allocation3 + $0x12] ss:$2 sm:$0xff]  ;;  %v2611_v4 = vld [vmem:[#allocation3 + $0x62] ss:$2 sm:$0xff] }
 0x4b7   : > { %6338 = vmatmul.mubr.msk.bf16.gmra.mxu0 %vm1450_vm3, %v2396_v39  ;;  %v2623_v21 = vpack.c.bf16 %v2601_v45, %v2599_v7 }
 0x4b8   : > { %6362 = vmatmul.mubr.msk.bf16.gmra.mxu1 %vm1450_vm3, %v2366_v1  ;;  %2337 = vst.msk [vmem:[#allocation3 + $0x88] sm:$0xff] %vm1450_vm3, %v2317_v0  ;;  %6341 = vmatprep.mubr.msk.bf16.mxu0 %vm7114_vm5, %v7113_v10 }
 0x4b9   : > { %6365 = vmatprep.mubr.msk.bf16.mxu1 %vm7114_vm5, %v7113_v10  ;;  %v2613_v16 = vld [vmem:[#allocation3 + $0x72] ss:$2 sm:$0xff] }
 0x4ba   : > { %v2626_v28 = vpack.c.bf16 %v2613_v16, %v2611_v4 }
 0x4bb   : > { %v2387_v5 = vld [vmem:[#allocation3 + $0x91] ss:$2 sm:$0x7f]  ;;  %v2358_v41 = vld [vmem:[#allocation3 + $0x90] ss:$2 sm:$0x7f] }
 0x4bc   : > { %v2617_v26 = vld [vmem:[#allocation3 + $0x92] ss:$2 sm:$0x7f] }
 0x4bf   : > { %v2385_v60 = vld [vmem:[#allocation3 + $0x81] ss:$2 sm:$0xff]  ;;  %v2356_v20 = vld [vmem:[#allocation3 + $0x80] ss:$2 sm:$0xff] }
 0x4c0   : > { %v2397_v19 = vpack.c.bf16 %v2387_v5, %v2385_v60  ;;  %v2367_v2 = vpack.c.bf16 %v2358_v41, %v2356_v20  ;;  %v2615_v18 = vld [vmem:[#allocation3 + $0x82] ss:$2 sm:$0xff] }
 0x4c1   : > { %v2627_v54 = vpack.c.bf16 %v2617_v26, %v2615_v18 }
 0x4c2   : > { %6342 = vmatmul.mubr.msk.bf16.gmra.mxu0 %vm1450_vm3, %v2397_v19  ;;  %6366 = vmatmul.mubr.msk.bf16.gmra.mxu1 %vm1450_vm3, %v2367_v2 }
 0x4c3   : > { %6373 = vmatprep.mubr.msk.bf16.mxu0 %vm7114_vm5, %v7113_v10  ;;  %6397 = vmatprep.mubr.msk.bf16.mxu1 %vm7114_vm5, %v7113_v10 }
 0x4ca   : > { %6374 = vmatmul.mubr.msk.bf16.vlgmr.msra.gmra.mxu0 %vm1450_vm3, %v2623_v21 }
 0x4cb   : > { %6377 = vmatprep.mubr.msk.bf16.mxu0 %vm7114_vm5, %v7113_v10  ;;  %6410 = vmatpush3.bf16.msra.mxu0 %v6810_v43 }
 0x4cc   : > { %6411 = vmatprep.subr.bf16.mxu0 %v7113_v10 }
 0x4cf   : > { %6412 = vmatpush3.bf16.msra.mxu0 %v6811_v15 }
 0x4d2   : > { %6378 = vmatmul.mubr.msk.bf16.gmra.mxu0 %vm1450_vm3, %v2624_v9 }
 0x4d3   : > { %6381 = vmatprep.mubr.msk.bf16.mxu0 %vm7114_vm5, %v7113_v10 }
 0x4da   : > { %6382 = vmatmul.mubr.msk.bf16.gmra.mxu0 %vm1450_vm3, %v2625_v57 }
 0x4db   : > { %6385 = vmatprep.mubr.msk.bf16.mxu0 %vm7114_vm5, %v7113_v10 }
 0x4e2   : > { %6386 = vmatmul.mubr.msk.bf16.gmra.mxu0 %vm1450_vm3, %v2626_v28 }
 0x4e3   : > { %6389 = vmatprep.mubr.msk.bf16.mxu0 %vm7114_vm5, %v7113_v10 }
 0x4ea   : > { %6390 = vmatmul.mubr.msk.bf16.gmra.mxu0 %vm1450_vm3, %v2627_v54 }
 0x4eb   : > { %6413 = vmatprep.mubr.msk.bf16.mxu0 %vm7114_vm5, %v7113_v10 }
 0x55b   : > { %v2459_v23 = vpop.f32.mrf.mxu0 }
 0x55d   : > { %v2559_v36 = vpop.f32.mrf.mxu1  ;;  %v6327_v24 = vpop.f32.mrf.mxu0 }
 0x55e   : > { %v2560_v60 = vadd.f32 %v2559_v36, %v2459_v23 }
 0x55f   : > { %v6351_v42 = vpop.f32.mrf.mxu1  ;;  %v2462_v30 = vpop.f32.mrf.mxu0 }
 0x561   : > { %v2562_v25 = vpop.f32.mrf.mxu1  ;;  %v6328_v11 = vpop.f32.mrf.mxu0 }
 0x562   : > { %v2563_v45 = vadd.f32 %v2562_v25, %v2462_v30 }
 0x563   : > { %v6352_v40 = vpop.f32.mrf.mxu1  ;;  %v2467_v29 = vpop.f32.mrf.mxu0 }
 0x565   : > { %v2567_v12 = vpop.f32.mrf.mxu1  ;;  %v6331_v6 = vpop.f32.mrf.mxu0 }
 0x566   : > { %v2568_v61 = vadd.f32 %v2567_v12, %v2467_v29 }
 0x567   : > { %v6355_v37 = vpop.f32.mrf.mxu1  ;;  %v2470_v34 = vpop.f32.mrf.mxu0 }
 0x569   : > { %v2570_v46 = vpop.f32.mrf.mxu1  ;;  %v6332_v47 = vpop.f32.mrf.mxu0 }
 0x56a   : > { %v2571_v54 = vadd.f32 %v2570_v46, %v2470_v34 }
 0x56b   : > { %v6356_v56 = vpop.f32.mrf.mxu1  ;;  %v2475_v49 = vpop.f32.mrf.mxu0 }
 0x56d   : > { %v2575_v50 = vpop.f32.mrf.mxu1  ;;  %v6335_v35 = vpop.f32.mrf.mxu0 }
 0x56e   : > { %v2576_v30 = vadd.f32 %v2575_v50, %v2475_v49 }
 0x56f   : > { %v6359_v32 = vpop.f32.mrf.mxu1  ;;  %v2478_v53 = vpop.f32.mrf.mxu0 }
 0x571   : > { %v2578_v38 = vpop.f32.mrf.mxu1  ;;  %v6336_v3 = vpop.f32.mrf.mxu0 }
 0x572   : > { %v2579_v46 = vadd.f32 %v2578_v38, %v2478_v53 }
 0x573   : > { %v6360_v51 = vpop.f32.mrf.mxu1 }
 0x577   : > { %v7834_v27 = vpop.f32.mrf.mxu0 }
 0x578   : > { %v7836_v48 = vpop.f32.mrf.mxu1 }
 0x579   : > { %v6339_v55 = vpop.f32.mrf.mxu0 }
 0x57a   : > { %v6363_v52 = vpop.f32.mrf.mxu1  ;;  %v2584_v55 = vadd.f32 %v7836_v48, %v7834_v27 }
 0x57b   : > { %v7838_v17 = vpop.f32.mrf.mxu0 }
 0x57c   : > { %v7840_v63 = vpop.f32.mrf.mxu1 }
 0x57d   : > { %v6340_v14 = vpop.f32.mrf.mxu0  ;;  %v2587_v48 = vadd.f32 %v7840_v63, %v7838_v17 }
 0x57e   : > { %v6364_v31 = vpop.f32.mrf.mxu1 }
 0x582   : > { %v7842_v44 = vpop.f32.mrf.mxu0  ;;  %v7844_v13 = vpop.f32.mrf.mxu1 }
 0x584   : > { %v6343_v59 = vpop.f32.mrf.mxu0  ;;  %v6367_v39 = vpop.f32.mrf.mxu1 }
 0x586   : > { %v7846_v1 = vpop.f32.mrf.mxu0  ;;  %v7848_v0 = vpop.f32.mrf.mxu1 }
 0x588   : > { %v6344_v5 = vpop.f32.mrf.mxu0  ;;  %v6368_v41 = vpop.f32.mrf.mxu1 }
 0x58a   : > { %v2689_v20 = vpop.f32.mrf.mxu0 }
 0x58b   : > { %v7850_v19 = vadd.f32 %v2689_v20, %v2560_v60 }
 0x58c   : > { %v6375_v2 = vpop.f32.mrf.mxu0 }
 0x58d   : > { %v2738_v7 = vmul.f32 %v7850_v19, %v7850_v19 }
 0x58e   : > { %v2692_v21 = vpop.f32.mrf.mxu0 }
 0x58f   : > { %v2748_v8 = vmul.f32 %v2738_v7, %v7850_v19  ;;  %v7855_v33 = vadd.f32 %v2692_v21, %v2563_v45 }
 0x590   : > { %v6376_v9 = vpop.f32.mrf.mxu0 }
 0x591   : > { %v2758_v58 = vmul.f32 0.044715, %v2748_v8  ;;  %v2739_v57 = vmul.f32 %v7855_v33, %v7855_v33 }
 0x592   : > { %v2697_v16 = vpop.f32.mrf.mxu0 }
 0x593   : > { %v2768_v4 = vadd.f32 %v2758_v58, %v7850_v19  ;;  %v2749_v28 = vmul.f32 %v2739_v57, %v7855_v33  ;;  %v7861_v18 = vadd.f32 %v2697_v16, %v2568_v61  ;;  %v2592_v61 = vadd.f32 %v7844_v13, %v7842_v44 }
 0x594   : > { %v6379_v26 = vpop.f32.mrf.mxu0  ;;  %v2595_v13 = vadd.f32 %v7848_v0, %v7846_v1 }
 0x595   : > { %v2778_v62 = vmul.f32 0.7978846, %v2768_v4  ;;  %v2759_v43 = vmul.f32 0.044715, %v2749_v28  ;;  %v2740_v22 = vmul.f32 %v7861_v18, %v7861_v18 }
 0x596   : > { %v2700_v15 = vpop.f32.mrf.mxu0 }
 0x597   : > { %6928 = vtanh.f32 %v2778_v62  ;;  %v2769_v23 = vadd.f32 %v2759_v43, %v7855_v33  ;;  %v2750_v36 = vmul.f32 %v2740_v22, %v7861_v18  ;;  %v7867_v24 = vadd.f32 %v2700_v15, %v2571_v54 }
 0x598   : > { %v6380_v42 = vpop.f32.mrf.mxu0 }
 0x599   : > { %v2779_v25 = vmul.f32 0.7978846, %v2769_v23  ;;  %v2760_v11 = vmul.f32 0.044715, %v2750_v36  ;;  %v2741_v40 = vmul.f32 %v7867_v24, %v7867_v24 }
 0x59a   : > { %v2705_v29 = vpop.f32.mrf.mxu0 }
 0x59b   : > { %6930 = vtanh.f32 %v2779_v25  ;;  %v2770_v12 = vadd.f32 %v2760_v11, %v7861_v18  ;;  %v2751_v6 = vmul.f32 %v2741_v40, %v7867_v24  ;;  %v7873_v37 = vadd.f32 %v2705_v29, %v2576_v30 }
 0x59c   : > { %v6383_v34 = vpop.f32.mrf.mxu0 }
 0x59d   : > { %v2780_v47 = vmul.f32 0.7978846, %v2770_v12  ;;  %v2761_v56 = vmul.f32 0.044715, %v2751_v6  ;;  %v2742_v49 = vmul.f32 %v7873_v37, %v7873_v37 }
 0x59e   : > { %v2708_v50 = vpop.f32.mrf.mxu0 }
 0x59f   : > { %6932 = vtanh.f32 %v2780_v47  ;;  %v2771_v35 = vadd.f32 %v2761_v56, %v7867_v24  ;;  %v2752_v32 = vmul.f32 %v2742_v49, %v7873_v37  ;;  %v7879_v3 = vadd.f32 %v2708_v50, %v2579_v46 }
 0x5a0   : > { %v6384_v51 = vpop.f32.mrf.mxu0 }
 0x5a1   : > { %v2781_v52 = vmul.f32 0.7978846, %v2771_v35  ;;  %v2762_v14 = vmul.f32 0.044715, %v2752_v32  ;;  %v2743_v53 = vmul.f32 %v7879_v3, %v7879_v3 }
 0x5a2   : > { %v2713_v38 = vpop.f32.mrf.mxu0 }
 0x5a3   : > { %6934 = vtanh.f32 %v2781_v52  ;;  %v2772_v31 = vadd.f32 %v2762_v14, %v7873_v37  ;;  %v2753_v59 = vmul.f32 %v2743_v53, %v7879_v3  ;;  %v7887_v39 = vadd.f32 %v2713_v38, %v2584_v55 }
 0x5a4   : > { %v6929_v5 = vpop.eup %6928  ;;  %v6387_v41 = vpop.f32.mrf.mxu0 }
 0x5a5   : > { %v2798_v60 = vadd.f32 1.0, %v6929_v5  ;;  %v2782_v20 = vmul.f32 0.7978846, %v2772_v31  ;;  %v2763_v2 = vmul.f32 0.044715, %v2753_v59  ;;  %v2744_v27 = vmul.f32 %v7887_v39, %v7887_v39 }
 0x5a6   : > { %v2716_v45 = vpop.f32.mrf.mxu0 }
 0x5a7   : > { %v2808_v7 = vmul.f32 0.5, %v2798_v60  ;;  %6936 = vtanh.f32 %v2782_v20  ;;  %v2773_v21 = vadd.f32 %v2763_v2, %v7879_v3  ;;  %v2754_v8 = vmul.f32 %v2744_v27, %v7887_v39  ;;  %v6812_v2 = vld [vmem:[%s7170_s29 + $0x28] sm:$0xff]  }
 0x5a8   : > { %v6931_v9 = vpop.eup %6930  ;;  %v7897_v58 = vadd.f32 %v2716_v45, %v2587_v48  ;;  %v6388_v57 = vpop.f32.mrf.mxu0 }
 0x5a9   : > { %v2818_v16 = vmul.f32 %v2808_v7, %v7850_v19  ;;  %v2799_v4 = vadd.f32 1.0, %v6931_v9  ;;  %v2783_v28 = vmul.f32 0.7978846, %v2773_v21  ;;  %v2764_v26 = vmul.f32 0.044715, %v2754_v8 }
 0x5aa   : > { %v2745_v17 = vmul.f32 %v7897_v58, %v7897_v58  ;;  %v2721_v63 = vpop.f32.mrf.mxu0 }
 0x5ab   : > { %2828 = vst.msk [vmem:[#allocation2] sm:$0xff] %vm1450_vm3, %v2818_v16  ;;  %v2809_v54 = vmul.f32 0.5, %v2799_v4  ;;  %6938 = vtanh.f32 %v2783_v28  ;;  %v2774_v62 = vadd.f32 %v2764_v26, %v7887_v39  ;;  %v7904_v43 = vadd.f32 %v2721_v63, %v2592_v61  ;;  %v6813_v61 = vld [vmem:[%s7170_s29 + $0x20] sm:$0xff]  }
 0x5ac   : > { %v6933_v44 = vpop.eup %6932  ;;  %v2755_v19 = vmul.f32 %v2745_v17, %v7897_v58  ;;  %v6391_v22 = vpop.f32.mrf.mxu0 }
 0x5ad   : > { %v2819_v15 = vmul.f32 %v2809_v54, %v7855_v33  ;;  %v2800_v23 = vadd.f32 1.0, %v6933_v44  ;;  %v2784_v36 = vmul.f32 0.7978846, %v2774_v62  ;;  %v2746_v42 = vmul.f32 %v7904_v43, %v7904_v43 }
 0x5ae   : > { %v2765_v30 = vmul.f32 0.044715, %v2755_v19  ;;  %v2724_v25 = vpop.f32.mrf.mxu0 }
 0x5af   : > { %2829 = vst.msk [vmem:[#allocation2 + $0x8] sm:$0xff] %vm1450_vm3, %v2819_v15  ;;  %v2810_v11 = vmul.f32 0.5, %v2800_v23  ;;  %6940 = vtanh.f32 %v2784_v36  ;;  %v2756_v40 = vmul.f32 %v2746_v42, %v7904_v43  ;;  %v7914_v29 = vadd.f32 %v2724_v25, %v2595_v13 }
 0x5b0   : > { %v6935_v1 = vpop.eup %6934  ;;  %v2775_v0 = vadd.f32 %v2765_v30, %v7897_v58  ;;  %v6392_v12 = vpop.f32.mrf.mxu0 }
 0x5b1   : > { %v2820_v33 = vmul.f32 %v2810_v11, %v7861_v18  ;;  %v2801_v6 = vadd.f32 1.0, %v6935_v1  ;;  %v2766_v34 = vmul.f32 0.044715, %v2756_v40  ;;  %v2747_v46 = vmul.f32 %v7914_v29, %v7914_v29 }
 0x5b2   : > { %v2785_v47 = vmul.f32 0.7978846, %v2775_v0 }
 0x5b3   : > { %2830 = vst.msk [vmem:[#allocation2 + $0x10] sm:$0xff] %vm1450_vm3, %v2820_v33  ;;  %v2811_v56 = vmul.f32 0.5, %v2801_v6  ;;  %v2776_v49 = vadd.f32 %v2766_v34, %v7904_v43  ;;  %v2757_v50 = vmul.f32 %v2747_v46, %v7914_v29  ;;  %v6814_v33 = vld [vmem:[%s8429_s3 + $0x18] sm:$0xff]   ;;  %v6815_v6 = vld [vmem:[%s8429_s3 + $0x10] sm:$0xff]   ;;  %v7970_v34 = vld [vmem:[%s8429_s3 + $0x8] sm:$0xff]  }
 0x5b4   : > { %v6937_v35 = vpop.eup %6936  ;;  %6942 = vtanh.f32 %v2785_v47  ;;  %6441 = vmatprep.subr.bf16.mxu0 %v6814_v33 }
 0x5b5   : > { %v2821_v32 = vmul.f32 %v2811_v56, %v7867_v24  ;;  %v2802_v51 = vadd.f32 1.0, %v6937_v35  ;;  %v2786_v55 = vmul.f32 0.7978846, %v2776_v49  ;;  %v2767_v18 = vmul.f32 0.044715, %v2757_v50 }
 0x5b6   : > { %v2850_v20 = vld [vmem:[#allocation2 + $0x1] ss:$2 sm:$0xff]  ;;  %v2838_v48 = vld [vmem:[#allocation2] ss:$2 sm:$0xff] }
 0x5b7   : > { %2831 = vst.msk [vmem:[#allocation2 + $0x18] sm:$0xff] %vm1450_vm3, %v2821_v32  ;;  %v2812_v52 = vmul.f32 0.5, %v2802_v51  ;;  %6944 = vtanh.f32 %v2786_v55  ;;  %v2777_v14 = vadd.f32 %v2767_v18, %v7914_v29 }
 0x5b8   : > { %v6939_v53 = vpop.eup %6938 }
 0x5b9   : > { %v2822_v38 = vmul.f32 %v2812_v52, %v7873_v37  ;;  %v2803_v31 = vadd.f32 1.0, %v6939_v53  ;;  %v2787_v59 = vmul.f32 0.7978846, %v2777_v14 }
 0x5ba   : > { %v3017_v25 = vld [vmem:[#allocation2 + $0x2] ss:$2 sm:$0xff] }
 0x5bb   : > { %2832 = vst.msk [vmem:[#allocation2 + $0x20] sm:$0xff] %vm1450_vm3, %v2822_v38  ;;  %v2813_v5 = vmul.f32 0.5, %v2803_v31  ;;  %6946 = vtanh.f32 %v2787_v59 }
 0x5bc   : > { %v6941_v24 = vpop.eup %6940 }
 0x5bd   : > { %v2823_v41 = vmul.f32 %v2813_v5, %v7879_v3  ;;  %v2804_v60 = vadd.f32 1.0, %v6941_v24 }
 0x5be   : > { %v2851_v27 = vld [vmem:[#allocation2 + $0x11] ss:$2 sm:$0xff]  ;;  %v2839_v45 = vld [vmem:[#allocation2 + $0x10] ss:$2 sm:$0xff] }
 0x5bf   : > { %2833 = vst.msk [vmem:[#allocation2 + $0x28] sm:$0xff] %vm1450_vm3, %v2823_v41  ;;  %v2814_v7 = vmul.f32 0.5, %v2804_v60  ;;  %v2860_v37 = vpack.c.bf16 %v2851_v27, %v2850_v20  ;;  %v2847_v21 = vpack.c.bf16 %v2839_v45, %v2838_v48 }
 0x5c1   : > { %v6943_v8 = vpop.eup %6942  ;;  %v2824_v9 = vmul.f32 %v2814_v7, %v7887_v39  ;;  %6398 = vmatmul.mubr.msk.bf16.vlgmr.msra.gmra.mxu1 %vm1450_vm3, %v2860_v37  ;;  %6414 = vmatmul.mubr.msk.bf16.vlgmr.msra.gmra.mxu0 %vm1450_vm3, %v2847_v21 }
 0x5c2   : > { %v2805_v3 = vadd.f32 1.0, %v6943_v8  ;;  %6426 = vmatpush3.bf16.msra.mxu1 %v6812_v2  ;;  %6401 = vmatprep.mubr.msk.bf16.mxu1 %vm7114_vm5, %v7113_v10  ;;  %v3018_v30 = vld [vmem:[#allocation2 + $0x12] ss:$2 sm:$0xff] }
 0x5c3   : > { %2834 = vst.msk [vmem:[#allocation2 + $0x30] sm:$0xff] %vm1450_vm3, %v2824_v9  ;;  %6417 = vmatprep.mubr.msk.bf16.mxu0 %vm7114_vm5, %v7113_v10  ;;  %6427 = vmatprep.subr.bf16.mxu1 %v7113_v10  ;;  %v3027_v11 = vpack.c.bf16 %v3018_v30, %v3017_v25 }
 0x5c4   : > { %v6945_v57 = vpop.eup %6944  ;;  %v2815_v16 = vmul.f32 0.5, %v2805_v3  ;;  %6442 = vmatpush3.bf16.msra.mxu0 %v6814_v33 }
 0x5c5   : > { %v2806_v39 = vadd.f32 1.0, %v6945_v57  ;;  %6443 = vmatprep.subr.bf16.mxu0 %v6815_v6 }
 0x5c6   : > { %v2825_v4 = vmul.f32 %v2815_v16, %v7897_v58  ;;  %6428 = vmatpush3.bf16.msra.mxu1 %v6813_v61  ;;  %v2852_v44 = vld [vmem:[#allocation2 + $0x21] ss:$2 sm:$0xff]  ;;  %v2840_v58 = vld [vmem:[#allocation2 + $0x20] ss:$2 sm:$0xff] }
 0x5c7   : > { %v2816_v28 = vmul.f32 0.5, %v2806_v39  ;;  %6465 = vmatprep.subr.bf16.mxu1 %v7113_v10 }
 0x5c8   : > { %v6947_v26 = vpop.eup %6946  ;;  %2835 = vst.msk [vmem:[#allocation2 + $0x38] sm:$0xff] %vm1450_vm3, %v2825_v4  ;;  %6444 = vmatpush3.bf16.msra.mxu0 %v6815_v6 }
 0x5c9   : > { %v2826_v17 = vmul.f32 %v2816_v28, %v7904_v43  ;;  %v2807_v63 = vadd.f32 1.0, %v6947_v26  ;;  %6449 = vmatprep.subr.bf16.mxu0 %v7970_v34 }
 0x5cb   : > { %2836 = vst.msk [vmem:[#allocation2 + $0x40] sm:$0xff] %vm1450_vm3, %v2826_v17  ;;  %v2817_v54 = vmul.f32 0.5, %v2807_v63 }
 0x5cd   : > { %v2827_v62 = vmul.f32 %v2817_v54, %v7914_v29  ;;  %v3019_v29 = vld [vmem:[#allocation2 + $0x22] ss:$2 sm:$0xff] }
 0x5cf   : > { %2837 = vst.msk [vmem:[#allocation2 + $0x48] sm:$0x7f] %vm1490_vm4, %v2827_v62  ;;  %v2853_v13 = vld [vmem:[#allocation2 + $0x31] ss:$2 sm:$0xff]  ;;  %v2841_v19 = vld [vmem:[#allocation2 + $0x30] ss:$2 sm:$0xff] }
 0x5d0   : > { %v2861_v22 = vpack.c.bf16 %v2853_v13, %v2852_v44  ;;  %v2848_v15 = vpack.c.bf16 %v2841_v19, %v2840_v58 }
 0x5d2   : > { %6402 = vmatmul.mubr.msk.bf16.gmra.mxu1 %vm1450_vm3, %v2861_v22  ;;  %6418 = vmatmul.mubr.msk.bf16.gmra.mxu0 %vm1450_vm3, %v2848_v15  ;;  %v3020_v40 = vld [vmem:[#allocation2 + $0x32] ss:$2 sm:$0xff] }
 0x5d3   : > { %6405 = vmatprep.mubr.msk.bf16.mxu1 %vm7114_vm5, %v7113_v10  ;;  %6421 = vmatprep.mubr.msk.bf16.mxu0 %vm7114_vm5, %v7113_v10  ;;  %v3028_v1 = vpack.c.bf16 %v3020_v40, %v3019_v29 }
 0x5d6   : > { %v2854_v43 = vld [vmem:[#allocation2 + $0x41] ss:$2 sm:$0x7f]  ;;  %v2842_v23 = vld [vmem:[#allocation2 + $0x40] ss:$2 sm:$0x7f] }
 0x5d7   : > { %v2862_v36 = vpack.c.bf16 %v2854_v43, %v2854_v43  ;;  %v2849_v42 = vpack.c.bf16 %v2842_v23, %v2842_v23  ;;  %v3021_v0 = vld [vmem:[#allocation2 + $0x42] ss:$2 sm:$0x7f] }
 0x5d8   : > { %v3029_v12 = vpack.c.bf16 %v3021_v0, %v3021_v0 }
 0x5da   : > { %6406 = vmatmul.mubr.msk.bf16.gmra.mxu1 %vm1450_vm3, %v2862_v36  ;;  %6422 = vmatmul.mubr.msk.bf16.gmra.mxu0 %vm1450_vm3, %v2849_v42 }
 0x5db   : > { %6429 = vmatprep.mubr.msk.bf16.mxu1 %vm7114_vm5, %v7113_v10 }
 0x5e2   : > { %6430 = vmatmul.mubr.msk.bf16.vlgmr.msra.gmra.mxu1 %vm1450_vm3, %v3027_v11 }
 0x5e3   : > { %6433 = vmatprep.mubr.msk.bf16.mxu1 %vm7114_vm5, %v7113_v10 }
 0x5ea   : > { %6434 = vmatmul.mubr.msk.bf16.gmra.mxu1 %vm1450_vm3, %v3028_v1 }
 0x5eb   : > { %6437 = vmatprep.mubr.msk.bf16.mxu1 %vm7114_vm5, %v7113_v10 }
 0x5f2   : > { %6438 = vmatmul.mubr.msk.bf16.gmra.mxu1 %vm1450_vm3, %v3029_v12 }
 0x5f3   : > { %6469 = vmatprep.mubr.msk.bf16.mxu1 %vm7114_vm5, %v7113_v10 }
 0x681   : > { %v2918_v46 = vpop.f32.mrf.mxu1  ;;  %v2995_v47 = vpop.f32.mrf.mxu0 }
 0x682   : > { %v2996_v45 = vadd.f32 %v2995_v47, %v2918_v46 }
 0x683   : > { %v6399_v56 = vpop.f32.mrf.mxu1  ;;  %v6415_v49 = vpop.f32.mrf.mxu0 }
 0x685   : > { %v2921_v50 = vpop.f32.mrf.mxu1  ;;  %v2998_v35 = vpop.f32.mrf.mxu0 }
 0x686   : > { %v2999_v8 = vadd.f32 %v2998_v35, %v2921_v50 }
 0x687   : > { %v6400_v32 = vpop.f32.mrf.mxu1  ;;  %v6416_v51 = vpop.f32.mrf.mxu0 }
 0x692   : > { %v2926_v55 = vpop.f32.mrf.mxu1  ;;  %v3003_v18 = vpop.f32.mrf.mxu0 }
 0x693   : > { %v3004_v39 = vadd.f32 %v3003_v18, %v2926_v55 }
 0x694   : > { %v6403_v52 = vpop.f32.mrf.mxu1  ;;  %v6419_v14 = vpop.f32.mrf.mxu0 }
 0x696   : > { %v2929_v53 = vpop.f32.mrf.mxu1  ;;  %v3006_v38 = vpop.f32.mrf.mxu0 }
 0x697   : > { %v3007_v44 = vadd.f32 %v3006_v38, %v2929_v53 }
 0x698   : > { %v6404_v31 = vpop.f32.mrf.mxu1  ;;  %v6420_v59 = vpop.f32.mrf.mxu0 }
 0x69a   : > { %v2934_v5 = vpop.f32.mrf.mxu1  ;;  %v3011_v24 = vpop.f32.mrf.mxu0 }
 0x69b   : > { %v3012_v42 = vadd.f32 %v3011_v24, %v2934_v5 }
 0x69c   : > { %v6407_v41 = vpop.f32.mrf.mxu1  ;;  %v6423_v60 = vpop.f32.mrf.mxu0 }
 0x69e   : > { %v2937_v20 = vpop.f32.mrf.mxu1  ;;  %v3014_v2 = vpop.f32.mrf.mxu0 }
 0x6a0   : > { %v6408_v27 = vpop.f32.mrf.mxu1  ;;  %v6424_v48 = vpop.f32.mrf.mxu0 }
 0x6a2   : > { %v3085_v7 = vpop.f32.mrf.mxu1 }
 0x6a3   : > { %v3107_v37 = vadd.f32 %v3085_v7, %v2996_v45 }
 0x6a4   : > { %v6431_v21 = vpop.f32.mrf.mxu1 }
 0x6a5   : > { %v3112_v9 = vmul.f32 %v3107_v37, %v3107_v37 }
 0x6a6   : > { %v3088_v3 = vpop.f32.mrf.mxu1 }
 0x6a7   : > { %v3117_v61 = vmul.f32 %v3112_v9, %v3107_v37  ;;  %v3108_v57 = vadd.f32 %v3088_v3, %v2999_v8 }
 0x6a8   : > { %v6432_v16 = vpop.f32.mrf.mxu1 }
 0x6a9   : > { %v3122_v4 = vmul.f32 0.044715, %v3117_v61  ;;  %v3113_v28 = vmul.f32 %v3108_v57, %v3108_v57 }
 0x6aa   : > { %v3093_v26 = vpop.f32.mrf.mxu1 }
 0x6ab   : > { %v3127_v17 = vadd.f32 %v3122_v4, %v3107_v37  ;;  %v3118_v63 = vmul.f32 %v3113_v28, %v3108_v57  ;;  %v3109_v54 = vadd.f32 %v3093_v26, %v3004_v39  ;;  %v6817_v28 = vld [vmem:[%s8429_s3] sm:$0xff]  }
 0x6ac   : > { %v6435_v62 = vpop.f32.mrf.mxu1 }
 0x6ad   : > { %v3132_v13 = vmul.f32 0.7978846, %v3127_v17  ;;  %v3123_v58 = vmul.f32 0.044715, %v3118_v63  ;;  %v3114_v19 = vmul.f32 %v3109_v54, %v3109_v54  ;;  %v6818_v17 = vld [vmem:[%s8429_s3 + $0x28] sm:$0xff]  }
 0x6ae   : > { %v3096_v22 = vpop.f32.mrf.mxu1 }
 0x6af   : > { %6948 = vtanh.f32 %v3132_v13  ;;  %v3128_v15 = vadd.f32 %v3123_v58, %v3108_v57  ;;  %v3119_v43 = vmul.f32 %v3114_v19, %v3109_v54  ;;  %v3110_v23 = vadd.f32 %v3096_v22, %v3007_v44  ;;  %v6819_v13 = vld [vmem:[%s8429_s3 + $0x20] sm:$0xff]   ;;  %v6820_v22 = vld [vmem:[%s8428_s8 + $0x18] sm:$0xff]   ;;  %s8373_s3 = sand.u32 1, %s7072_s16  }
 0x6b0   : > { %v6436_v36 = vpop.f32.mrf.mxu1  ;;  %6466 = vmatpush3.bf16.msra.mxu1 %v6820_v22  ;;  %s6698_s5 = smul.u32 12, %s8373_s3  ;;  %s8378_s3 = smov 80  }
 0x6b1   : > { %v3133_v30 = vmul.f32 0.7978846, %v3128_v15  ;;  %v3124_v25 = vmul.f32 0.044715, %v3119_v43  ;;  %v3115_v11 = vmul.f32 %v3110_v23, %v3110_v23  ;;  %v6822_v15 = vld [vmem:[%s8428_s8 + $0x8] sm:$0xff]   ;;  %v6821_v43 = vld [vmem:[%s8428_s8 + $0x10] sm:$0xff]   ;;  %6467 = vmatprep.subr.bf16.mxu1 %v7113_v10 }
 0x6b2   : > { %v3101_v40 = vpop.f32.mrf.mxu1 }
 0x6b3   : > { %6950 = vtanh.f32 %v3133_v30  ;;  %v3129_v29 = vadd.f32 %v3124_v25, %v3109_v54  ;;  %v3120_v1 = vmul.f32 %v3115_v11, %v3110_v23  ;;  %v3111_v0 = vadd.f32 %v3101_v40, %v3012_v42 }
 0x6b4   : > { %v6439_v12 = vpop.f32.mrf.mxu1  ;;  %6468 = vmatpush3.bf16.msra.mxu1 %v6821_v43 }
 0x6b5   : > { %v3134_v33 = vmul.f32 0.7978846, %v3129_v29  ;;  %v3125_v6 = vmul.f32 0.044715, %v3120_v1  ;;  %v3116_v46 = vmul.f32 %v3111_v0, %v3111_v0  ;;  %6481 = vmatprep.subr.bf16.mxu1 %v7113_v10 }
 0x6b6   : > { %v3104_v47 = vpop.f32.mrf.mxu1 }
 0x6b7   : > { %6952 = vtanh.f32 %v3134_v33  ;;  %v3130_v56 = vadd.f32 %v3125_v6, %v3110_v23  ;;  %v3121_v49 = vmul.f32 %v3116_v46, %v3111_v0 }
 0x6b8   : > { %v6440_v50 = vpop.f32.mrf.mxu1 }
 0x6b9   : > { %v3135_v35 = vmul.f32 0.7978846, %v3130_v56  ;;  %v3126_v32 = vmul.f32 0.044715, %v3121_v49 }
 0x6bb   : > { %6954 = vtanh.f32 %v3135_v35  ;;  %v3131_v51 = vadd.f32 %v3126_v32, %v3111_v0 }
 0x6bc   : > { %v6949_v55 = vpop.eup %6948 }
 0x6bd   : > { %v3142_v18 = vadd.f32 1.0, %v6949_v55  ;;  %v3136_v52 = vmul.f32 0.7978846, %v3131_v51 }
 0x6bf   : > { %v3147_v14 = vmul.f32 0.5, %v3142_v18  ;;  %6956 = vtanh.f32 %v3136_v52 }
 0x6c0   : > { %v6951_v53 = vpop.eup %6950 }
 0x6c1   : > { %v3152_v38 = vmul.f32 %v3147_v14, %v3107_v37  ;;  %v3143_v31 = vadd.f32 1.0, %v6951_v53 }
 0x6c3   : > { %3157 = vst.msk [vmem:[#allocation3] sm:$0xff] %vm1450_vm3, %v3152_v38  ;;  %v3148_v59 = vmul.f32 0.5, %v3143_v31 }
 0x6c4   : > { %v6953_v5 = vpop.eup %6952 }
 0x6c5   : > { %v3153_v24 = vmul.f32 %v3148_v59, %v3108_v57  ;;  %v3144_v41 = vadd.f32 1.0, %v6953_v5 }
 0x6c7   : > { %3158 = vst.msk [vmem:[#allocation3 + $0x8] sm:$0xff] %vm1450_vm3, %v3153_v24  ;;  %v3149_v60 = vmul.f32 0.5, %v3144_v41 }
 0x6c8   : > { %v6955_v20 = vpop.eup %6954 }
 0x6c9   : > { %v3154_v2 = vmul.f32 %v3149_v60, %v3109_v54  ;;  %v3145_v27 = vadd.f32 1.0, %v6955_v20 }
 0x6cb   : > { %3159 = vst.msk [vmem:[#allocation3 + $0x10] sm:$0xff] %vm1450_vm3, %v3154_v2  ;;  %v3150_v48 = vmul.f32 0.5, %v3145_v27 }
 0x6cc   : > { %v6957_v45 = vpop.eup %6956 }
 0x6cd   : > { %v3155_v7 = vmul.f32 %v3150_v48, %v3110_v23  ;;  %v3146_v37 = vadd.f32 1.0, %v6957_v45  ;;  %v6823_v23 = vld [vmem:[%s8428_s8] sm:$0xff]   ;;  %s8071_s8 = scalar_lea.vmem [#allocation4], %s6698_s5  ;;  %s8376_s5 = smov 96  }
 0x6ce   : > { %v3171_v9 = vld [vmem:[#allocation3 + $0x1] ss:$2 sm:$0xff]  ;;  %v3162_v4 = vld [vmem:[#allocation3] ss:$2 sm:$0xff] }
 0x6cf   : > { %3160 = vst.msk [vmem:[#allocation3 + $0x18] sm:$0xff] %vm1450_vm3, %v3155_v7  ;;  %v3151_v21 = vmul.f32 0.5, %v3146_v37 }
 0x6d1   : > { %v3156_v8 = vmul.f32 %v3151_v21, %v3111_v0 }
 0x6d2   : > { %v3313_v44 = vld [vmem:[#allocation3 + $0x2] ss:$2 sm:$0xff] }
 0x6d3   : > { %3161 = vst.msk [vmem:[#allocation3 + $0x20] sm:$0x7f] %vm1490_vm4, %v3156_v8 }
 0x6d6   : > { %v3172_v3 = vld [vmem:[#allocation3 + $0x11] ss:$2 sm:$0xff]  ;;  %v3163_v57 = vld [vmem:[#allocation3 + $0x10] ss:$2 sm:$0xff] }
 0x6d7   : > { %v3179_v61 = vpack.c.bf16 %v3172_v3, %v3171_v9  ;;  %v3169_v26 = vpack.c.bf16 %v3163_v57, %v3162_v4 }
 0x6d9   : > { %6445 = vmatprep.mubr.msk.bf16.mxu0 %vm1450_vm3, %v3179_v61 }
 0x6da   : > { %v3173_v16 = vld [vmem:[#allocation3 + $0x21] ss:$2 sm:$0x7]  ;;  %v3164_v63 = vld [vmem:[#allocation3 + $0x20] ss:$2 sm:$0x7] }
 0x6db   : > { %v3180_v39 = vpack.c.bf16 %v3173_v16, %v3173_v16  ;;  %v3314_v54 = vld [vmem:[#allocation3 + $0x12] ss:$2 sm:$0xff]  ;;  %v3170_v62 = vpack.c.bf16 %v3164_v63, %v3164_v63 }
 0x6dc   : > { %v3321_v58 = vpack.c.bf16 %v3314_v54, %v3313_v44  ;;  %v6824_v63 = vld [vmem:[%s8424_s14 + $0x18] sm:$0xff]   ;;  %v6825_v54 = vld [vmem:[%s8424_s14 + $0x8] sm:$0xff]   ;;  %v6827_v44 = vld [vmem:[%s8424_s14] sm:$0xff]  }
 0x6dd   : > { %6446 = vmatmul.mubr.msk.bf16.vlgmr.msra.gmra.mxu0 %vm1450_vm3, %v3180_v39 }
 0x6de   : > { %6450 = vmatpush3.bf16.msra.mxu0 %v7970_v34  ;;  %6453 = vmatprep.mubr.msk.bf16.mxu0 %vm1450_vm3, %v3169_v26  ;;  %v3315_v34 = vld [vmem:[#allocation3 + $0x22] ss:$2 sm:$0x7] }
 0x6df   : > { %6451 = vmatprep.subr.bf16.mxu0 %v6817_v28  ;;  %v3322_v19 = vpack.c.bf16 %v3315_v34, %v3315_v34 }
 0x6e2   : > { %6452 = vmatpush3.bf16.msra.mxu0 %v6817_v28 }
 0x6e3   : > { %6457 = vmatprep.subr.bf16.mxu0 %v6818_v17 }
 0x6e5   : > { %6454 = vmatmul.mubr.msk.bf16.vlgmr.msra.gmra.mxu0 %vm1450_vm3, %v3170_v62  ;;  %v6826_v62 = vld [vmem:[%s8424_s14 + $0x10] sm:$0xff]   ;;  %s8448_s14 = smov 88  }
 0x6e6   : > { %6458 = vmatpush3.bf16.msra.mxu0 %v6818_v17  ;;  %6461 = vmatprep.mubr.msk.bf16.mxu0 %vm1450_vm3, %v3321_v58 }
 0x6e7   : > { %6459 = vmatprep.subr.bf16.mxu0 %v6819_v13 }
 0x6ea   : > { %6460 = vmatpush3.bf16.msra.mxu0 %v6819_v13 }
 0x6eb   : > { %6473 = vmatprep.subr.bf16.mxu0 %v7113_v10 }
 0x6ed   : > { %6462 = vmatmul.mubr.msk.bf16.vlgmr.msra.gmra.mxu0 %vm1450_vm3, %v3322_v19 }
 0x6ee   : > { %6477 = vmatprep.mubr.msk.bf16.mxu0 %vm7114_vm5, %v7113_v10  ;;  %6474 = vmatpush3.bf16.msra.mxu0 %v6822_v15 }
 0x6ef   : > { %6475 = vmatprep.subr.bf16.mxu0 %v7113_v10 }
 0x6f2   : > { %6476 = vmatpush3.bf16.msra.mxu0 %v6823_v23 }
 0x6f3   : > { %6489 = vmatprep.subr.bf16.mxu0 %v7113_v10 }
 0x79d   : > { %v6447_v36 = vpop.f32.mrf.mxu0 }
 0x79f   : > { %v3233_v42 = vpop.f32.mrf.mxu0 }
 0x7a1   : > { %v6448_v30 = vpop.f32.mrf.mxu0 }
 0x7a3   : > { %v3236_v25 = vpop.f32.mrf.mxu0 }
 0x7a5   : > { %v6455_v11 = vpop.f32.mrf.mxu0 }
 0x7a6   : > { %v3308_v0 = vadd.f32 %v6455_v11, %v6447_v36 }
 0x7a7   : > { %v3299_v40 = vpop.f32.mrf.mxu0 }
 0x7a8   : > { %v3300_v33 = vadd.f32 %v3299_v40, %v3233_v42 }
 0x7a9   : > { %v6456_v29 = vpop.f32.mrf.mxu0 }
 0x7ab   : > { %v3302_v1 = vpop.f32.mrf.mxu0 }
 0x7ac   : > { %v3303_v50 = vadd.f32 %v3302_v1, %v3236_v25 }
 0x7ad   : > { %v6463_v12 = vpop.f32.mrf.mxu0 }
 0x7ae   : > { %v3391_v6 = vadd.f32 %v6463_v12, %v3308_v0 }
 0x7af   : > { %v3375_v46 = vpop.f32.mrf.mxu0 }
 0x7b0   : > { %v3394_v47 = vmul.f32 %v3391_v6, %v3391_v6  ;;  %v3389_v56 = vadd.f32 %v3375_v46, %v3300_v33 }
 0x7b1   : > { %v6464_v49 = vpop.f32.mrf.mxu0 }
 0x7b2   : > { %v3397_v35 = vmul.f32 %v3394_v47, %v3391_v6  ;;  %v3392_v32 = vmul.f32 %v3389_v56, %v3389_v56 }
 0x7b3   : > { %v3378_v51 = vpop.f32.mrf.mxu0 }
 0x7b4   : > { %v3400_v55 = vmul.f32 0.044715, %v3397_v35  ;;  %v3395_v18 = vmul.f32 %v3392_v32, %v3389_v56  ;;  %v3390_v52 = vadd.f32 %v3378_v51, %v3303_v50 }
 0x7b6   : > { %v3403_v14 = vadd.f32 %v3400_v55, %v3391_v6  ;;  %v3398_v53 = vmul.f32 0.044715, %v3395_v18  ;;  %v3393_v38 = vmul.f32 %v3390_v52, %v3390_v52 }
 0x7b8   : > { %v3406_v31 = vmul.f32 0.7978846, %v3403_v14  ;;  %v3401_v59 = vadd.f32 %v3398_v53, %v3389_v56  ;;  %v3396_v5 = vmul.f32 %v3393_v38, %v3390_v52 }
 0x7ba   : > { %6958 = vtanh.f32 %v3406_v31  ;;  %v3404_v24 = vmul.f32 0.7978846, %v3401_v59  ;;  %v3399_v41 = vmul.f32 0.044715, %v3396_v5 }
 0x7bc   : > { %6960 = vtanh.f32 %v3404_v24  ;;  %v3402_v60 = vadd.f32 %v3399_v41, %v3390_v52 }
 0x7be   : > { %v3405_v20 = vmul.f32 0.7978846, %v3402_v60 }
 0x7c0   : > { %6962 = vtanh.f32 %v3405_v20 }
 0x7c7   : > { %v6959_v2 = vpop.eup %6958 }
 0x7c8   : > { %v3412_v27 = vadd.f32 1.0, %v6959_v2 }
 0x7c9   : > { %v6961_v48 = vpop.eup %6960 }
 0x7ca   : > { %v3415_v45 = vmul.f32 0.5, %v3412_v27  ;;  %v3410_v7 = vadd.f32 1.0, %v6961_v48 }
 0x7cc   : > { %v3418_v37 = vmul.f32 %v3415_v45, %v3391_v6  ;;  %v3413_v21 = vmul.f32 0.5, %v3410_v7 }
 0x7cd   : > { %v6963_v8 = vpop.eup %6962 }
 0x7ce   : > { %v3416_v9 = vmul.f32 %v3413_v21, %v3389_v56  ;;  %v3411_v3 = vadd.f32 1.0, %v6963_v8  ;;  %3422 = vst.msk [vmem:[#allocation2 + $0x10] sm:$0x7] %vm3421_vm6, %v3418_v37 }
 0x7d0   : > { %3419 = vst.msk [vmem:[#allocation2] sm:$0xff] %vm1450_vm3, %v3416_v9  ;;  %v3414_v61 = vmul.f32 0.5, %v3411_v3 }
 0x7d2   : > { %v3417_v57 = vmul.f32 %v3414_v61, %v3390_v52 }
 0x7d4   : > { %3420 = vst.msk [vmem:[#allocation2 + $0x8] sm:$0xff] %vm1450_vm3, %v3417_v57 }
 0x7d5   : > { %v3431_v16 = vld [vmem:[#allocation2 + $0x11] ss:$2 sm:$0x1]  ;;  %v3424_v39 = vld [vmem:[#allocation2 + $0x10] ss:$2 sm:$0x1] }
 0x7db   : > { %v3430_v4 = vld [vmem:[#allocation2 + $0x1] ss:$2 sm:$0xff]  ;;  %v3423_v28 = vld [vmem:[#allocation2] ss:$2 sm:$0xff] }
 0x7dc   : > { %v3437_v26 = vpack.c.bf16 %v3431_v16, %v3430_v4  ;;  %v3429_v17 = vpack.c.bf16 %v3424_v39, %v3423_v28  ;;  %v6828_v28 = vld [vmem:[%s7200_s30 + $0x8] sm:$0xff]  }
 0x7de   : > { %6470 = vmatmul.mubr.msk.bf16.vlgmr.msra.gmra.mxu1 %vm1450_vm3, %v3437_v26  ;;  %6478 = vmatmul.mubr.msk.bf16.vlgmr.msra.gmra.mxu0 %vm1450_vm3, %v3429_v17  ;;  %v6829_v26 = vld [vmem:[%s7200_s30] sm:$0xff]   ;;  %v6830_v17 = vld [vmem:[%s8426_s12 + $0x18] sm:$0xff]  }
 0x7df   : > { %6485 = vmatprep.mubr.msk.bf16.mxu1 %vm7114_vm5, %v7113_v10  ;;  %6493 = vmatprep.mubr.msk.bf16.mxu0 %vm7114_vm5, %v7113_v10 }
 0x7e0   : > { %6482 = vmatpush3.bf16.msra.mxu1 %v6824_v63  ;;  %6490 = vmatpush3.bf16.msra.mxu0 %v6825_v54 }
 0x7e1   : > { %6483 = vmatprep.subr.bf16.mxu1 %v7113_v10  ;;  %6491 = vmatprep.subr.bf16.mxu0 %v7113_v10 }
 0x7e4   : > { %6484 = vmatpush3.bf16.msra.mxu1 %v6826_v62  ;;  %6492 = vmatpush3.bf16.msra.mxu0 %v6827_v44 }
 0x7e5   : > { %6497 = vmatprep.subr.bf16.mxu1 %v7113_v10  ;;  %6505 = vmatprep.subr.bf16.mxu0 %v7113_v10 }
 0x89e   : > { %v3487_v13 = vpop.f32.mrf.mxu1  ;;  %v3543_v58 = vpop.f32.mrf.mxu0 }
 0x89f   : > { %v3544_v34 = vadd.f32 %v3543_v58, %v3487_v13  ;;  %v5953_v13 = vld [vmem:[%s8433_s19] ss:$0 sm:$0xff]  ;;  %s8450_s19 = smov 112  }
 0x8a0   : > { %v6471_v19 = vpop.f32.mrf.mxu1  ;;  %v6479_v22 = vpop.f32.mrf.mxu0 }
 0x8a1   : > { %v3550_v15 = vmul.f32 %v3544_v34, %v3544_v34 }
 0x8a2   : > { %v3490_v43 = vpop.f32.mrf.mxu1  ;;  %v3546_v23 = vpop.f32.mrf.mxu0 }
 0x8a3   : > { %v3552_v36 = vmul.f32 %v3550_v15, %v3544_v34  ;;  %v3547_v42 = vadd.f32 %v3546_v23, %v3490_v43  ;;  %v6831_v43 = vld [vmem:[%s8426_s12 + $0x10] sm:$0xff]   ;;  %v6832_v23 = vld [vmem:[%s8426_s12 + $0x8] sm:$0xff]  }
 0x8a4   : > { %v6472_v30 = vpop.f32.mrf.mxu1  ;;  %v6480_v25 = vpop.f32.mrf.mxu0 }
 0x8a5   : > { %v3554_v11 = vmul.f32 0.044715, %v3552_v36  ;;  %v3551_v40 = vmul.f32 %v3547_v42, %v3547_v42  ;;  %v6834_v36 = vld [vmem:[%s8426_s12] sm:$0xff]   ;;  %v3801_v25 = vlaneseq }
 0x8a7   : > { %v3556_v29 = vadd.f32 %v3554_v11, %v3544_v34  ;;  %v3553_v1 = vmul.f32 %v3551_v40, %v3547_v42 }
 0x8a9   : > { %v3558_v0 = vmul.f32 0.7978846, %v3556_v29  ;;  %v3555_v12 = vmul.f32 0.044715, %v3553_v1  ;;  %v6833_v29 = vld [vmem:[%s8426_s12 + $0x28] sm:$0xff]  }
 0x8ab   : > { %6964 = vtanh.f32 %v3558_v0  ;;  %v3557_v33 = vadd.f32 %v3555_v12, %v3547_v42 }
 0x8ad   : > { %v3559_v6 = vmul.f32 0.7978846, %v3557_v33  ;;  %v3802_v33 = vshrl.u32 %v3801_v25, 7 }
 0x8af   : > { %6966 = vtanh.f32 %v3559_v6  ;;  %vm3803_vm10 = vcmp.ge.s32.totalorder %v3802_v33, 1  ;;  %vm3815_vm11 = vcmp.le.s32.totalorder %v3802_v33, 2 }
 0x8b8   : > { %v6965_v46 = vpop.eup %6964 }
 0x8b9   : > { %v3562_v47 = vadd.f32 1.0, %v6965_v46 }
 0x8bb   : > { %v3564_v56 = vmul.f32 0.5, %v3562_v47 }
 0x8bc   : > { %v6967_v49 = vpop.eup %6966 }
 0x8bd   : > { %v3566_v50 = vmul.f32 %v3564_v56, %v3544_v34  ;;  %v3563_v35 = vadd.f32 1.0, %v6967_v49  ;;  %v5954_v34 = vld [vmem:[%s8434_s24] ss:$0 sm:$0xff]  ;;  %s8454_s24 = smov 72  }
 0x8be   : > { %v6835_v56 = vld [vmem:[%s8426_s12 + $0x20] sm:$0xff]   ;;  %s8377_s12 = smov 72  }
 0x8bf   : > { %3568 = vst.msk [vmem:[#allocation3] sm:$0xff] %vm1450_vm3, %v3566_v50  ;;  %v3565_v32 = vmul.f32 0.5, %v3563_v35 }
 0x8c1   : > { %v3567_v51 = vmul.f32 %v3565_v32, %v3547_v42  ;;  %v5955_v42 = vld [vmem:[%s8435_s1] ss:$0 sm:$0xff]  ;;  %s8439_s1 = sld [smem:[#allocation21_spill]] }
 0x8c3   : > { %3570 = vst.msk [vmem:[#allocation3 + $0x8] sm:$0x1] %vm3569_vm7, %v3567_v51 }
 0x8c6   : > { %v3577_v55 = vld [vmem:[#allocation3 + $0x1] ss:$2 sm:$0xf]  ;;  %v3571_v18 = vld [vmem:[#allocation3] ss:$2 sm:$0xf] }
 0x8c7   : > { %v3583_v52 = vpack.c.bf16 %v3577_v55, %v3577_v55  ;;  %v3576_v14 = vpack.c.bf16 %v3571_v18, %v3571_v18 }
 0x8c9   : > { %6486 = vmatmul.mubr.msk.bf16.vlgmr.msra.gmra.mxu1 %vm1450_vm3, %v3583_v52  ;;  %6494 = vmatmul.mubr.msk.bf16.vlgmr.msra.gmra.mxu0 %vm1450_vm3, %v3576_v14 }
 0x8ca   : > { %6501 = vmatprep.mubr.msk.bf16.mxu1 %vm7114_vm5, %v7113_v10  ;;  %6509 = vmatprep.mubr.msk.bf16.mxu0 %vm7114_vm5, %v7113_v10 }
 0x8cb   : > { %6498 = vmatpush3.bf16.msra.mxu1 %v6828_v28  ;;  %6506 = vmatpush3.bf16.msra.mxu0 %v6830_v17 }
 0x8cc   : > { %6499 = vmatprep.subr.bf16.mxu1 %v7113_v10  ;;  %6507 = vmatprep.subr.bf16.mxu0 %v7113_v10 }
 0x8cf   : > { %6500 = vmatpush3.bf16.msra.mxu1 %v6829_v26  ;;  %6508 = vmatpush3.bf16.msra.mxu0 %v6831_v43 }
 0x8d0   : > { %6513 = vmatprep.subr.bf16.mxu1 %v7113_v10  ;;  %6521 = vmatprep.subr.bf16.mxu0 %v7113_v10 }
 0x989   : > { %v3633_v53 = vpop.f32.mrf.mxu1  ;;  %v3688_v38 = vpop.f32.mrf.mxu0 }
 0x98a   : > { %v3689_v31 = vadd.f32 %v3688_v38, %v3633_v53 }
 0x98b   : > { %v6487_v59 = vpop.f32.mrf.mxu1  ;;  %v6495_v5 = vpop.f32.mrf.mxu0 }
 0x98c   : > { %v3694_v24 = vmul.f32 %v3689_v31, %v3689_v31 }
 0x98d   : > { %v3636_v41 = vpop.f32.mrf.mxu1  ;;  %v3691_v60 = vpop.f32.mrf.mxu0 }
 0x98e   : > { %v3695_v20 = vmul.f32 %v3694_v24, %v3689_v31  ;;  %v5976_v24 = vld [vmem:[%s8436_s11] ss:$0 sm:$0xff]  ;;  %s8440_s11 = sld [smem:[#allocation23_spill]] }
 0x98f   : > { %v6488_v2 = vpop.f32.mrf.mxu1  ;;  %v6496_v27 = vpop.f32.mrf.mxu0 }
 0x990   : > { %v3696_v48 = vmul.f32 0.044715, %v3695_v20 }
 0x992   : > { %v3697_v45 = vadd.f32 %v3696_v48, %v3689_v31 }
 0x994   : > { %v3698_v7 = vmul.f32 0.7978846, %v3697_v45  ;;  %v5979_v25 = vld [vmem:[%s8440_s11] ss:$0 sm:$0xff] }
 0x996   : > { %6968 = vtanh.f32 %v3698_v7 }
 0x9a3   : > { %v6969_v37 = vpop.eup %6968 }
 0x9a4   : > { %v3700_v21 = vadd.f32 1.0, %v6969_v37 }
 0x9a6   : > { %v3701_v8 = vmul.f32 0.5, %v3700_v21 }
 0x9a8   : > { %v3702_v9 = vmul.f32 %v3701_v8, %v3689_v31 }
 0x9aa   : > { %v3706_v3 = vsel %vm3705_vm8, %v3702_v9, 0.0 }
 0x9ab   : > { %3707 = vadd.xlane.f32.xlu1 %v3706_v3 }
 0xa34   : > { %v3708_v61 = vpop.xlane.xlu1 %3707 }
 0xa35   : > { %v3710_v57 = vmul.f32 0.03125, %v3708_v61 }
 0xa37   : > { %v3711_v16 = vsub.f32 %v3702_v9, %v3710_v57 }
 0xa39   : > { %v3712_v39 = vmul.f32 %v3711_v16, %v3711_v16 }
 0xa3b   : > { %v3713_v4 = vsel %vm3705_vm8, %v3712_v39, 0.0 }
 0xa3c   : > { %3714 = vadd.xlane.f32.xlu0 %v3713_v4 }
 0xac5   : > { %v3715_v63 = vpop.xlane.xlu0 %3714 }
 0xac6   : > { %v3716_v54 = vmul.f32 0.03125, %v3715_v63 }
 0xac8   : > { %v3717_v62 = vadd.f32 1e-05, %v3716_v54 }
 0xaca   : > { %6970 = vrsqrt.f32 %v3717_v62 }
 0xad7   : > { %v6971_v44 = vpop.eup %6970 }
 0xad8   : > { %v3719_v58 = vmul.f32 %v6971_v44, %v3711_v16  ;;  %v6836_v44 = vld [vmem:[%s8437_s23 + $0x8] sm:$0xff]  }
 0xada   : > { %v3726_v19 = vmul.f32 %v5953_v13, %v3719_v58  ;;  %v6837_v13 = vld [vmem:[%s8437_s23] sm:$0xff]  }
 0xadc   : > { %v3733_v22 = vadd.f32 %v5954_v34, %v3726_v19 }
 0xade   : > { %v3738_v15 = vpack.c.bf16 %v3733_v22, %v3733_v22 }
 0xae0   : > { %6502 = vmatmul.mubr.msk.bf16.vlgmr.msra.gmra.mxu1 %vm1450_vm3, %v3738_v15  ;;  %v5977_v15 = vld [vmem:[%s8438_s28] ss:$0 sm:$0xff]  ;;  %s8380_s28 = smov 120  }
 0xae1   : > { %6517 = vmatprep.mubr.msk.bf16.mxu1 %vm7114_vm5, %v7113_v10  ;;  %6514 = vmatpush3.bf16.msra.mxu1 %v6832_v23  ;;  %v5978_v23 = vld [vmem:[%s8439_s1] ss:$0 sm:$0xff]  ;;  %s8390_s1 = smov 88  }
 0xae2   : > { %6515 = vmatprep.subr.bf16.mxu1 %v7113_v10 }
 0xae5   : > { %6516 = vmatpush3.bf16.msra.mxu1 %v6834_v36 }
 0xae6   : > { %6529 = vmatprep.subr.bf16.mxu1 %v7113_v10 }
 0xba0   : > { %v3795_v30 = vpop.f32.mrf.mxu1 }
 0xba1   : > { %v3796_v11 = vadd.f32 %v5955_v42, %v3795_v30 }
 0xba2   : > { %v6503_v40 = vpop.f32.mrf.mxu1 }
 0xba3   : > { %v3805_v1 = vrot.slane %v3796_v11, 4  ;;  %v3831_v0 = vpack.c.bf16 %v3796_v11, %v3796_v11 }
 0xba4   : > { %v3798_v12 = vpop.f32.mrf.mxu1 }
 0xba5   : > { %v3806_v6 = vsel %vm3804_vm9, %v3805_v1, %v3796_v11  ;;  %6510 = vmatmul.mubr.msk.bf16.vlgmr.msra.gmra.mxu0 %vm1450_vm3, %v3831_v0 }
 0xba6   : > { %v3807_v46 = vrot.slane %v3806_v6, 4  ;;  %v6504_v47 = vpop.f32.mrf.mxu1  ;;  %6522 = vmatpush3.bf16.msra.mxu0 %v6833_v29  ;;  %6525 = vmatprep.mubr.msk.bf16.mxu0 %vm7114_vm5, %v7113_v10 }
 0xba7   : > { %6523 = vmatprep.subr.bf16.mxu0 %v7113_v10 }
 0xba8   : > { %v3808_v49 = vsel %vm3804_vm9, %v3807_v46, %v3796_v11 }
 0xba9   : > { %v3812_v50 = vrot.slane %v3808_v49, 3  ;;  %v3818_v35 = vrot.slane %v3808_v49, 1 }
 0xbaa   : > { %6524 = vmatpush3.bf16.msra.mxu0 %v6835_v56 }
 0xbab   : > { %v3814_v32 = vsel %vm3803_vm10, %v3812_v50, 0.0  ;;  %v3820_v51 = vsel %vm3815_vm11, %v3818_v35, 0.0  ;;  %6537 = vmatprep.subr.bf16.mxu0 %v7113_v10 }
 0xbac   : > { %v3825_v55 = vpack.c.bf16 %v3814_v32, %v3814_v32  ;;  %v3947_v18 = vpack.c.bf16 %v3820_v51, %v3820_v51 }
 0xbae   : > { %6518 = vmatmul.mubr.msk.bf16.vlgmr.msra.gmra.mxu1 %vm1450_vm3, %v3825_v55  ;;  %6526 = vmatmul.mubr.msk.bf16.vlgmr.msra.gmra.mxu0 %vm1450_vm3, %v3947_v18 }
 0xbaf   : > { %6533 = vmatprep.mubr.msk.bf16.mxu1 %vm7114_vm5, %v7113_v10  ;;  %6539 = vmatprep.mubr.msk.bf16.mxu0 %vm7114_vm5, %v7113_v10 }
 0xbb0   : > { %6530 = vmatpush3.bf16.msra.mxu1 %v6836_v44 }
 0xbb1   : > { %6531 = vmatprep.subr.bf16.mxu1 %v7113_v10 }
 0xbb4   : > { %6532 = vmatpush3.bf16.msra.mxu1 %v6837_v13 }
 0xbb5   : > { %6543 = vmatprep.subr.bf16.mxu1 %v7113_v10 }
 0xc65   : > { %v3881_v52 = vpop.f32.mrf.mxu0 }
 0xc67   : > { %v6511_v14 = vpop.f32.mrf.mxu0 }
 0xc69   : > { %v3884_v53 = vpop.f32.mrf.mxu0 }
 0xc6b   : > { %v6512_v38 = vpop.f32.mrf.mxu0 }
 0xc6e   : > { %v3936_v31 = vpop.f32.mrf.mxu1  ;;  %v3997_v59 = vpop.f32.mrf.mxu0 }
 0xc6f   : > { %v3937_v5 = vadd.f32 %v3936_v31, %v3881_v52 }
 0xc70   : > { %v6519_v41 = vpop.f32.mrf.mxu1  ;;  %v6527_v60 = vpop.f32.mrf.mxu0 }
 0xc71   : > { %v4003_v20 = vadd.f32 %v3997_v59, %v3937_v5 }
 0xc72   : > { %v3939_v2 = vpop.f32.mrf.mxu1  ;;  %v4000_v27 = vpop.f32.mrf.mxu0 }
 0xc73   : > { %v4011_v48 = vadd.f32 %v5976_v24, %v4003_v20 }
 0xc74   : > { %v6520_v45 = vpop.f32.mrf.mxu1  ;;  %v6528_v7 = vpop.f32.mrf.mxu0 }
 0xc75   : > { %v4012_v37 = vmul.f32 %v4011_v48, %v4011_v48 }
 0xc77   : > { %v4013_v21 = vmul.f32 %v4012_v37, %v4011_v48 }
 0xc79   : > { %v4014_v8 = vmul.f32 0.044715, %v4013_v21 }
 0xc7b   : > { %v4015_v9 = vadd.f32 %v4014_v8, %v4011_v48 }
 0xc7d   : > { %v4016_v3 = vmul.f32 0.7978846, %v4015_v9 }
 0xc7f   : > { %6972 = vtanh.f32 %v4016_v3 }
 0xc8c   : > { %v6973_v61 = vpop.eup %6972 }
 0xc8d   : > { %v4018_v57 = vadd.f32 1.0, %v6973_v61 }
 0xc8f   : > { %v4019_v16 = vmul.f32 0.5, %v4018_v57 }
 0xc91   : > { %v4020_v39 = vmul.f32 %v4019_v16, %v4011_v48 }
 0xc93   : > { %v4021_v4 = vadd.f32 %v4020_v39, %v3796_v11 }
 0xc95   : > { %v4024_v28 = vsel %vm3705_vm8, %v4021_v4, 0.0 }
 0xc96   : > { %4025 = vadd.xlane.f32.xlu1 %v4024_v28 }
 0xd1f   : > { %v4026_v26 = vpop.xlane.xlu1 %4025 }
 0xd20   : > { %v4027_v17 = vmul.f32 0.03125, %v4026_v26 }
 0xd22   : > { %v4028_v63 = vsub.f32 %v4021_v4, %v4027_v17 }
 0xd24   : > { %v4029_v54 = vmul.f32 %v4028_v63, %v4028_v63 }
 0xd26   : > { %v4030_v62 = vsel %vm3705_vm8, %v4029_v54, 0.0 }
 0xd27   : > { %4031 = vadd.xlane.f32.xlu1 %v4030_v62 }
 0xdb0   : > { %v4032_v58 = vpop.xlane.xlu1 %4031 }
 0xdb1   : > { %v4033_v34 = vmul.f32 0.03125, %v4032_v58 }
 0xdb3   : > { %v4034_v19 = vadd.f32 1e-05, %v4033_v34 }
 0xdb5   : > { %6974 = vrsqrt.f32 %v4034_v19 }
 0xdc2   : > { %v6975_v22 = vpop.eup %6974 }
 0xdc3   : > { %v4036_v43 = vmul.f32 %v6975_v22, %v4028_v63 }
 0xdc5   : > { %v4043_v36 = vmul.f32 %v5977_v15, %v4036_v43 }
 0xdc7   : > { %v8067_v42 = vadd.f32 %v5978_v23, %v4043_v36 }
 0xdc9   : > { %v4056_v30 = vpack.c.bf16 %v8067_v42, %v8067_v42  ;;  %4051 = vst.msk [vmem:[%s8071_s8] sm:$0xf] %vm3705_vm8, %v8067_v42 }
 0xdcb   : > { %6534 = vmatmul.mubr.msk.bf16.vlgmr.msra.gmra.mxu1 %vm1450_vm3, %v4056_v30 }
 0xdcc   : > { %6545 = vmatprep.mubr.msk.bf16.mxu1 %vm7114_vm5, %v7113_v10 }
 0xe8b   : > { %v4113_v11 = vpop.f32.mrf.mxu1 }
 0xe8c   : > { %v4114_v40 = vadd.f32 %v5979_v25, %v4113_v11 }
 0xe8d   : > { %v6535_v29 = vpop.f32.mrf.mxu1 }
 0xe8e   : > { %v4119_v1 = vmul.f32 0.35355338, %v4114_v40  ;;  %v8080_v0 = vpack.c.bf16 %v4114_v40, %v4114_v40 }
 0xe8f   : > { %v4116_v12 = vpop.f32.mrf.mxu1 }
 0xe90   : > { %v4120_v33 = vpack.c.bf16 %v4119_v1, %v4119_v1  ;;  %4123 = vrot.lane.b32.xlu1 %v8080_v0, %s8376_s5  ;;  %s8379_s5 = smov 104  }
 0xe91   : > { %v6536_v6 = vpop.f32.mrf.mxu1 }
 0xe92   : > { %4236 = vrot.lane.b32.xlu0 %v4120_v33, %s8380_s28  ;;  %s8381_s28 = smov 48  }
 0xe94   : > { %4238 = vrot.lane.b32.xlu1 %v8080_v0, %s8390_s1  ;;  %s8446_s1 = sld [smem:[#allocation30_spill]] }
 0xe98   : > { %4348 = vrot.lane.b32.xlu1 %v8080_v0, %s8378_s3  ;;  %s8383_s3 = smov 64  }
 0xe9c   : > { %4346 = vrot.lane.b32.xlu1 %v4120_v33, %s8389_s9  ;;  %s8445_s9 = sld [smem:[#allocation27_spill]] }
 0xea0   : > { %4458 = vrot.lane.b32.xlu1 %v8080_v0, %s8377_s12  ;;  %s8386_s12 = smov 56  }
 0xea4   : > { %4456 = vrot.lane.b32.xlu1 %v4120_v33, %s8379_s5  ;;  %s8382_s5 = smov 40  }
 0xf02   : > { %v4124_v46 = vpop.permute.xlu1 %4123 }
 0xf03   : > { %v4130_v47 = vsel %vm4125_vm12, %v4124_v46, 0 }
 0xf04   : > { %6538 = vmatpush3.bf16.xpose.msra.mxu0 %v4130_v47  ;;  %v4237_v35 = vpop.permute.xlu0 %4236 }
 0xf05   : > { %6549 = vmatprep.subr.bf16.mxu0 %v7113_v10 }
 0xf06   : > { %v4239_v56 = vpop.permute.xlu1 %4238 }
 0xf07   : > { %v4244_v49 = vsel %vm4125_vm12, %v4239_v56, 0 }
 0xf0a   : > { %v4349_v50 = vpop.permute.xlu1 %4348 }
 0xf0b   : > { %6540 = vmatmul.mubr.msk.bf16.vlgmr.msra.gmra.mxu0 %vm4125_vm12, %v4120_v33  ;;  %v4354_v51 = vsel %vm4125_vm12, %v4349_v50, 0 }
 0xf0c   : > { %6550 = vmatpush3.bf16.xpose.msra.mxu0 %v4244_v49  ;;  %6551 = vmatprep.mubr.msk.bf16.mxu0 %vm7114_vm5, %v7113_v10 }
 0xf0d   : > { %6561 = vmatprep.subr.bf16.mxu0 %v7113_v10 }
 0xf0e   : > { %v4347_v32 = vpop.permute.xlu1 %4346 }
 0xf12   : > { %v4459_v55 = vpop.permute.xlu1 %4458 }
 0xf13   : > { %6552 = vmatmul.mubr.msk.bf16.vlgmr.msra.gmra.mxu0 %vm4125_vm12, %v4237_v35  ;;  %v4464_v18 = vsel %vm4125_vm12, %v4459_v55, 0 }
 0xf14   : > { %6562 = vmatpush3.bf16.xpose.msra.mxu0 %v4354_v51  ;;  %6563 = vmatprep.mubr.msk.bf16.mxu0 %vm7114_vm5, %v7113_v10 }
 0xf15   : > { %6573 = vmatprep.subr.bf16.mxu0 %v7113_v10 }
 0xf16   : > { %v4457_v52 = vpop.permute.xlu1 %4456 }
 0xf1b   : > { %6564 = vmatmul.mubr.msk.bf16.vlgmr.msra.gmra.mxu0 %vm4125_vm12, %v4347_v32 }
 0xf1c   : > { %6574 = vmatpush3.bf16.xpose.msra.mxu0 %v4464_v18  ;;  %6575 = vmatprep.mubr.msk.bf16.mxu0 %vm7114_vm5, %v7113_v10 }
 0xf1d   : > { %6585 = vmatprep.subr.bf16.mxu0 %v7113_v10 }
 0xf23   : > { %6576 = vmatmul.mubr.msk.bf16.vlgmr.msra.gmra.mxu0 %vm4125_vm12, %v4457_v52 }
 0xf24   : > { %6589 = vmatprep.mubr.msk.bf16.mxu0 %vm7114_vm5, %v7113_v10 }
 0xfcb   : > { %v4166_v14 = vpop.f32.mrf.mxu0 }
 0xfcc   : > { %v4173_v53 = vsel %vm4172_vm13, %v4166_v14, -inf }
 0xfcd   : > { %4174 = vmax.xlane.f32.xlu1 %v4173_v53  ;;  %v6541_v38 = vpop.f32.mrf.mxu0 }
 0xfcf   : > { %v4169_v31 = vpop.f32.mrf.mxu0 }
 0xfd1   : > { %v6542_v59 = vpop.f32.mrf.mxu0 }
 0xfd3   : > { %v4280_v5 = vpop.f32.mrf.mxu0 }
 0xfd4   : > { %v4286_v24 = vsel %vm4172_vm13, %v4280_v5, -inf }
 0xfd5   : > { %4287 = vmax.xlane.f32.xlu0 %v4286_v24  ;;  %v6553_v41 = vpop.f32.mrf.mxu0 }
 0xfd7   : > { %v4283_v60 = vpop.f32.mrf.mxu0 }
 0xfd9   : > { %v6554_v20 = vpop.f32.mrf.mxu0 }
 0xfdb   : > { %v4390_v2 = vpop.f32.mrf.mxu0 }
 0xfdc   : > { %v4396_v27 = vsel %vm4172_vm13, %v4390_v2, -inf }
 0xfdd   : > { %4397 = vmax.xlane.f32.xlu0 %v4396_v27  ;;  %v6565_v48 = vpop.f32.mrf.mxu0 }
 0xfdf   : > { %v4393_v45 = vpop.f32.mrf.mxu0 }
 0xfe1   : > { %v6566_v7 = vpop.f32.mrf.mxu0 }
 0xfe3   : > { %v4500_v37 = vpop.f32.mrf.mxu0 }
 0xfe4   : > { %v4506_v21 = vsel %vm4172_vm13, %v4500_v37, -inf }
 0xfe5   : > { %4507 = vmax.xlane.f32.xlu1 %v4506_v21  ;;  %v6577_v8 = vpop.f32.mrf.mxu0 }
 0xfe7   : > { %v4503_v9 = vpop.f32.mrf.mxu0 }
 0xfe9   : > { %v6578_v3 = vpop.f32.mrf.mxu0 }
0x1056   : > { %v4175_v61 = vpop.xlane.xlu1 %4174 }
0x1057   : > { %v4176_v57 = vsub.f32 %v4166_v14, %v4175_v61 }
0x1059   : > { %v4177_v16 = vmul.f32 1.442695, %v4176_v57 }
0x105b   : > { %6976 = vpow2.f32 %v4177_v16 }
0x105e   : > { %v4288_v39 = vpop.xlane.xlu0 %4287 }
0x105f   : > { %v4289_v4 = vsub.f32 %v4280_v5, %v4288_v39 }
0x1061   : > { %v4290_v28 = vmul.f32 1.442695, %v4289_v4 }
0x1063   : > { %6978 = vpow2.f32 %v4290_v28 }
0x1066   : > { %v4398_v26 = vpop.xlane.xlu0 %4397 }
0x1067   : > { %v4399_v17 = vsub.f32 %v4390_v2, %v4398_v26 }
0x1068   : > { %v6977_v63 = vpop.eup %6976 }
0x1069   : > { %v4400_v54 = vmul.f32 1.442695, %v4399_v17  ;;  %v4179_v62 = vsel %vm4172_vm13, %v6977_v63, 0.0 }
0x106a   : > { %4180 = vadd.xlane.f32.xlu0 %v4179_v62 }
0x106b   : > { %6980 = vpow2.f32 %v4400_v54 }
0x106e   : > { %v4508_v19 = vpop.xlane.xlu1 %4507 }
0x106f   : > { %v4509_v22 = vsub.f32 %v4500_v37, %v4508_v19 }
0x1070   : > { %v6979_v44 = vpop.eup %6978 }
0x1071   : > { %v4292_v13 = vsel %vm4172_vm13, %v6979_v44, 0.0  ;;  %v4510_v15 = vmul.f32 1.442695, %v4509_v22 }
0x1072   : > { %4293 = vadd.xlane.f32.xlu1 %v4292_v13 }
0x1073   : > { %6982 = vpow2.f32 %v4510_v15 }
0x1078   : > { %v6981_v58 = vpop.eup %6980 }
0x1079   : > { %v4402_v34 = vsel %vm4172_vm13, %v6981_v58, 0.0 }
0x107a   : > { %4403 = vadd.xlane.f32.xlu0 %v4402_v34 }
0x1080   : > { %v6983_v43 = vpop.eup %6982 }
0x1081   : > { %v4512_v23 = vsel %vm4172_vm13, %v6983_v43, 0.0 }
0x1083   : > { %4298 = vrot.lane.b32.xlu1 %v8080_v0, %s8386_s12  ;;  %s8442_s12 = sld [smem:[#allocation25_spill]] }
0x1089   : > { %v5991_v17 = vld [vmem:[%s8442_s12] ss:$0 sm:$0xff] }
0x1090   : > { %4185 = vrot.lane.b32.xlu0 %v8080_v0, %s8383_s3  ;;  %s8388_s3 = smov 16  }
0x1094   : > { %4518 = vrot.lane.b32.xlu0 %v8080_v0, %s8382_s5  ;;  %s8385_s5 = smov 8  }
0x10a7   : > { %4513 = vadd.xlane.f32.xlu1 %v4512_v23 }
0x10b8   : > { %4408 = vrot.lane.b32.xlu1 %v8080_v0, %s8381_s28  ;;  %s8441_s28 = sld [smem:[#allocation24_spill]] }
0x10be   : > { %v6838_v2 = vld [vmem:[%s8441_s28 + $0x8] sm:$0xff]   ;;  %v6839_v27 = vld [vmem:[%s8441_s28] sm:$0xff]  }
0x10bf   : > { %6586 = vmatpush3.bf16.msra.mxu0 %v6838_v2 }
0x10c0   : > { %6587 = vmatprep.subr.bf16.mxu0 %v7113_v10 }
0x10c3   : > { %6588 = vmatpush3.bf16.msra.mxu0 %v6839_v27 }
0x10c4   : > { %6601 = vmatprep.subr.bf16.mxu0 %v7113_v10 }
0x10f3   : > { %v4181_v36 = vpop.xlane.xlu0 %4180 }
0x10f4   : > { %6984 = vrcp.f32 %v4181_v36 }
0x10fb   : > { %v4294_v30 = vpop.xlane.xlu1 %4293 }
0x10fc   : > { %6986 = vrcp.f32 %v4294_v30 }
0x10ff   : > { %v4299_v12 = vpop.permute.xlu1 %4298 }
0x1100   : > { %v4304_v0 = vsel %vm4191_vm14, %v4299_v12, 0  ;;  %v5996_v12 = vld [vmem:[%s8445_s9] ss:$0 sm:$0xff] }
0x1101   : > { %v6985_v25 = vpop.eup %6984 }
0x1102   : > { %v4183_v40 = vmul.f32 %v6985_v25, %v6977_v63 }
0x1103   : > { %v4404_v11 = vpop.xlane.xlu0 %4403 }
0x1104   : > { %v4184_v33 = vpack.c.bf16 %v4183_v40, %v4183_v40  ;;  %6988 = vrcp.f32 %v4404_v11 }
0x1107   : > { %v4186_v29 = vpop.permute.xlu0 %4185 }
0x1108   : > { %v4193_v1 = vsel %vm4191_vm14, %v4186_v29, 0 }
0x1109   : > { %6544 = vmatpush3.bf16.msra.mxu1 %v4193_v1  ;;  %v6987_v6 = vpop.eup %6986 }
0x110a   : > { %6555 = vmatprep.subr.bf16.mxu1 %v7113_v10  ;;  %v4296_v46 = vmul.f32 %v6987_v6, %v6979_v44 }
0x110b   : > { %v4519_v51 = vpop.permute.xlu0 %4518 }
0x110c   : > { %6546 = vmatmul.mubr.msk.bf16.vlgmr.msra.gmra.mxu1 %vm4187_vm15, %v4184_v33  ;;  %v4297_v47 = vpack.c.bf16 %v4296_v46, %v4296_v46  ;;  %v4524_v18 = vsel %vm4191_vm14, %v4519_v51, 0  ;;  %v6842_v46 = vld [vmem:[%s8446_s1 + $0x18] sm:$0xff]  }
0x110d   : > { %6556 = vmatpush3.bf16.msra.mxu1 %v4304_v0  ;;  %6557 = vmatprep.mubr.msk.bf16.mxu1 %vm7114_vm5, %v7113_v10 }
0x110e   : > { %6567 = vmatprep.subr.bf16.mxu1 %v7113_v10 }
0x1111   : > { %v6989_v56 = vpop.eup %6988 }
0x1112   : > { %v4406_v50 = vmul.f32 %v6989_v56, %v6981_v58  ;;  %v6844_v56 = vld [vmem:[%s8446_s1 + $0x8] sm:$0xff]  }
0x1114   : > { %6558 = vmatmul.mubr.msk.bf16.vlgmr.msra.gmra.mxu1 %vm4187_vm15, %v4297_v47  ;;  %v4407_v55 = vpack.c.bf16 %v4406_v50, %v4406_v50  ;;  %v6843_v47 = vld [vmem:[%s8446_s1 + $0x10] sm:$0xff]   ;;  %v5997_v50 = vld [vmem:[%s8447_s13] ss:$0 sm:$0xff] }
0x1115   : > { %6569 = vmatprep.mubr.msk.bf16.mxu1 %vm7114_vm5, %v7113_v10 }
0x1130   : > { %v4514_v49 = vpop.xlane.xlu1 %4513 }
0x1131   : > { %6990 = vrcp.f32 %v4514_v49  ;;  %v6845_v49 = vld [vmem:[%s8446_s1] sm:$0xff]  }
0x1134   : > { %v4409_v35 = vpop.permute.xlu1 %4408 }
0x1135   : > { %v4414_v32 = vsel %vm4191_vm14, %v4409_v35, 0 }
0x1136   : > { %6568 = vmatpush3.bf16.msra.mxu1 %v4414_v32 }
0x1137   : > { %6579 = vmatprep.subr.bf16.mxu1 %v7113_v10 }
0x1139   : > { %6570 = vmatmul.mubr.msk.bf16.vlgmr.msra.gmra.mxu1 %vm4187_vm15, %v4407_v55 }
0x113a   : > { %6580 = vmatpush3.bf16.msra.mxu1 %v4524_v18  ;;  %6581 = vmatprep.mubr.msk.bf16.mxu1 %vm7114_vm5, %v7113_v10 }
0x113b   : > { %6593 = vmatprep.subr.bf16.mxu1 %v7113_v10 }
0x113e   : > { %v6991_v52 = vpop.eup %6990 }
0x113f   : > { %v4516_v14 = vmul.f32 %v6991_v52, %v6983_v43 }
0x1141   : > { %v4517_v53 = vpack.c.bf16 %v4516_v14, %v4516_v14 }
0x1143   : > { %6582 = vmatmul.mubr.msk.bf16.vlgmr.msra.gmra.mxu1 %vm4187_vm15, %v4517_v53 }
0x1144   : > { %6597 = vmatprep.mubr.msk.bf16.mxu1 %vm7114_vm5, %v7113_v10 }
0x11cc   : > { %v4229_v38 = vpop.f32.mrf.mxu1 }
0x11ce   : > { %v6547_v31 = vpop.f32.mrf.mxu1 }
0x11d0   : > { %v4232_v59 = vpop.f32.mrf.mxu1 }
0x11d2   : > { %v6548_v5 = vpop.f32.mrf.mxu1 }
0x11d4   : > { %v4340_v24 = vpop.f32.mrf.mxu1 }
0x11d5   : > { %4567 = vrot.lane.b32.xlu1 %v4340_v24, %s8385_s5  ;;  %s8387_s5 = smov 24  }
0x11d6   : > { %v6559_v41 = vpop.f32.mrf.mxu1 }
0x11d8   : > { %v4343_v60 = vpop.f32.mrf.mxu1 }
0x11da   : > { %v6560_v20 = vpop.f32.mrf.mxu1 }
0x11db   : > { %v6001_v20 = vld [vmem:[%s7275_s20] ss:$0 sm:$0xff] }
0x11f9   : > { %v4450_v48 = vpop.f32.mrf.mxu1 }
0x11fa   : > { %4571 = vrot.lane.b32.xlu0 %v4450_v48, %s8388_s3  ;;  %s8444_s3 = sld [smem:[#allocation26_spill]] }
0x11fb   : > { %v6571_v45 = vpop.f32.mrf.mxu1 }
0x11fd   : > { %v4453_v7 = vpop.f32.mrf.mxu1 }
0x11ff   : > { %v6572_v37 = vpop.f32.mrf.mxu1 }
0x1200   : > { %v5995_v29 = vld [vmem:[%s8444_s3] ss:$0 sm:$0xff] }
0x1203   : > { %v4560_v21 = vpop.f32.mrf.mxu1 }
0x1204   : > { %4575 = vrot.lane.b32.xlu1 %v4560_v21, %s8387_s5  ;;  %s8443_s5 = sld [smem:[#allocation28_spill]] }
0x1205   : > { %v6583_v8 = vpop.f32.mrf.mxu1 }
0x1207   : > { %v4563_v9 = vpop.f32.mrf.mxu1 }
0x1209   : > { %v6584_v3 = vpop.f32.mrf.mxu1 }
0x120a   : > { %v6840_v36 = vld [vmem:[%s8443_s5 + $0x8] sm:$0xff]   ;;  %v6841_v30 = vld [vmem:[%s8443_s5] sm:$0xff]  }
0x120b   : > { %6594 = vmatpush3.bf16.msra.mxu1 %v6840_v36 }
0x120c   : > { %6595 = vmatprep.subr.bf16.mxu1 %v7113_v10 }
0x120f   : > { %6596 = vmatpush3.bf16.msra.mxu1 %v6841_v30 }
0x1210   : > { %6613 = vmatprep.subr.bf16.mxu1 %v7113_v10 }
0x1247   : > { %v4568_v61 = vpop.permute.xlu1 %4567 }
0x1248   : > { %v4578_v16 = vsel %vm4125_vm12, %v4229_v38, %v4568_v61 }
0x126c   : > { %v4572_v57 = vpop.permute.xlu0 %4571 }
0x126d   : > { %v4580_v39 = vsel %vm4579_vm0, %v4578_v16, %v4572_v57  ;;  %v6846_v16 = vld [vmem:[%s8437_s23 + $0x18] sm:$0xff]  }
0x1276   : > { %v4576_v4 = vpop.permute.xlu1 %4575 }
0x1277   : > { %v4582_v28 = vsel %vm4581_vm1, %v4580_v39, %v4576_v4  ;;  %v6847_v39 = vld [vmem:[%s8437_s23 + $0x10] sm:$0xff]   ;;  %s8453_s23 = smov 80  }
0x1278   : > { %v4587_v26 = vpack.c.bf16 %v4582_v28, %v4582_v28 }
0x127a   : > { %6590 = vmatmul.mubr.msk.bf16.vlgmr.msra.gmra.mxu0 %vm1450_vm3, %v4587_v26 }
0x127b   : > { %6609 = vmatprep.mubr.msk.bf16.mxu0 %vm7114_vm5, %v7113_v10  ;;  %6602 = vmatpush3.bf16.msra.mxu0 %v6842_v46 }
0x127c   : > { %6603 = vmatprep.subr.bf16.mxu0 %v7113_v10 }
0x127f   : > { %6604 = vmatpush3.bf16.msra.mxu0 %v6843_v47 }
0x1280   : > { %6605 = vmatprep.subr.bf16.mxu0 %v7113_v10 }
0x1283   : > { %6606 = vmatpush3.bf16.msra.mxu0 %v6844_v56 }
0x1284   : > { %6607 = vmatprep.subr.bf16.mxu0 %v7113_v10 }
0x1287   : > { %6608 = vmatpush3.bf16.msra.mxu0 %v6845_v49 }
0x1288   : > { %6627 = vmatprep.subr.bf16.mxu0 %v7113_v10 }
0x133a   : > { %v4644_v63 = vpop.f32.mrf.mxu0 }
0x133b   : > { %v4645_v54 = vadd.f32 %v5991_v17, %v4644_v63  ;;  %v6007_v63 = vld [vmem:[%s7280_s27] ss:$0 sm:$0xff] }
0x133c   : > { %v6591_v62 = vpop.f32.mrf.mxu0 }
0x133d   : > { %v4650_v44 = vadd.f32 %v4645_v54, %v8067_v42  ;;  %v6008_v62 = vld [vmem:[%s7285_s4] ss:$0 sm:$0xff] }
0x133e   : > { %v4647_v13 = vpop.f32.mrf.mxu0 }
0x133f   : > { %v4653_v58 = vsel %vm3705_vm8, %v4650_v44, 0.0 }
0x1340   : > { %4654 = vadd.xlane.f32.xlu0 %v4653_v58  ;;  %v6592_v34 = vpop.f32.mrf.mxu0 }
0x1341   : > { %v6015_v34 = vld [vmem:[%s8440_s11 + $0x1] ss:$0 sm:$0xff]  ;;  %s8452_s11 = smov 104  }
0x13c9   : > { %v4655_v19 = vpop.xlane.xlu0 %4654 }
0x13ca   : > { %v4656_v22 = vmul.f32 0.03125, %v4655_v19 }
0x13cc   : > { %v4657_v15 = vsub.f32 %v4650_v44, %v4656_v22 }
0x13ce   : > { %v4658_v43 = vmul.f32 %v4657_v15, %v4657_v15 }
0x13d0   : > { %v4659_v23 = vsel %vm3705_vm8, %v4658_v43, 0.0 }
0x13d1   : > { %4660 = vadd.xlane.f32.xlu1 %v4659_v23 }
0x145a   : > { %v4661_v42 = vpop.xlane.xlu1 %4660 }
0x145b   : > { %v4662_v25 = vmul.f32 0.03125, %v4661_v42 }
0x145d   : > { %v4663_v11 = vadd.f32 1e-05, %v4662_v25 }
0x145f   : > { %6992 = vrsqrt.f32 %v4663_v11 }
0x146c   : > { %v6993_v40 = vpop.eup %6992 }
0x146d   : > { %v4665_v1 = vmul.f32 %v6993_v40, %v4657_v15 }
0x146f   : > { %v4672_v33 = vmul.f32 %v5995_v29, %v4665_v1 }
0x1471   : > { %v4679_v6 = vadd.f32 %v5996_v12, %v4672_v33 }
0x1473   : > { %v4684_v0 = vpack.c.bf16 %v4679_v6, %v4679_v6 }
0x1475   : > { %6598 = vmatmul.mubr.msk.bf16.vlgmr.msra.gmra.mxu1 %vm1450_vm3, %v4684_v0 }
0x1476   : > { %6617 = vmatprep.mubr.msk.bf16.mxu1 %vm7114_vm5, %v7113_v10  ;;  %6614 = vmatpush3.bf16.msra.mxu1 %v6846_v16 }
0x1477   : > { %6615 = vmatprep.subr.bf16.mxu1 %v7113_v10 }
0x147a   : > { %6616 = vmatpush3.bf16.msra.mxu1 %v6847_v39 }
0x147b   : > { %6621 = vmatprep.subr.bf16.mxu1 %v7113_v10 }
0x1535   : > { %v4741_v35 = vpop.f32.mrf.mxu1 }
0x1536   : > { %v4742_v32 = vadd.f32 %v5997_v50, %v4741_v35 }
0x1537   : > { %v6599_v51 = vpop.f32.mrf.mxu1 }
0x1538   : > { %v4747_v55 = vmul.f32 %v4742_v32, %v4742_v32 }
0x1539   : > { %v4744_v18 = vpop.f32.mrf.mxu1 }
0x153a   : > { %v4748_v52 = vmul.f32 %v4747_v55, %v4742_v32 }
0x153b   : > { %v6600_v14 = vpop.f32.mrf.mxu1 }
0x153c   : > { %v4749_v53 = vmul.f32 0.044715, %v4748_v52 }
0x153e   : > { %v4750_v38 = vadd.f32 %v4749_v53, %v4742_v32 }
0x1540   : > { %v4751_v31 = vmul.f32 0.7978846, %v4750_v38 }
0x1542   : > { %6994 = vtanh.f32 %v4751_v31 }
0x154f   : > { %v6995_v59 = vpop.eup %6994 }
0x1550   : > { %v4753_v5 = vadd.f32 1.0, %v6995_v59 }
0x1552   : > { %v4754_v24 = vmul.f32 0.5, %v4753_v5 }
0x1554   : > { %v4755_v41 = vmul.f32 %v4754_v24, %v4742_v32 }
0x1556   : > { %v4764_v60 = vpack.c.bf16 %v4755_v41, %v4755_v41 }
0x1558   : > { %6610 = vmatmul.mubr.msk.bf16.vlgmr.msra.gmra.mxu0 %vm4796_vm2, %v4764_v60 }
0x1559   : > { %6629 = vmatprep.mubr.msk.bf16.mxu0 %vm7114_vm5, %v7113_v10 }
0x1618   : > { %v4834_v2 = vpop.f32.mrf.mxu0 }
0x1619   : > { %v4835_v27 = vadd.f32 %v6001_v20, %v4834_v2 }
0x161a   : > { %v6611_v48 = vpop.f32.mrf.mxu0 }
0x161b   : > { %v4840_v45 = vadd.f32 %v4835_v27, %v4679_v6 }
0x161c   : > { %v4837_v7 = vpop.f32.mrf.mxu0 }
0x161d   : > { %v4843_v37 = vsel %vm3705_vm8, %v4840_v45, 0.0 }
0x161e   : > { %4844 = vadd.xlane.f32.xlu0 %v4843_v37  ;;  %v6612_v21 = vpop.f32.mrf.mxu0 }
0x16a7   : > { %v4845_v8 = vpop.xlane.xlu0 %4844 }
0x16a8   : > { %v4846_v9 = vmul.f32 0.03125, %v4845_v8 }
0x16aa   : > { %v4847_v3 = vsub.f32 %v4840_v45, %v4846_v9 }
0x16ac   : > { %v4848_v61 = vmul.f32 %v4847_v3, %v4847_v3 }
0x16ae   : > { %v4849_v57 = vsel %vm3705_vm8, %v4848_v61, 0.0 }
0x16af   : > { %4850 = vadd.xlane.f32.xlu0 %v4849_v57 }
0x1738   : > { %v4851_v4 = vpop.xlane.xlu0 %4850 }
0x1739   : > { %v4852_v28 = vmul.f32 0.03125, %v4851_v4 }
0x173b   : > { %v4853_v26 = vadd.f32 1e-05, %v4852_v28 }
0x173d   : > { %6996 = vrsqrt.f32 %v4853_v26 }
0x174a   : > { %v6997_v17 = vpop.eup %6996 }
0x174b   : > { %v4855_v54 = vmul.f32 %v6997_v17, %v4847_v3 }
0x174d   : > { %v4862_v44 = vmul.f32 %v6007_v63, %v4855_v54 }
0x174f   : > { %v8196_v13 = vadd.f32 %v6008_v62, %v4862_v44 }
0x1751   : > { %v4877_v58 = vpack.c.bf16 %v8196_v13, %v8196_v13  ;;  %6009 = vst.msk [vmem:[%s8071_s8 + $0x4] sm:$0xf] %vm3705_vm8, %v8196_v13 }
0x1753   : > { %6618 = vmatmul.mubr.msk.bf16.vlgmr.msra.gmra.mxu1 %vm1450_vm3, %v4877_v58 }
0x1754   : > { %6623 = vmatprep.mubr.msk.bf16.mxu1 %vm7114_vm5, %v7113_v10 }
0x1813   : > { %v4935_v19 = vpop.f32.mrf.mxu1 }
0x1814   : > { %v4936_v22 = vadd.f32 %v6015_v34, %v4935_v19 }
0x1815   : > { %v6619_v15 = vpop.f32.mrf.mxu1 }
0x1816   : > { %v4941_v43 = vmul.f32 0.35355338, %v4936_v22  ;;  %v8207_v23 = vpack.c.bf16 %v4936_v22, %v4936_v22 }
0x1817   : > { %v4938_v36 = vpop.f32.mrf.mxu1 }
0x1818   : > { %5056 = vrot.lane.b32.xlu0 %v8207_v23, %s8448_s14  ;;  %4945 = vrot.lane.b32.xlu1 %v8207_v23, %s8449_s17  ;;  %v4942_v42 = vpack.c.bf16 %v4941_v43, %v4941_v43  ;;  %s8455_s17 = smov 56   ;;  %s8457_s14 = smov 40  }
0x1819   : > { %v6620_v30 = vpop.f32.mrf.mxu1 }
0x181c   : > { %5164 = vrot.lane.b32.xlu0 %v4942_v42, %s8450_s19  ;;  %5054 = vrot.lane.b32.xlu1 %v4942_v42, %s8451_s21  ;;  %s8456_s21 = smov 64   ;;  %s8458_s19 = smov 48  }
0x1820   : > { %5274 = vrot.lane.b32.xlu0 %v4942_v42, %s8452_s11  ;;  %5166 = vrot.lane.b32.xlu1 %v8207_v23, %s8453_s23  ;;  %s8460_s23 = smov 16   ;;  %s8461_s11 = smov 24  }
0x1824   : > { %5276 = vrot.lane.b32.xlu1 %v8207_v23, %s8454_s24  ;;  %s8459_s24 = smov 8  }
0x188a   : > { %v4946_v25 = vpop.permute.xlu1 %4945  ;;  %v5057_v40 = vpop.permute.xlu0 %5056 }
0x188b   : > { %v4951_v11 = vsel %vm4125_vm12, %v4946_v25, 0  ;;  %v5062_v1 = vsel %vm4125_vm12, %v5057_v40, 0 }
0x188c   : > { %6622 = vmatpush3.bf16.xpose.msra.mxu1 %v4951_v11 }
0x188d   : > { %6633 = vmatprep.subr.bf16.mxu1 %v7113_v10 }
0x188e   : > { %v5055_v29 = vpop.permute.xlu1 %5054  ;;  %v5165_v0 = vpop.permute.xlu0 %5164 }
0x1892   : > { %v5167_v12 = vpop.permute.xlu1 %5166  ;;  %v5275_v47 = vpop.permute.xlu0 %5274 }
0x1893   : > { %6624 = vmatmul.mubr.msk.bf16.vlgmr.msra.gmra.mxu1 %vm4125_vm12, %v4942_v42  ;;  %v5172_v33 = vsel %vm4125_vm12, %v5167_v12, 0 }
0x1894   : > { %6634 = vmatpush3.bf16.xpose.msra.mxu1 %v5062_v1  ;;  %6635 = vmatprep.mubr.msk.bf16.mxu1 %vm7114_vm5, %v7113_v10 }
0x1895   : > { %6645 = vmatprep.subr.bf16.mxu1 %v7113_v10 }
0x1896   : > { %v5277_v6 = vpop.permute.xlu1 %5276 }
0x1897   : > { %v5282_v46 = vsel %vm4125_vm12, %v5277_v6, 0 }
0x189b   : > { %6636 = vmatmul.mubr.msk.bf16.vlgmr.msra.gmra.mxu1 %vm4125_vm12, %v5055_v29 }
0x189c   : > { %6646 = vmatpush3.bf16.xpose.msra.mxu1 %v5172_v33  ;;  %6647 = vmatprep.mubr.msk.bf16.mxu1 %vm7114_vm5, %v7113_v10 }
0x189d   : > { %6657 = vmatprep.subr.bf16.mxu1 %v7113_v10 }
0x18a3   : > { %6648 = vmatmul.mubr.msk.bf16.vlgmr.msra.gmra.mxu1 %vm4125_vm12, %v5165_v0 }
0x18a4   : > { %6658 = vmatpush3.bf16.xpose.msra.mxu1 %v5282_v46  ;;  %6659 = vmatprep.mubr.msk.bf16.mxu1 %vm7114_vm5, %v7113_v10 }
0x18a5   : > { %6669 = vmatprep.subr.bf16.mxu1 %v7113_v10 }
0x18ab   : > { %6660 = vmatmul.mubr.msk.bf16.vlgmr.msra.gmra.mxu1 %vm4125_vm12, %v5275_v47 }
0x18ac   : > { %6673 = vmatprep.mubr.msk.bf16.mxu1 %vm7114_vm5, %v7113_v10 }
0x1953   : > { %v4987_v56 = vpop.f32.mrf.mxu1 }
0x1954   : > { %v4993_v49 = vsel %vm4172_vm13, %v4987_v56, -inf }
0x1955   : > { %4994 = vmax.xlane.f32.xlu1 %v4993_v49  ;;  %v6625_v50 = vpop.f32.mrf.mxu1 }
0x1957   : > { %v4990_v35 = vpop.f32.mrf.mxu1 }
0x1959   : > { %v6626_v32 = vpop.f32.mrf.mxu1 }
0x195b   : > { %v5098_v51 = vpop.f32.mrf.mxu1 }
0x195c   : > { %v5104_v55 = vsel %vm4172_vm13, %v5098_v51, -inf }
0x195d   : > { %5105 = vmax.xlane.f32.xlu0 %v5104_v55  ;;  %v6637_v18 = vpop.f32.mrf.mxu1 }
0x195f   : > { %v5101_v52 = vpop.f32.mrf.mxu1 }
0x1961   : > { %v6638_v14 = vpop.f32.mrf.mxu1 }
0x1963   : > { %v5208_v53 = vpop.f32.mrf.mxu1 }
0x1964   : > { %v5214_v38 = vsel %vm4172_vm13, %v5208_v53, -inf }
0x1965   : > { %5215 = vmax.xlane.f32.xlu0 %v5214_v38  ;;  %v6649_v31 = vpop.f32.mrf.mxu1  ;;  %v6849_v38 = vld [vmem:[%s8441_s28 + $0x10] sm:$0xff]  }
0x1967   : > { %v5211_v59 = vpop.f32.mrf.mxu1 }
0x1969   : > { %v6650_v5 = vpop.f32.mrf.mxu1 }
0x196b   : > { %v5318_v24 = vpop.f32.mrf.mxu1 }
0x196c   : > { %v5324_v41 = vsel %vm4172_vm13, %v5318_v24, -inf }
0x196d   : > { %5325 = vmax.xlane.f32.xlu1 %v5324_v41  ;;  %v6661_v60 = vpop.f32.mrf.mxu1 }
0x196f   : > { %v5321_v20 = vpop.f32.mrf.mxu1 }
0x1971   : > { %v6662_v2 = vpop.f32.mrf.mxu1 }
0x19de   : > { %v4995_v27 = vpop.xlane.xlu1 %4994 }
0x19df   : > { %v4996_v48 = vsub.f32 %v4987_v56, %v4995_v27 }
0x19e1   : > { %v4997_v45 = vmul.f32 1.442695, %v4996_v48 }
0x19e3   : > { %6998 = vpow2.f32 %v4997_v45 }
0x19e6   : > { %v5106_v7 = vpop.xlane.xlu0 %5105 }
0x19e7   : > { %v5107_v37 = vsub.f32 %v5098_v51, %v5106_v7 }
0x19e9   : > { %v5108_v21 = vmul.f32 1.442695, %v5107_v37 }
0x19eb   : > { %7000 = vpow2.f32 %v5108_v21 }
0x19ee   : > { %v5216_v8 = vpop.xlane.xlu0 %5215 }
0x19ef   : > { %v5217_v9 = vsub.f32 %v5208_v53, %v5216_v8  ;;  %v6848_v53 = vld [vmem:[%s8441_s28 + $0x18] sm:$0xff]  }
0x19f0   : > { %v6999_v3 = vpop.eup %6998  ;;  %6670 = vmatpush3.bf16.msra.mxu1 %v6848_v53 }
0x19f1   : > { %v5218_v61 = vmul.f32 1.442695, %v5217_v9  ;;  %v4999_v57 = vsel %vm4172_vm13, %v6999_v3, 0.0  ;;  %6671 = vmatprep.subr.bf16.mxu1 %v7113_v10  ;;  %v6032_v9 = vld [vmem:[%s8442_s12 + $0x1] ss:$0 sm:$0xff] }
0x19f2   : > { %5000 = vadd.xlane.f32.xlu0 %v4999_v57 }
0x19f3   : > { %7002 = vpow2.f32 %v5218_v61 }
0x19f4   : > { %6672 = vmatpush3.bf16.msra.mxu1 %v6849_v38 }
0x19f5   : > { %6685 = vmatprep.subr.bf16.mxu1 %v7113_v10 }
0x19f6   : > { %v5326_v26 = vpop.xlane.xlu1 %5325 }
0x19f7   : > { %v5327_v17 = vsub.f32 %v5318_v24, %v5326_v26 }
0x19f8   : > { %v7001_v16 = vpop.eup %7000 }
0x19f9   : > { %v5110_v39 = vsel %vm4172_vm13, %v7001_v16, 0.0  ;;  %v5328_v63 = vmul.f32 1.442695, %v5327_v17 }
0x19fa   : > { %5111 = vadd.xlane.f32.xlu1 %v5110_v39 }
0x19fb   : > { %7004 = vpow2.f32 %v5328_v63 }
0x1a00   : > { %v7003_v4 = vpop.eup %7002 }
0x1a01   : > { %v5220_v28 = vsel %vm4172_vm13, %v7003_v4, 0.0 }
0x1a02   : > { %5221 = vadd.xlane.f32.xlu0 %v5220_v28 }
0x1a08   : > { %v7005_v54 = vpop.eup %7004 }
0x1a09   : > { %v5330_v62 = vsel %vm4172_vm13, %v7005_v54, 0.0 }
0x1a0b   : > { %5116 = vrot.lane.b32.xlu1 %v8207_v23, %s8455_s17  ;;  %s6069_s17 = sshll.u32 %s7313_s0, 6  ;;  %s7129_s0 = smov [#allocation4]  }
0x1a18   : > { %5005 = vrot.lane.b32.xlu0 %v8207_v23, %s8456_s21 }
0x1a1c   : > { %5336 = vrot.lane.b32.xlu0 %v8207_v23, %s8457_s14  ;;  %s5710_s14 = sshll.u32 %s8071_s8, 4  ;;  %s8318_s14 = int_to_ptr.vmem [resolvable:$true] %s5710_s14 }
0x1a2f   : > { %5331 = vadd.xlane.f32.xlu1 %v5330_v62 }
0x1a40   : > { %5226 = vrot.lane.b32.xlu1 %v8207_v23, %s8458_s19  ;;  %s8316_s19 = scalar_lea.hbm %s7290_s6, %s6069_s17 }
0x1a7b   : > { %v5001_v44 = vpop.xlane.xlu0 %5000 }
0x1a7c   : > { %7006 = vrcp.f32 %v5001_v44  ;;  %v6850_v44 = vld [vmem:[%s8443_s5 + $0x18] sm:$0xff]  }
0x1a83   : > { %v5112_v58 = vpop.xlane.xlu1 %5111 }
0x1a84   : > { %7008 = vrcp.f32 %v5112_v58 }
0x1a87   : > { %v5117_v36 = vpop.permute.xlu1 %5116 }
0x1a88   : > { %v5122_v25 = vsel %vm4191_vm14, %v5117_v36, 0  ;;  %v6039_v36 = vld [vmem:[%s8445_s9 + $0x1] ss:$0 sm:$0xff] }
0x1a89   : > { %v7007_v34 = vpop.eup %7006 }
0x1a8a   : > { %v5003_v22 = vmul.f32 %v7007_v34, %v6999_v3 }
0x1a8b   : > { %v5222_v19 = vpop.xlane.xlu0 %5221 }
0x1a8c   : > { %v5004_v30 = vpack.c.bf16 %v5003_v22, %v5003_v22  ;;  %7010 = vrcp.f32 %v5222_v19 }
0x1a8f   : > { %v5006_v15 = vpop.permute.xlu0 %5005 }
0x1a90   : > { %v5011_v43 = vsel %vm4191_vm14, %v5006_v15, 0  ;;  %v6038_v15 = vld [vmem:[%s8444_s3 + $0x1] ss:$0 sm:$0xff] }
0x1a91   : > { %6628 = vmatpush3.bf16.msra.mxu0 %v5011_v43  ;;  %v7009_v42 = vpop.eup %7008 }
0x1a92   : > { %6639 = vmatprep.subr.bf16.mxu0 %v7113_v10  ;;  %v5114_v23 = vmul.f32 %v7009_v42, %v7001_v16 }
0x1a93   : > { %v5337_v6 = vpop.permute.xlu0 %5336 }
0x1a94   : > { %6630 = vmatmul.mubr.msk.bf16.vlgmr.msra.gmra.mxu0 %vm4187_vm15, %v5004_v30  ;;  %v5115_v11 = vpack.c.bf16 %v5114_v23, %v5114_v23  ;;  %v5342_v46 = vsel %vm4191_vm14, %v5337_v6, 0  ;;  %v6852_v23 = vld [vmem:[%s8446_s1 + $0x38] sm:$0xff]  }
0x1a95   : > { %6640 = vmatpush3.bf16.msra.mxu0 %v5122_v25  ;;  %6641 = vmatprep.mubr.msk.bf16.mxu0 %vm7114_vm5, %v7113_v10 }
0x1a96   : > { %6651 = vmatprep.subr.bf16.mxu0 %v7113_v10 }
0x1a99   : > { %v7011_v40 = vpop.eup %7010 }
0x1a9a   : > { %v5224_v1 = vmul.f32 %v7011_v40, %v7003_v4  ;;  %v6854_v40 = vld [vmem:[%s8446_s1 + $0x28] sm:$0xff]  }
0x1a9c   : > { %6642 = vmatmul.mubr.msk.bf16.vlgmr.msra.gmra.mxu0 %vm4187_vm15, %v5115_v11  ;;  %v5225_v0 = vpack.c.bf16 %v5224_v1, %v5224_v1  ;;  %v6853_v11 = vld [vmem:[%s8446_s1 + $0x30] sm:$0xff]   ;;  %v6045_v1 = vld [vmem:[%s8447_s13 + $0x1] ss:$0 sm:$0xff] }
0x1a9d   : > { %6653 = vmatprep.mubr.msk.bf16.mxu0 %vm7114_vm5, %v7113_v10 }
0x1ab8   : > { %v5332_v29 = vpop.xlane.xlu1 %5331 }
0x1ab9   : > { %7012 = vrcp.f32 %v5332_v29  ;;  %v6855_v29 = vld [vmem:[%s8446_s1 + $0x20] sm:$0xff]   ;;  %s7024_s1 = sshll.u32 %s7129_s0, 4  ;;  %s7025_s1 = int_to_ptr.vmem [resolvable:$false] %s7024_s1 }
0x1aba   : > { %s7026_s17 = scalar_lea.vmem %s7025_s1, 384  ;;  %p7027_p0 = scmp.lt.s32.totalorder %s8318_s14, %s7025_s1 }
0x1abc   : > { %v5227_v12 = vpop.permute.xlu1 %5226 }
0x1abd   : > { %v5232_v33 = vsel %vm4191_vm14, %v5227_v12, 0 }
0x1abe   : > { %6652 = vmatpush3.bf16.msra.mxu0 %v5232_v33 }
0x1abf   : > { %6663 = vmatprep.subr.bf16.mxu0 %v7113_v10 }
0x1ac1   : > { %6654 = vmatmul.mubr.msk.bf16.vlgmr.msra.gmra.mxu0 %vm4187_vm15, %v5225_v0 }
0x1ac2   : > { %6664 = vmatpush3.bf16.msra.mxu0 %v5342_v46  ;;  %6665 = vmatprep.mubr.msk.bf16.mxu0 %vm7114_vm5, %v7113_v10 }
0x1ac3   : > { %6677 = vmatprep.subr.bf16.mxu0 %v7113_v10 }
0x1ac6   : > { %v7013_v47 = vpop.eup %7012 }
0x1ac7   : > { %v5334_v56 = vmul.f32 %v7013_v47, %v7005_v54 }
0x1ac9   : > { %v5335_v49 = vpack.c.bf16 %v5334_v56, %v5334_v56 }
0x1acb   : > { %6666 = vmatmul.mubr.msk.bf16.vlgmr.msra.gmra.mxu0 %vm4187_vm15, %v5335_v49 }
0x1acc   : > { %6681 = vmatprep.mubr.msk.bf16.mxu0 %vm7114_vm5, %v7113_v10  ;;  %6678 = vmatpush3.bf16.msra.mxu0 %v6850_v44 }
0x1acd   : > { %6679 = vmatprep.subr.bf16.mxu0 %v7113_v10 }
0x1b54   : > { %v5047_v50 = vpop.f32.mrf.mxu0 }
0x1b56   : > { %v6631_v35 = vpop.f32.mrf.mxu0 }
0x1b58   : > { %v5050_v32 = vpop.f32.mrf.mxu0 }
0x1b5a   : > { %v6632_v51 = vpop.f32.mrf.mxu0 }
0x1b5c   : > { %v5158_v55 = vpop.f32.mrf.mxu0 }
0x1b5d   : > { %5385 = vrot.lane.b32.xlu1 %v5158_v55, %s8459_s24  ;;  %s8462_s24 = sand.u32 1, %s7072_s16  }
0x1b5e   : > { %v6643_v18 = vpop.f32.mrf.mxu0 }
0x1b60   : > { %v5161_v52 = vpop.f32.mrf.mxu0 }
0x1b61   : > { %v6058_v52 = vld [vmem:[%s7275_s20 + $0x1] ss:$0 sm:$0xff] }
0x1b62   : > { %v6644_v14 = vpop.f32.mrf.mxu0 }
0x1b81   : > { %v5268_v31 = vpop.f32.mrf.mxu0 }
0x1b82   : > { %5389 = vrot.lane.b32.xlu0 %v5268_v31, %s8460_s23  ;;  %s8324_s23 = scalar_lea.sflag [#allocation5], %s8462_s24 }
0x1b83   : > { %v6655_v59 = vpop.f32.mrf.mxu0 }
0x1b85   : > { %v5271_v5 = vpop.f32.mrf.mxu0 }
0x1b87   : > { %v6656_v24 = vpop.f32.mrf.mxu0 }
0x1b8b   : > { %v5378_v41 = vpop.f32.mrf.mxu0 }
0x1b8c   : > { %5393 = vrot.lane.b32.xlu1 %v5378_v41, %s8461_s11  ;;  %s7020_s11 = scalar_lea.vmem %s8318_s14, 192 }
0x1b8d   : > { %v6667_v60 = vpop.f32.mrf.mxu0  ;;  %p7021_p11 = scmp.ne.s32.totalorder %s8318_s14, %s7020_s11  ;;  %p7028_p1 = scmp.lt.s32.totalorder %s7026_s17, %s7020_s11 }
0x1b8f   : > { %v5381_v20 = vpop.f32.mrf.mxu0  ;;  %p7022_p12 = pnand %p7021_p11, %p7330_p5  ;;  %p7029_p2 = por %p7028_p1, %p7027_p0 }
0x1b91   : > { %v6668_v2 = vpop.f32.mrf.mxu0  ;;  %p7023_p13 = pneg %p7022_p12 }
0x1b93   : > { %p7030_p3 = pnand %p7029_p2, %p7023_p13 }
0x1bcf   : > { %v5386_v27 = vpop.permute.xlu1 %5385 }
0x1bd0   : > { %v5396_v45 = vsel %vm4125_vm12, %v5047_v50, %v5386_v27 }
0x1bf4   : > { %v5390_v48 = vpop.permute.xlu0 %5389 }
0x1bf5   : > { %v5397_v7 = vsel %vm4579_vm0, %v5396_v45, %v5390_v48 }
0x1bfe   : > { %v5394_v37 = vpop.permute.xlu1 %5393 }
0x1bff   : > { %v5398_v21 = vsel %vm4581_vm1, %v5397_v7, %v5394_v37 }
0x1c00   : > { %v5404_v8 = vpack.c.bf16 %v5398_v21, %v5398_v21  ;;  %v6066_v21 = vld [vmem:[%s7280_s27 + $0x1] ss:$0 sm:$0xff] }
0x1c02   : > { %6674 = vmatmul.mubr.msk.bf16.vlgmr.msra.gmra.mxu1 %vm1450_vm3, %v5404_v8 }
0x1c03   : > { %6693 = vmatprep.mubr.msk.bf16.mxu1 %vm7114_vm5, %v7113_v10  ;;  %6686 = vmatpush3.bf16.msra.mxu1 %v6852_v23 }
0x1c04   : > { %6687 = vmatprep.subr.bf16.mxu1 %v7113_v10 }
0x1c07   : > { %6688 = vmatpush3.bf16.msra.mxu1 %v6853_v11 }
0x1c08   : > { %6689 = vmatprep.subr.bf16.mxu1 %v7113_v10 }
0x1c0b   : > { %6690 = vmatpush3.bf16.msra.mxu1 %v6854_v40 }
0x1c0c   : > { %6691 = vmatprep.subr.bf16.mxu1 %v7113_v10 }
0x1c0f   : > { %6692 = vmatpush3.bf16.msra.mxu1 %v6855_v29 }
0x1cc2   : > { %v5462_v3 = vpop.f32.mrf.mxu1 }
0x1cc3   : > { %v5463_v61 = vadd.f32 %v6032_v9, %v5462_v3  ;;  %v6067_v9 = vld [vmem:[%s7285_s4 + $0x1] ss:$0 sm:$0xff] }
0x1cc4   : > { %v6675_v57 = vpop.f32.mrf.mxu1 }
0x1cc5   : > { %v5468_v16 = vadd.f32 %v5463_v61, %v8196_v13  ;;  %v6851_v13 = vld [vmem:[%s8443_s5 + $0x10] sm:$0xff]  }
0x1cc6   : > { %v5465_v39 = vpop.f32.mrf.mxu1  ;;  %6680 = vmatpush3.bf16.msra.mxu0 %v6851_v13 }
0x1cc7   : > { %v5473_v4 = vsel %vm3705_vm8, %v5468_v16, 0.0 }
0x1cc8   : > { %5474 = vadd.xlane.f32.xlu0 %v5473_v4  ;;  %v6676_v28 = vpop.f32.mrf.mxu1 }
0x1d51   : > { %v5475_v26 = vpop.xlane.xlu0 %5474 }
0x1d52   : > { %v5476_v17 = vmul.f32 0.03125, %v5475_v26 }
0x1d54   : > { %v5477_v63 = vsub.f32 %v5468_v16, %v5476_v17 }
0x1d56   : > { %v5478_v54 = vmul.f32 %v5477_v63, %v5477_v63 }
0x1d58   : > { %v5479_v62 = vsel %vm3705_vm8, %v5478_v54, 0.0 }
0x1d59   : > { %5480 = vadd.xlane.f32.xlu1 %v5479_v62 }
0x1de2   : > { %v5481_v58 = vpop.xlane.xlu1 %5480 }
0x1de3   : > { %v5482_v34 = vmul.f32 0.03125, %v5481_v58 }
0x1de5   : > { %v5483_v19 = vadd.f32 1e-05, %v5482_v34 }
0x1de7   : > { %7014 = vrsqrt.f32 %v5483_v19 }
0x1df4   : > { %v7015_v22 = vpop.eup %7014 }
0x1df5   : > { %v5485_v43 = vmul.f32 %v7015_v22, %v5477_v63 }
0x1df7   : > { %v5492_v30 = vmul.f32 %v6038_v15, %v5485_v43 }
0x1df9   : > { %v5499_v42 = vadd.f32 %v6039_v36, %v5492_v30 }
0x1dfb   : > { %v5505_v25 = vpack.c.bf16 %v5499_v42, %v5499_v42 }
0x1dfd   : > { %6682 = vmatmul.mubr.msk.bf16.vlgmr.msra.gmra.mxu0 %vm1450_vm3, %v5505_v25 }
0x1ebd   : > { %v5563_v12 = vpop.f32.mrf.mxu0 }
0x1ebe   : > { %v5564_v33 = vadd.f32 %v6045_v1, %v5563_v12 }
0x1ebf   : > { %v6683_v6 = vpop.f32.mrf.mxu0 }
0x1ec0   : > { %v5569_v0 = vmul.f32 %v5564_v33, %v5564_v33 }
0x1ec1   : > { %v5566_v46 = vpop.f32.mrf.mxu0 }
0x1ec2   : > { %v5570_v47 = vmul.f32 %v5569_v0, %v5564_v33 }
0x1ec3   : > { %v6684_v56 = vpop.f32.mrf.mxu0 }
0x1ec4   : > { %v5571_v49 = vmul.f32 0.044715, %v5570_v47 }
0x1ec6   : > { %v5572_v50 = vadd.f32 %v5571_v49, %v5564_v33 }
0x1ec8   : > { %v5573_v35 = vmul.f32 0.7978846, %v5572_v50 }
0x1eca   : > { %7016 = vtanh.f32 %v5573_v35 }
0x1ed7   : > { %v7017_v32 = vpop.eup %7016 }
0x1ed8   : > { %v5575_v51 = vadd.f32 1.0, %v7017_v32 }
0x1eda   : > { %v5576_v55 = vmul.f32 0.5, %v5575_v51 }
0x1edc   : > { %v5577_v18 = vmul.f32 %v5576_v55, %v5564_v33 }
0x1ede   : > { %v5587_v10 = vpack.c.bf16 %v5577_v18, %v5577_v18 }
0x1ee0   : > { %6694 = vmatmul.mubr.msk.bf16.vlgmr.msra.gmra.mxu1 %vm4796_vm2, %v5587_v10 }
0x1fa0   : > { %v5657_v14 = vpop.f32.mrf.mxu1 }
0x1fa1   : > { %v5658_v53 = vadd.f32 %v6058_v52, %v5657_v14 }
0x1fa2   : > { %v6695_v38 = vpop.f32.mrf.mxu1 }
0x1fa3   : > { %v5663_v31 = vadd.f32 %v5658_v53, %v5499_v42 }
0x1fa4   : > { %v5660_v59 = vpop.f32.mrf.mxu1 }
0x1fa5   : > { %v5668_v5 = vsel %vm3705_vm8, %v5663_v31, 0.0 }
0x1fa6   : > { %5669 = vadd.xlane.f32.xlu0 %v5668_v5  ;;  %v6696_v24 = vpop.f32.mrf.mxu1 }
0x202f   : > { %v5670_v41 = vpop.xlane.xlu0 %5669 }
0x2030   : > { %v5671_v60 = vmul.f32 0.03125, %v5670_v41 }
0x2032   : > { %v5672_v20 = vsub.f32 %v5663_v31, %v5671_v60 }
0x2034   : > { %v5673_v2 = vmul.f32 %v5672_v20, %v5672_v20 }
0x2036   : > { %v5674_v27 = vsel %vm3705_vm8, %v5673_v2, 0.0 }
0x2037   : > { %5675 = vadd.xlane.f32.xlu0 %v5674_v27 }
0x20c0   : > { %v5676_v48 = vpop.xlane.xlu0 %5675 }
0x20c1   : > { %v5677_v45 = vmul.f32 0.03125, %v5676_v48 }
0x20c3   : > { %v5678_v7 = vadd.f32 1e-05, %v5677_v45 }
0x20c5   : > { %7018 = vrsqrt.f32 %v5678_v7 }
0x20d2   : > { %v7019_v37 = vpop.eup %7018 }
0x20d3   : > { %v5680_v8 = vmul.f32 %v7019_v37, %v5672_v20 }
0x20d5   : > { %v5687_v3 = vmul.f32 %v6066_v21, %v5680_v8 }
0x20d7   : > { %v5694_v61 = vadd.f32 %v6067_v9, %v5687_v3 }
0x20d9   : > { %6068 = vst.msk [vmem:[%s8071_s8 + $0x8] sm:$0xf] %vm3705_vm8, %v5694_v61 }
0x20da   : > { %7033 = shalt.err (!%p7030_p3)
}
0x20db   : > { %s7034_s8 = scalar_lea.hbm %s8316_s19, 192  ;;  %s7038_s24 = scalar_lea.hbm %s7290_s6, 384 }
0x20dc   : > { %p7035_p4 = scmp.ne.s32.totalorder %s8316_s19, %s7034_s8  ;;  %p7039_p9 = scmp.lt.s32.totalorder %s8316_s19, %s7290_s6 }
0x20dd   : > { %p7040_p10 = scmp.lt.s32.totalorder %s7038_s24, %s7034_s8 }
0x20de   : > { %p7036_p7 = pnand %p7035_p4, %p7330_p5 }
0x20df   : > { %p7041_p11 = por %p7040_p10, %p7039_p9 }
0x20e0   : > { %p7037_p8 = pneg %p7036_p7 }
0x20e2   : > { %p7042_p12 = pnand %p7041_p11, %p7037_p8 }
0x20e4   : > { %7045 = shalt.err (!%p7042_p12)
}
0x20e5   : > { %s7130_s1 = smov 128   ;;  %s7131_s11 = smov 4  }
0x20e6   : > { %6700 = dma.vmem_to_hbm [thread:$0]  (%p7330_p5), %s8318_s14, 192, %s8316_s19, %s8324_s23, %s8456_s21, %s7130_s1, %s7131_s11  }
0x20e7 PF: > { %p6706_p13 = scmp.ge.s32.totalorder %s7080_s22, 2  ;;  %s5725_s0 = sand.u32 1, %s7068_s15  }
0x20e8   : > { %s5726_s17 = scalar_lea.sflag [#allocation5], %s5725_s0 }
0x20e9   : > { %p6703_p0 = pnand %p6706_p13, %p7334_p6 }
0x20eb   : > { %p6704_p1 = pneg %p6703_p0 }
0x20ed   : > { %7063 = dma.done.wait (%p6704_p1), %s5726_s17, 192  }
0x20ee   : > { %7065 = vsyncadd (%p6704_p1), %s5726_s17, 4294967104  ;;  %p71_p2 = scmp.ge.s32.totalorder %s7317_s26, 4   ;;  %s8463_s15 = smov %s7072_s16 }
0x20ef   : > { %s8464_s16 = smov %s7076_s18  ;;  %s8465_s18 = smov %s7328_s2 }
0x20f0   : > { %s8466_s22 = smov %s7317_s26  ;;  %73 = sbr.rel (!%p71_p2) target bundleno = 66 (0x42), region = 319 }
0x20f5   :  { %5731 = vsyncpa [#allocation5], 1 }
0x20f6   :  { %5733 = vsyncpa [#allocation5 + $0x1], 1 }

</bundles_post_ra>
